<compile_context>
chip_gen: v5e
topology: v5e:2x2
jax: 0.10.0
libtpu: 0.0.40
codegen_flags: <defaults>
</compile_context>

<pallas_src>
import functools
from types import SimpleNamespace

import jax
import jax.numpy as jnp
from jax.experimental import pallas as pl
from jax.experimental.pallas import tpu as pltpu


# ----------------------------------------------------------------------------
# Pallas kernel: the whole ComplexDecoder stack, one batch element / grid step
# ----------------------------------------------------------------------------
def _decoder_kernel(x_sca_ref, coor_ref, edge_ref, xmask_ref, umask_ref,
                    wqk_ref, wv_ref, wo_ref, wb_ref, wg_ref,
                    bqk_ref, bv_ref, bo_ref, bb_ref, bg_ref,
                    gamma_ref, beta_ref,
                    x_out_ref, coor_hid_ref,
                    *, n_head, only_coor_flags, coor_clamp):
    H = n_head
    L = len(only_coor_flags)
    x = x_sca_ref[0]                         # [N, C]      f32
    coor = coor_ref[0]                       # [N, 3]      f32
    e2 = edge_ref[0]                         # [N*N, De]   bf16 (read once)
    xm = xmask_ref[...]                      # [1, 1, N]   mask over keys j
    um = umask_ref[0]                        # [N, 1]      coordinate update mask

    N, C = x.shape
    inv_h = 1.0 / float(H)

    neg = (1.0 - xm) * (-1e9)                # [1,1,N] -> broadcasts to [H,N,N]

    # ---- Hoisted across layers: edge-scalar attention bias for ALL layers &
    # heads in ONE matmul over the N^2 edge tensor (edge features are carried
    # unchanged through the decoder here), relayout to head-major once, fold
    # in the key-padding mask once.
    bias_f = jnp.dot(e2, wb_ref[...].astype(jnp.bfloat16),
                     preferred_element_type=jnp.float32) + bb_ref[...]   # [N*N, L*H]
    bias_nn = bias_f.reshape(N, N, L * H)                                # minor dim kept
    bias_all = [
        jnp.stack([bias_nn[:, :, l * H + h] for h in range(H)], axis=0) + neg
        for l in range(L)
    ]                                                                    # L x [H,N,N]

    coor_list = []
    for l, only_coor in enumerate(only_coor_flags):     # static, L is small
        wqk_l = wqk_ref[l]                   # [2H, C, dh]  (q heads, then k heads)
        bqk_l = bqk_ref[l]                   # [2H, 1, dh]  (1/sqrt(dh) folded into q)
        wg_l = wg_ref[l]                     # [C, H]
        bg_l = bg_ref[l]                     # [1, H]

        # Fused Q/K head-batched projection: one batched MXU op.
        x_b2 = jnp.broadcast_to(x[None], (2 * H, N, C))
        qk_h = jnp.einsum('hnc,hcd->hnd', x_b2, wqk_l,
                          preferred_element_type=jnp.float32) + bqk_l    # [2H,N,dh]
        q_h = qk_h[:H]                        # leading-dim slices: no relayout
        k_h = qk_h[H:]

        # All-head logits in a single batched matmul (bf16 in, f32 acc).
        # Scale and edge bias + mask are pre-folded.
        logits = jnp.einsum('hnd,hmd->hnm',
                            q_h.astype(jnp.bfloat16),
                            k_h.astype(jnp.bfloat16),
                            preferred_element_type=jnp.float32)          # [H,N,N]
        logits = logits + bias_all[l]

        # One softmax pass over the whole [H, N, N] slab; divide on the EUP.
        m = jnp.max(logits, axis=-1, keepdims=True)
        p = jnp.exp(logits - m)
        attn = p * pl.reciprocal(jnp.sum(p, axis=-1, keepdims=True),
                                 approx=True)                            # [H,N,N]
        attn_b = attn.astype(jnp.bfloat16)

        # Per-node, per-head coordinate gate.
        gate = jax.nn.sigmoid(
            jnp.dot(x, wg_l, preferred_element_type=jnp.float32) + bg_l)  # [N,H]

        # Coordinate messages for every head: single [H*N, N] @ [N, 3] matmul.
        cm = jnp.dot(attn_b.reshape(H * N, N), coor.astype(jnp.bfloat16),
                     preferred_element_type=jnp.float32).reshape(H, N, 3)

        # sum_j a_ij (coor_i - coor_j) = coor_i - (attn @ coor)_i ; head combine
        # is a tiny static VPU-only loop (no MXU / softmax work per head).
        delta = jnp.zeros_like(coor)
        for h in range(H):
            delta = delta + gate[:, h:h + 1] * (coor - cm[h])
        delta = delta * inv_h
        if coor_clamp is not None:
            delta = jnp.clip(delta, -coor_clamp, coor_clamp)
        coor = coor + delta * um
        coor_list.append(coor)

        if not only_coor:
            # Scalar-feature track: skipped statically for only_update_coor
            # layers (no dead MXU work).
            wv_l = wv_ref[l]                 # [H, C, dh]
            bv_l = bv_ref[l]                 # [H, 1, dh]
            wo_l = wo_ref[l]                 # [H, dh, C]
            bo_l = bo_ref[l]                 # [1, C]
            gamma_l = gamma_ref[l]           # [1, C]
            beta_l = beta_ref[l]             # [1, C]

            v_h = jnp.einsum('hnc,hcd->hnd', x_b2[:H], wv_l,
                             preferred_element_type=jnp.float32) + bv_l  # [H,N,dh]
            o_h = jnp.einsum('hnm,hmd->hnd', attn_b, v_h.astype(jnp.bfloat16),
                             preferred_element_type=jnp.float32)         # [H,N,dh]
            # Head merge + output projection as one batched matmul + a leading
            # -dim reduce (no lane concatenate relayout).
            o = jnp.einsum('hnd,hdc->hnc', o_h, wo_l,
                           preferred_element_type=jnp.float32)           # [H,N,C]
            o = jnp.sum(o, axis=0) + bo_l                                # [N,C]

            y = x + o
            mu = jnp.mean(y, axis=-1, keepdims=True)
            var = jnp.mean(jnp.square(y - mu), axis=-1, keepdims=True)
            y = (y - mu) * jax.lax.rsqrt(var + 1e-5)
            x = y * gamma_l + beta_l

    x_out_ref[0] = x
    coor_hid_ref[0] = jnp.stack(coor_list, axis=0)       # [L, N, 3]


# ----------------------------------------------------------------------------
# Wrapper: single pallas_call for the whole decoder stack
# ----------------------------------------------------------------------------
def complex_decoder_pallas(x_sca, coor, edge_sca, x_mask, update_mask, packed,
                           *, n_head, only_coor_flags, coor_clamp):
    B, N, C = x_sca.shape
    De = edge_sca.shape[-1]
    L = len(only_coor_flags)

    # The N^2 edge tensor is the dominant HBM stream: flatten it at the
    # wrapper (no in-kernel relayout) and store it in bf16.
    edge_flat = edge_sca.reshape(B, N * N, De).astype(jnp.bfloat16)
    xm = x_mask.astype(jnp.float32).reshape(B, 1, N)       # masks attended j
    um = update_mask.astype(jnp.float32).reshape(B, N, 1)  # masks updated i

    kernel = functools.partial(_decoder_kernel, n_head=n_head,
                               only_coor_flags=tuple(only_coor_flags),
                               coor_clamp=coor_clamp)

    def batched(*shape):
        nd = len(shape)
        return pl.BlockSpec((1,) + tuple(shape),
                            lambda b, _nd=nd: (b,) + (0,) * _nd)

    def replicated(arr):
        nd = arr.ndim
        return pl.BlockSpec(arr.shape, lambda b, _nd=nd: (0,) * _nd)

    weight_order = ('wqk', 'wv', 'wo', 'wb', 'wg',
                    'bqk', 'bv', 'bo', 'bb', 'bg', 'gamma', 'beta')
    weights = [packed[k] for k in weight_order]

    in_specs = ([batched(N, C),          # x_sca
                 batched(N, 3),          # coor
                 batched(N * N, De),     # edge (flattened, bf16)
                 batched(1, N),          # x_mask (key mask)
                 batched(N, 1)]          # update mask
                + [replicated(w) for w in weights])
    out_specs = (batched(N, C), batched(L, N, 3))
    out_shape = (jax.ShapeDtypeStruct((B, N, C), jnp.float32),
                 jax.ShapeDtypeStruct((B, L, N, 3), jnp.float32))

    x_new, coor_hid = pl.pallas_call(
        kernel,
        grid=(B,),
        in_specs=in_specs,
        out_specs=out_specs,
        out_shape=out_shape,
        compiler_params=pltpu.CompilerParams(
            dimension_semantics=("parallel",),
            vmem_limit_bytes=48 * 1024 * 1024),
    )(x_sca.astype(jnp.float32), coor.astype(jnp.float32), edge_flat, xm, um,
      *weights)
    return x_new, coor_hid


# ----------------------------------------------------------------------------
# ComplexDecoder forward (decoder-level semantics from the PyTorch module)
# ----------------------------------------------------------------------------
def complex_decoder_forward(complex_graph, layer_params, only_coor_flags,
                            *, fix_prot, n_head, coor_clamp):
    x_sca, x_vec = complex_graph["x_sca_vec"]
    edge_sca, edge_vec = complex_graph["edge_sca_vec"]
    coor = complex_graph["coor"]
    x_mask = complex_graph["x_mask"].astype(jnp.float32)
    if fix_prot:
        update_mask = complex_graph["l_coor_update_mask"].astype(jnp.float32)
    else:
        update_mask = complex_graph["x_mask"].astype(jnp.float32)

    B, N, C = x_sca.shape
    De = edge_sca.shape[-1]
    packed = pack_layer_params(layer_params, C, De, n_head)

    x_new, coor_hid = complex_decoder_pallas(
        x_sca, coor, edge_sca, x_mask, update_mask, packed,
        n_head=n_head, only_coor_flags=only_coor_flags, coor_clamp=coor_clamp)

    out = dict(complex_graph)
    out["x_sca_vec"] = (x_new, x_vec)
    out["edge_sca_vec"] = (edge_sca, edge_vec)
    out["coor"] = coor_hid[:, -1]                               # [B, N, 3]
    out["coor_hidden"] = jnp.transpose(coor_hid, (0, 2, 1, 3))  # [B, N, L, 3]
    return out


# ----------------------------------------------------------------------------
# Parameter init (nn.Linear-style weights + biases) and kernel-layout packing
# ----------------------------------------------------------------------------
def init_layer_params(key, c_x_sca, c_edge_sca, n_head):
    ks = jax.random.split(key, 12)
    s = 0.1
    f32 = jnp.float32
    return dict(
        wq=jax.random.normal(ks[0], (c_x_sca, c_x_sca), f32) * s,
        bq=jax.random.normal(ks[1], (c_x_sca,), f32) * s,
        wk=jax.random.normal(ks[2], (c_x_sca, c_x_sca), f32) * s,
        bk=jax.random.normal(ks[3], (c_x_sca,), f32) * s,
        wv=jax.random.normal(ks[4], (c_x_sca, c_x_sca), f32) * s,
        bv=jax.random.normal(ks[5], (c_x_sca,), f32) * s,
        wo=jax.random.normal(ks[6], (c_x_sca, c_x_sca), f32) * s,
        bo=jax.random.normal(ks[7], (c_x_sca,), f32) * s,
        wb=jax.random.normal(ks[8], (c_edge_sca, n_head), f32) * s,
        bb=jax.random.normal(ks[9], (n_head,), f32) * s,
        wg=jax.random.normal(ks[10], (c_x_sca, n_head), f32) * s,
        bg=jax.random.normal(ks[11], (n_head,), f32) * s,
        gamma=jnp.ones((c_x_sca,), f32),
        beta=jnp.zeros((c_x_sca,), f32),
    )


def pack_layer_params(layer_params, c_x, c_edge, n_head):
    """Stack per-layer params into head-batched layouts used by the kernel.

    - Q/K weights fused along the head axis ([2H, C, dh]) so the kernel does
      one batched projection and slices heads on the leading dim.
    - 1/sqrt(dh) attention scale pre-folded into the Q weights/bias.
    - Edge-bias weights concatenated across layers ([De, L*H]) so the kernel
      does a single matmul over the N^2 edge tensor for all layers.
    """
    H = n_head
    dh = c_x // H
    scale = 1.0 / float(dh) ** 0.5

    def head_major(w):                              # [C, C] -> [H, C, dh]
        return w.reshape(c_x, H, dh).transpose(1, 0, 2)

    def stack(fn):
        return jnp.stack([fn(p) for p in layer_params], axis=0)

    wb_all = jnp.concatenate([p["wb"] for p in layer_params], axis=-1)   # [De, L*H]
    bb_all = jnp.concatenate([p["bb"] for p in layer_params],
                             axis=-1).reshape(1, -1)                     # [1, L*H]

    return dict(
        wqk=stack(lambda p: jnp.concatenate(
            [head_major(p["wq"]) * scale, head_major(p["wk"])], axis=0)),  # [L,2H,C,dh]
        bqk=stack(lambda p: jnp.concatenate(
            [p["bq"].reshape(H, 1, dh) * scale,
             p["bk"].reshape(H, 1, dh)], axis=0)),                         # [L,2H,1,dh]
        wv=stack(lambda p: head_major(p["wv"])),                           # [L,H,C,dh]
        wo=stack(lambda p: p["wo"].reshape(H, dh, c_x)),                   # [L,H,dh,C]
        wb=wb_all,                                                         # [De,L*H]
        wg=stack(lambda p: p["wg"]),                                       # [L,C,H]
        bv=stack(lambda p: p["bv"].reshape(H, 1, dh)),
        bo=stack(lambda p: p["bo"].reshape(1, c_x)),
        bb=bb_all,                                                         # [1,L*H]
        bg=stack(lambda p: p["bg"].reshape(1, H)),
        gamma=stack(lambda p: p["gamma"].reshape(1, c_x)),
        beta=stack(lambda p: p["beta"].reshape(1, c_x)),
    )


if __name__ == "__main__":
    # Small shapes consistent with ComplexDecoder.__init__.
    args = SimpleNamespace(
        c_x_sca_hidden=32, c_x_vec_hidden=8,
        c_edge_sca_hidden=16, c_edge_vec_hidden=4,
        n_head=4, dropout=0.0,
        c_block=2, c_block_only_coor=1,
        update_coor_clamp=10.0, fix_prot=False,
    )
    # TODO(synk): dropout is a no-op here (eval mode).

    B, N = 2, 8
    key = jax.random.PRNGKey(0)
    k_in, k_par = jax.random.split(key)
    ki = jax.random.split(k_in, 6)

    x_sca = jax.random.normal(ki[0], (B, N, args.c_x_sca_hidden), jnp.float32)
    x_vec = jax.random.normal(ki[1], (B, N, args.c_x_vec_hidden, 3), jnp.float32)
    edge_sca = jax.random.normal(ki[2], (B, N, N, args.c_edge_sca_hidden),
                                 jnp.float32)
    edge_vec = jax.random.normal(ki[3], (B, N, N, args.c_edge_vec_hidden, 3),
                                 jnp.float32)
    coor = jax.random.normal(ki[4], (B, N, 3), jnp.float32)
    x_mask = jnp.ones((B, N), jnp.float32).at[:, -1].set(0.0)         # pad last node
    l_coor_update_mask = jnp.ones((B, N), jnp.float32).at[:, :2].set(0.0)

    complex_graph = dict(
        x_sca_vec=(x_sca, x_vec),
        edge_sca_vec=(edge_sca, edge_vec),
        x_mask=x_mask,
        l_coor_update_mask=l_coor_update_mask,
        coor=coor,
    )

    n_layers = args.c_block + args.c_block_only_coor
    layer_keys = jax.random.split(k_par, n_layers)
    layer_params = [init_layer_params(layer_keys[i], args.c_x_sca_hidden,
                                      args.c_edge_sca_hidden, args.n_head)
                    for i in range(n_layers)]
    only_coor_flags = [False] * args.c_block + [True] * args.c_block_only_coor

    out_graph = complex_decoder_forward(
        complex_graph, layer_params, only_coor_flags,
        fix_prot=args.fix_prot, n_head=args.n_head,
        coor_clamp=args.update_coor_clamp)

    jax.block_until_ready(out_graph["coor_hidden"])

    assert out_graph["coor"].shape == (B, N, 3)
    assert out_graph["coor_hidden"].shape == (B, N, n_layers, 3)
    assert out_graph["x_sca_vec"][0].shape == (B, N, args.c_x_sca_hidden)
    assert jnp.all(jnp.isfinite(out_graph["coor_hidden"]))
    assert jnp.all(jnp.isfinite(out_graph["x_sca_vec"][0]))
    print("KERNEL_OK")
</pallas_src>

<mosaic_0001>
module attributes {stable_mosaic.version = 11 : i64} {
  func.func @_decoder_kernel(%arg0: i32, %arg1: memref<1x8x32xf32, #tpu.memory_space<vmem>>, %arg2: memref<1x8x3xf32, #tpu.memory_space<vmem>>, %arg3: memref<1x64x16xbf16, #tpu.memory_space<vmem>>, %arg4: memref<1x1x8xf32, #tpu.memory_space<vmem>>, %arg5: memref<1x8x1xf32, #tpu.memory_space<vmem>>, %arg6: memref<3x8x32x8xf32, #tpu.memory_space<vmem>>, %arg7: memref<3x4x32x8xf32, #tpu.memory_space<vmem>>, %arg8: memref<3x4x8x32xf32, #tpu.memory_space<vmem>>, %arg9: memref<16x12xf32, #tpu.memory_space<vmem>>, %arg10: memref<3x32x4xf32, #tpu.memory_space<vmem>>, %arg11: memref<3x8x1x8xf32, #tpu.memory_space<vmem>>, %arg12: memref<3x4x1x8xf32, #tpu.memory_space<vmem>>, %arg13: memref<3x1x32xf32, #tpu.memory_space<vmem>>, %arg14: memref<1x12xf32, #tpu.memory_space<vmem>>, %arg15: memref<3x1x4xf32, #tpu.memory_space<vmem>>, %arg16: memref<3x1x32xf32, #tpu.memory_space<vmem>>, %arg17: memref<3x1x32xf32, #tpu.memory_space<vmem>>, %arg18: memref<1x8x32xf32, #tpu.memory_space<vmem>>, %arg19: memref<1x3x8x3xf32, #tpu.memory_space<vmem>>) attributes {dimension_semantics = [#tpu.dimension_semantics<parallel>], iteration_bounds = array<i64: 2>, scalar_prefetch = 0 : i64, scratch_operands = 0 : i64, tpu.core_type = #tpu.core_type<tc>, window_params = [{transform_indices = @transform_0, window_bounds = array<i64: 1, 8, 32>}, {transform_indices = @transform_1, window_bounds = array<i64: 1, 8, 3>}, {transform_indices = @transform_2, window_bounds = array<i64: 1, 64, 16>}, {transform_indices = @transform_3, window_bounds = array<i64: 1, 1, 8>}, {transform_indices = @transform_4, window_bounds = array<i64: 1, 8, 1>}, {pipeline_mode = #tpu.pipeline_mode<synchronous>, transform_indices = @transform_5, window_bounds = array<i64: 3, 8, 32, 8>}, {pipeline_mode = #tpu.pipeline_mode<synchronous>, transform_indices = @transform_6, window_bounds = array<i64: 3, 4, 32, 8>}, {pipeline_mode = #tpu.pipeline_mode<synchronous>, transform_indices = @transform_7, window_bounds = array<i64: 3, 4, 8, 32>}, {pipeline_mode = #tpu.pipeline_mode<synchronous>, transform_indices = @transform_8, window_bounds = array<i64: 16, 12>}, {pipeline_mode = #tpu.pipeline_mode<synchronous>, transform_indices = @transform_9, window_bounds = array<i64: 3, 32, 4>}, {pipeline_mode = #tpu.pipeline_mode<synchronous>, transform_indices = @transform_10, window_bounds = array<i64: 3, 8, 1, 8>}, {pipeline_mode = #tpu.pipeline_mode<synchronous>, transform_indices = @transform_11, window_bounds = array<i64: 3, 4, 1, 8>}, {pipeline_mode = #tpu.pipeline_mode<synchronous>, transform_indices = @transform_12, window_bounds = array<i64: 3, 1, 32>}, {pipeline_mode = #tpu.pipeline_mode<synchronous>, transform_indices = @transform_13, window_bounds = array<i64: 1, 12>}, {pipeline_mode = #tpu.pipeline_mode<synchronous>, transform_indices = @transform_14, window_bounds = array<i64: 3, 1, 4>}, {pipeline_mode = #tpu.pipeline_mode<synchronous>, transform_indices = @transform_15, window_bounds = array<i64: 3, 1, 32>}, {pipeline_mode = #tpu.pipeline_mode<synchronous>, transform_indices = @transform_16, window_bounds = array<i64: 3, 1, 32>}, {transform_indices = @transform_17, window_bounds = array<i64: 1, 8, 32>}, {transform_indices = @transform_18, window_bounds = array<i64: 1, 3, 8, 3>}]} {
    %c0 = arith.constant 0 : index
    %c0_0 = arith.constant 0 : index
    %c0_1 = arith.constant 0 : index
    %0 = vector.load %arg1[%c0, %c0_0, %c0_1] : memref<1x8x32xf32, #tpu.memory_space<vmem>>, vector<1x8x32xf32>
    %1 = vector.shape_cast %0 : vector<1x8x32xf32> to vector<8x32xf32>
    %c0_2 = arith.constant 0 : index
    %c0_3 = arith.constant 0 : index
    %c0_4 = arith.constant 0 : index
    %2 = vector.load %arg2[%c0_2, %c0_3, %c0_4] : memref<1x8x3xf32, #tpu.memory_space<vmem>>, vector<1x8x3xf32>
    %3 = vector.shape_cast %2 : vector<1x8x3xf32> to vector<8x3xf32>
    %c0_5 = arith.constant 0 : index
    %c0_6 = arith.constant 0 : index
    %c0_7 = arith.constant 0 : index
    %4 = vector.load %arg3[%c0_5, %c0_6, %c0_7] : memref<1x64x16xbf16, #tpu.memory_space<vmem>>, vector<1x64x16xbf16>
    %5 = vector.shape_cast %4 : vector<1x64x16xbf16> to vector<64x16xbf16>
    %c0_8 = arith.constant 0 : index
    %c0_9 = arith.constant 0 : index
    %c0_10 = arith.constant 0 : index
    %6 = vector.load %arg4[%c0_8, %c0_9, %c0_10] : memref<1x1x8xf32, #tpu.memory_space<vmem>>, vector<1x1x8xf32>
    %c0_11 = arith.constant 0 : index
    %c0_12 = arith.constant 0 : index
    %c0_13 = arith.constant 0 : index
    %7 = vector.load %arg5[%c0_11, %c0_12, %c0_13] : memref<1x8x1xf32, #tpu.memory_space<vmem>>, vector<1x8x1xf32>
    %8 = vector.shape_cast %7 : vector<1x8x1xf32> to vector<8x1xf32>
    %cst = arith.constant 1.000000e+00 : f32
    %9 = vector.broadcast %cst : f32 to vector<1x1x8xf32>
    %10 = arith.subf %9, %6 : vector<1x1x8xf32>
    %cst_14 = arith.constant -1.000000e+09 : f32
    %11 = vector.broadcast %cst_14 : f32 to vector<1x1x8xf32>
    %12 = arith.mulf %10, %11 : vector<1x1x8xf32>
    %c0_15 = arith.constant 0 : index
    %c0_16 = arith.constant 0 : index
    %13 = vector.load %arg9[%c0_15, %c0_16] : memref<16x12xf32, #tpu.memory_space<vmem>>, vector<16x12xf32>
    %14 = arith.truncf %13 : vector<16x12xf32> to vector<16x12xbf16>
    %cst_17 = arith.constant dense<0.000000e+00> : vector<64x12xf32>
    %15 = tpu.matmul %5, %14, %cst_17 {dimension_numbers = #tpu.dot_dimension_numbers<[1], [0], [0], [1], [0, 0, 1, 1], [], []>} : vector<64x16xbf16>, vector<16x12xbf16>, vector<64x12xf32> -> vector<64x12xf32>
    %c0_18 = arith.constant 0 : index
    %c0_19 = arith.constant 0 : index
    %16 = vector.load %arg14[%c0_18, %c0_19] : memref<1x12xf32, #tpu.memory_space<vmem>>, vector<1x12xf32>
    %17 = vector.broadcast %16 : vector<1x12xf32> to vector<64x12xf32>
    %18 = arith.addf %15, %17 : vector<64x12xf32>
    %19 = vector.shape_cast %18 : vector<64x12xf32> to vector<8x8x12xf32>
    %20 = vector.extract_strided_slice %19 {offsets = [0, 0, 0], sizes = [8, 8, 1], strides = [1, 1, 1]} : vector<8x8x12xf32> to vector<8x8x1xf32>
    %21 = vector.shape_cast %20 : vector<8x8x1xf32> to vector<8x8xf32>
    %22 = vector.extract_strided_slice %19 {offsets = [0, 0, 1], sizes = [8, 8, 1], strides = [1, 1, 1]} : vector<8x8x12xf32> to vector<8x8x1xf32>
    %23 = vector.shape_cast %22 : vector<8x8x1xf32> to vector<8x8xf32>
    %24 = vector.extract_strided_slice %19 {offsets = [0, 0, 2], sizes = [8, 8, 1], strides = [1, 1, 1]} : vector<8x8x12xf32> to vector<8x8x1xf32>
    %25 = vector.shape_cast %24 : vector<8x8x1xf32> to vector<8x8xf32>
    %26 = vector.extract_strided_slice %19 {offsets = [0, 0, 3], sizes = [8, 8, 1], strides = [1, 1, 1]} : vector<8x8x12xf32> to vector<8x8x1xf32>
    %27 = vector.shape_cast %26 : vector<8x8x1xf32> to vector<8x8xf32>
    %28 = vector.shape_cast %21 : vector<8x8xf32> to vector<1x8x8xf32>
    %29 = vector.shape_cast %23 : vector<8x8xf32> to vector<1x8x8xf32>
    %30 = vector.shape_cast %25 : vector<8x8xf32> to vector<1x8x8xf32>
    %31 = vector.shape_cast %27 : vector<8x8xf32> to vector<1x8x8xf32>
    %32 = tpu.concatenate %28, %29, %30, %31 in 0 : vector<1x8x8xf32>, vector<1x8x8xf32>, vector<1x8x8xf32>, vector<1x8x8xf32> -> vector<4x8x8xf32>
    %33 = vector.broadcast %12 : vector<1x1x8xf32> to vector<4x8x8xf32>
    %34 = arith.addf %32, %33 : vector<4x8x8xf32>
    %35 = vector.extract_strided_slice %19 {offsets = [0, 0, 4], sizes = [8, 8, 1], strides = [1, 1, 1]} : vector<8x8x12xf32> to vector<8x8x1xf32>
    %36 = vector.shape_cast %35 : vector<8x8x1xf32> to vector<8x8xf32>
    %37 = vector.extract_strided_slice %19 {offsets = [0, 0, 5], sizes = [8, 8, 1], strides = [1, 1, 1]} : vector<8x8x12xf32> to vector<8x8x1xf32>
    %38 = vector.shape_cast %37 : vector<8x8x1xf32> to vector<8x8xf32>
    %39 = vector.extract_strided_slice %19 {offsets = [0, 0, 6], sizes = [8, 8, 1], strides = [1, 1, 1]} : vector<8x8x12xf32> to vector<8x8x1xf32>
    %40 = vector.shape_cast %39 : vector<8x8x1xf32> to vector<8x8xf32>
    %41 = vector.extract_strided_slice %19 {offsets = [0, 0, 7], sizes = [8, 8, 1], strides = [1, 1, 1]} : vector<8x8x12xf32> to vector<8x8x1xf32>
    %42 = vector.shape_cast %41 : vector<8x8x1xf32> to vector<8x8xf32>
    %43 = vector.shape_cast %36 : vector<8x8xf32> to vector<1x8x8xf32>
    %44 = vector.shape_cast %38 : vector<8x8xf32> to vector<1x8x8xf32>
    %45 = vector.shape_cast %40 : vector<8x8xf32> to vector<1x8x8xf32>
    %46 = vector.shape_cast %42 : vector<8x8xf32> to vector<1x8x8xf32>
    %47 = tpu.concatenate %43, %44, %45, %46 in 0 : vector<1x8x8xf32>, vector<1x8x8xf32>, vector<1x8x8xf32>, vector<1x8x8xf32> -> vector<4x8x8xf32>
    %48 = vector.broadcast %12 : vector<1x1x8xf32> to vector<4x8x8xf32>
    %49 = arith.addf %47, %48 : vector<4x8x8xf32>
    %50 = vector.extract_strided_slice %19 {offsets = [0, 0, 8], sizes = [8, 8, 1], strides = [1, 1, 1]} : vector<8x8x12xf32> to vector<8x8x1xf32>
    %51 = vector.shape_cast %50 : vector<8x8x1xf32> to vector<8x8xf32>
    %52 = vector.extract_strided_slice %19 {offsets = [0, 0, 9], sizes = [8, 8, 1], strides = [1, 1, 1]} : vector<8x8x12xf32> to vector<8x8x1xf32>
    %53 = vector.shape_cast %52 : vector<8x8x1xf32> to vector<8x8xf32>
    %54 = vector.extract_strided_slice %19 {offsets = [0, 0, 10], sizes = [8, 8, 1], strides = [1, 1, 1]} : vector<8x8x12xf32> to vector<8x8x1xf32>
    %55 = vector.shape_cast %54 : vector<8x8x1xf32> to vector<8x8xf32>
    %56 = vector.extract_strided_slice %19 {offsets = [0, 0, 11], sizes = [8, 8, 1], strides = [1, 1, 1]} : vector<8x8x12xf32> to vector<8x8x1xf32>
    %57 = vector.shape_cast %56 : vector<8x8x1xf32> to vector<8x8xf32>
    %58 = vector.shape_cast %51 : vector<8x8xf32> to vector<1x8x8xf32>
    %59 = vector.shape_cast %53 : vector<8x8xf32> to vector<1x8x8xf32>
    %60 = vector.shape_cast %55 : vector<8x8xf32> to vector<1x8x8xf32>
    %61 = vector.shape_cast %57 : vector<8x8xf32> to vector<1x8x8xf32>
    %62 = tpu.concatenate %58, %59, %60, %61 in 0 : vector<1x8x8xf32>, vector<1x8x8xf32>, vector<1x8x8xf32>, vector<1x8x8xf32> -> vector<4x8x8xf32>
    %63 = vector.broadcast %12 : vector<1x1x8xf32> to vector<4x8x8xf32>
    %64 = arith.addf %62, %63 : vector<4x8x8xf32>
    %c0_20 = arith.constant 0 : index
    %c0_21 = arith.constant 0 : index
    %c0_22 = arith.constant 0 : index
    %c0_23 = arith.constant 0 : index
    %65 = vector.load %arg6[%c0_20, %c0_21, %c0_22, %c0_23] : memref<3x8x32x8xf32, #tpu.memory_space<vmem>>, vector<1x8x32x8xf32>
    %66 = vector.shape_cast %65 : vector<1x8x32x8xf32> to vector<8x32x8xf32>
    %c0_24 = arith.constant 0 : index
    %c0_25 = arith.constant 0 : index
    %c0_26 = arith.constant 0 : index
    %c0_27 = arith.constant 0 : index
    %67 = vector.load %arg11[%c0_24, %c0_25, %c0_26, %c0_27] : memref<3x8x1x8xf32, #tpu.memory_space<vmem>>, vector<1x8x1x8xf32>
    %68 = vector.shape_cast %67 : vector<1x8x1x8xf32> to vector<8x1x8xf32>
    %c0_28 = arith.constant 0 : index
    %c0_29 = arith.constant 0 : index
    %c0_30 = arith.constant 0 : index
    %69 = vector.load %arg10[%c0_28, %c0_29, %c0_30] : memref<3x32x4xf32, #tpu.memory_space<vmem>>, vector<1x32x4xf32>
    %70 = vector.shape_cast %69 : vector<1x32x4xf32> to vector<32x4xf32>
    %c0_31 = arith.constant 0 : index
    %c0_32 = arith.constant 0 : index
    %c0_33 = arith.constant 0 : index
    %71 = vector.load %arg15[%c0_31, %c0_32, %c0_33] : memref<3x1x4xf32, #tpu.memory_space<vmem>>, vector<1x1x4xf32>
    %72 = vector.shape_cast %71 : vector<1x1x4xf32> to vector<1x4xf32>
    %73 = vector.shape_cast %1 : vector<8x32xf32> to vector<1x8x32xf32>
    %74 = vector.shape_cast %73 : vector<1x8x32xf32> to vector<1x8x32xf32>
    %75 = vector.broadcast %74 : vector<1x8x32xf32> to vector<8x8x32xf32>
    "tpu.trace_start"() <{level = 10 : i32, message = "hnc,hcd->hnd"}> : () -> ()
    %cst_34 = arith.constant dense<0.000000e+00> : vector<8x8x8xf32>
    %76 = tpu.matmul %75, %66, %cst_34 {dimension_numbers = #tpu.dot_dimension_numbers<[2], [1], [1], [2], [0, 0, 0, 1, 1, 2], [0], [0]>} : vector<8x8x32xf32>, vector<8x32x8xf32>, vector<8x8x8xf32> -> vector<8x8x8xf32>
    "tpu.trace_stop"() : () -> ()
    %77 = vector.broadcast %68 : vector<8x1x8xf32> to vector<8x8x8xf32>
    %78 = arith.addf %76, %77 : vector<8x8x8xf32>
    %79 = vector.extract_strided_slice %78 {offsets = [0, 0, 0], sizes = [4, 8, 8], strides = [1, 1, 1]} : vector<8x8x8xf32> to vector<4x8x8xf32>
    %80 = vector.extract_strided_slice %78 {offsets = [4, 0, 0], sizes = [4, 8, 8], strides = [1, 1, 1]} : vector<8x8x8xf32> to vector<4x8x8xf32>
    %81 = arith.truncf %79 : vector<4x8x8xf32> to vector<4x8x8xbf16>
    %82 = arith.truncf %80 : vector<4x8x8xf32> to vector<4x8x8xbf16>
    "tpu.trace_start"() <{level = 10 : i32, message = "hnd,hmd->hnm"}> : () -> ()
    %cst_35 = arith.constant dense<0.000000e+00> : vector<4x8x8xf32>
    %83 = tpu.matmul %81, %82, %cst_35 {dimension_numbers = #tpu.dot_dimension_numbers<[2], [2], [1], [1], [0, 0, 0, 1, 1, 1], [0], [0]>} : vector<4x8x8xbf16>, vector<4x8x8xbf16>, vector<4x8x8xf32> -> vector<4x8x8xf32>
    "tpu.trace_stop"() : () -> ()
    %84 = arith.addf %83, %34 : vector<4x8x8xf32>
    %cst_36 = arith.constant dense<0xFF800000> : vector<4x8xf32>
    %85 = vector.multi_reduction <maximumf>, %84, %cst_36 [2] : vector<4x8x8xf32> to vector<4x8xf32>
    %86 = vector.shape_cast %85 : vector<4x8xf32> to vector<4x8x1xf32>
    %87 = vector.broadcast %86 : vector<4x8x1xf32> to vector<4x8x8xf32>
    %88 = arith.subf %84, %87 : vector<4x8x8xf32>
    %89 = math.exp %88 : vector<4x8x8xf32>
    %cst_37 = arith.constant dense<0.000000e+00> : vector<4x8xf32>
    %90 = vector.multi_reduction <add>, %89, %cst_37 [2] : vector<4x8x8xf32> to vector<4x8xf32>
    %91 = vector.shape_cast %90 : vector<4x8xf32> to vector<4x8x1xf32>
    %92 = tpu.reciprocal %91 {approx = true} : vector<4x8x1xf32> -> vector<4x8x1xf32>
    %93 = vector.broadcast %92 : vector<4x8x1xf32> to vector<4x8x8xf32>
    %94 = arith.mulf %89, %93 : vector<4x8x8xf32>
    %95 = arith.truncf %94 : vector<4x8x8xf32> to vector<4x8x8xbf16>
    %cst_38 = arith.constant dense<0.000000e+00> : vector<8x4xf32>
    %96 = tpu.matmul %1, %70, %cst_38 {dimension_numbers = #tpu.dot_dimension_numbers<[1], [0], [0], [1], [0, 0, 1, 1], [], []>} : vector<8x32xf32>, vector<32x4xf32>, vector<8x4xf32> -> vector<8x4xf32>
    %97 = vector.broadcast %72 : vector<1x4xf32> to vector<8x4xf32>
    %98 = arith.addf %96, %97 : vector<8x4xf32>
    %99 = arith.negf %98 : vector<8x4xf32>
    %100 = math.exp %99 : vector<8x4xf32>
    %cst_39 = arith.constant 1.000000e+00 : f32
    %101 = vector.broadcast %cst_39 : f32 to vector<8x4xf32>
    %102 = arith.addf %101, %100 : vector<8x4xf32>
    %103 = arith.divf %101, %102 : vector<8x4xf32>
    %104 = vector.shape_cast %95 : vector<4x8x8xbf16> to vector<32x8xbf16>
    %105 = arith.truncf %3 : vector<8x3xf32> to vector<8x3xbf16>
    %cst_40 = arith.constant dense<0.000000e+00> : vector<32x3xf32>
    %106 = tpu.matmul %104, %105, %cst_40 {dimension_numbers = #tpu.dot_dimension_numbers<[1], [0], [0], [1], [0, 0, 1, 1], [], []>} : vector<32x8xbf16>, vector<8x3xbf16>, vector<32x3xf32> -> vector<32x3xf32>
    %107 = vector.shape_cast %106 : vector<32x3xf32> to vector<4x8x3xf32>
    %cst_41 = arith.constant 0.000000e+00 : f32
    %108 = vector.broadcast %cst_41 : f32 to vector<8x3xf32>
    %109 = vector.extract_strided_slice %103 {offsets = [0, 0], sizes = [8, 1], strides = [1, 1]} : vector<8x4xf32> to vector<8x1xf32>
    %110 = vector.extract_strided_slice %107 {offsets = [0, 0, 0], sizes = [1, 8, 3], strides = [1, 1, 1]} : vector<4x8x3xf32> to vector<1x8x3xf32>
    %111 = vector.shape_cast %110 : vector<1x8x3xf32> to vector<8x3xf32>
    %112 = arith.subf %3, %111 : vector<8x3xf32>
    %113 = vector.broadcast %109 : vector<8x1xf32> to vector<8x3xf32>
    %114 = arith.mulf %113, %112 : vector<8x3xf32>
    %115 = arith.addf %108, %114 : vector<8x3xf32>
    %116 = vector.extract_strided_slice %103 {offsets = [0, 1], sizes = [8, 1], strides = [1, 1]} : vector<8x4xf32> to vector<8x1xf32>
    %117 = vector.extract_strided_slice %107 {offsets = [1, 0, 0], sizes = [1, 8, 3], strides = [1, 1, 1]} : vector<4x8x3xf32> to vector<1x8x3xf32>
    %118 = vector.shape_cast %117 : vector<1x8x3xf32> to vector<8x3xf32>
    %119 = arith.subf %3, %118 : vector<8x3xf32>
    %120 = vector.broadcast %116 : vector<8x1xf32> to vector<8x3xf32>
    %121 = arith.mulf %120, %119 : vector<8x3xf32>
    %122 = arith.addf %115, %121 : vector<8x3xf32>
    %123 = vector.extract_strided_slice %103 {offsets = [0, 2], sizes = [8, 1], strides = [1, 1]} : vector<8x4xf32> to vector<8x1xf32>
    %124 = vector.extract_strided_slice %107 {offsets = [2, 0, 0], sizes = [1, 8, 3], strides = [1, 1, 1]} : vector<4x8x3xf32> to vector<1x8x3xf32>
    %125 = vector.shape_cast %124 : vector<1x8x3xf32> to vector<8x3xf32>
    %126 = arith.subf %3, %125 : vector<8x3xf32>
    %127 = vector.broadcast %123 : vector<8x1xf32> to vector<8x3xf32>
    %128 = arith.mulf %127, %126 : vector<8x3xf32>
    %129 = arith.addf %122, %128 : vector<8x3xf32>
    %130 = vector.extract_strided_slice %103 {offsets = [0, 3], sizes = [8, 1], strides = [1, 1]} : vector<8x4xf32> to vector<8x1xf32>
    %131 = vector.extract_strided_slice %107 {offsets = [3, 0, 0], sizes = [1, 8, 3], strides = [1, 1, 1]} : vector<4x8x3xf32> to vector<1x8x3xf32>
    %132 = vector.shape_cast %131 : vector<1x8x3xf32> to vector<8x3xf32>
    %133 = arith.subf %3, %132 : vector<8x3xf32>
    %134 = vector.broadcast %130 : vector<8x1xf32> to vector<8x3xf32>
    %135 = arith.mulf %134, %133 : vector<8x3xf32>
    %136 = arith.addf %129, %135 : vector<8x3xf32>
    %cst_42 = arith.constant 2.500000e-01 : f32
    %137 = vector.broadcast %cst_42 : f32 to vector<8x3xf32>
    %138 = arith.mulf %136, %137 : vector<8x3xf32>
    %cst_43 = arith.constant -1.000000e+01 : f32
    %cst_44 = arith.constant 1.000000e+01 : f32
    %139 = vector.broadcast %cst_43 : f32 to vector<8x3xf32>
    %140 = arith.maximumf %139, %138 : vector<8x3xf32>
    %141 = vector.broadcast %cst_44 : f32 to vector<8x3xf32>
    %142 = arith.minimumf %141, %140 : vector<8x3xf32>
    %143 = vector.broadcast %8 : vector<8x1xf32> to vector<8x3xf32>
    %144 = arith.mulf %142, %143 : vector<8x3xf32>
    %145 = arith.addf %3, %144 : vector<8x3xf32>
    %c0_45 = arith.constant 0 : index
    %c0_46 = arith.constant 0 : index
    %c0_47 = arith.constant 0 : index
    %c0_48 = arith.constant 0 : index
    %146 = vector.load %arg7[%c0_45, %c0_46, %c0_47, %c0_48] : memref<3x4x32x8xf32, #tpu.memory_space<vmem>>, vector<1x4x32x8xf32>
    %147 = vector.shape_cast %146 : vector<1x4x32x8xf32> to vector<4x32x8xf32>
    %c0_49 = arith.constant 0 : index
    %c0_50 = arith.constant 0 : index
    %c0_51 = arith.constant 0 : index
    %c0_52 = arith.constant 0 : index
    %148 = vector.load %arg12[%c0_49, %c0_50, %c0_51, %c0_52] : memref<3x4x1x8xf32, #tpu.memory_space<vmem>>, vector<1x4x1x8xf32>
    %149 = vector.shape_cast %148 : vector<1x4x1x8xf32> to vector<4x1x8xf32>
    %c0_53 = arith.constant 0 : index
    %c0_54 = arith.constant 0 : index
    %c0_55 = arith.constant 0 : index
    %c0_56 = arith.constant 0 : index
    %150 = vector.load %arg8[%c0_53, %c0_54, %c0_55, %c0_56] : memref<3x4x8x32xf32, #tpu.memory_space<vmem>>, vector<1x4x8x32xf32>
    %151 = vector.shape_cast %150 : vector<1x4x8x32xf32> to vector<4x8x32xf32>
    %c0_57 = arith.constant 0 : index
    %c0_58 = arith.constant 0 : index
    %c0_59 = arith.constant 0 : index
    %152 = vector.load %arg13[%c0_57, %c0_58, %c0_59] : memref<3x1x32xf32, #tpu.memory_space<vmem>>, vector<1x1x32xf32>
    %153 = vector.shape_cast %152 : vector<1x1x32xf32> to vector<1x32xf32>
    %c0_60 = arith.constant 0 : index
    %c0_61 = arith.constant 0 : index
    %c0_62 = arith.constant 0 : index
    %154 = vector.load %arg16[%c0_60, %c0_61, %c0_62] : memref<3x1x32xf32, #tpu.memory_space<vmem>>, vector<1x1x32xf32>
    %155 = vector.shape_cast %154 : vector<1x1x32xf32> to vector<1x32xf32>
    %c0_63 = arith.constant 0 : index
    %c0_64 = arith.constant 0 : index
    %c0_65 = arith.constant 0 : index
    %156 = vector.load %arg17[%c0_63, %c0_64, %c0_65] : memref<3x1x32xf32, #tpu.memory_space<vmem>>, vector<1x1x32xf32>
    %157 = vector.shape_cast %156 : vector<1x1x32xf32> to vector<1x32xf32>
    %158 = vector.extract_strided_slice %75 {offsets = [0, 0, 0], sizes = [4, 8, 32], strides = [1, 1, 1]} : vector<8x8x32xf32> to vector<4x8x32xf32>
    "tpu.trace_start"() <{level = 10 : i32, message = "hnc,hcd->hnd"}> : () -> ()
    %cst_66 = arith.constant dense<0.000000e+00> : vector<4x8x8xf32>
    %159 = tpu.matmul %158, %147, %cst_66 {dimension_numbers = #tpu.dot_dimension_numbers<[2], [1], [1], [2], [0, 0, 0, 1, 1, 2], [0], [0]>} : vector<4x8x32xf32>, vector<4x32x8xf32>, vector<4x8x8xf32> -> vector<4x8x8xf32>
    "tpu.trace_stop"() : () -> ()
    %160 = vector.broadcast %149 : vector<4x1x8xf32> to vector<4x8x8xf32>
    %161 = arith.addf %159, %160 : vector<4x8x8xf32>
    %162 = arith.truncf %161 : vector<4x8x8xf32> to vector<4x8x8xbf16>
    "tpu.trace_start"() <{level = 10 : i32, message = "hnm,hmd->hnd"}> : () -> ()
    %cst_67 = arith.constant dense<0.000000e+00> : vector<4x8x8xf32>
    %163 = tpu.matmul %95, %162, %cst_67 {dimension_numbers = #tpu.dot_dimension_numbers<[2], [1], [1], [2], [0, 0, 0, 1, 1, 2], [0], [0]>} : vector<4x8x8xbf16>, vector<4x8x8xbf16>, vector<4x8x8xf32> -> vector<4x8x8xf32>
    "tpu.trace_stop"() : () -> ()
    "tpu.trace_start"() <{level = 10 : i32, message = "hnd,hdc->hnc"}> : () -> ()
    %cst_68 = arith.constant dense<0.000000e+00> : vector<4x8x32xf32>
    %164 = tpu.matmul %163, %151, %cst_68 {dimension_numbers = #tpu.dot_dimension_numbers<[2], [1], [1], [2], [0, 0, 0, 1, 1, 2], [0], [0]>} : vector<4x8x8xf32>, vector<4x8x32xf32>, vector<4x8x32xf32> -> vector<4x8x32xf32>
    "tpu.trace_stop"() : () -> ()
    %cst_69 = arith.constant dense<0.000000e+00> : vector<8x32xf32>
    %165 = vector.multi_reduction <add>, %164, %cst_69 [0] : vector<4x8x32xf32> to vector<8x32xf32>
    %166 = vector.broadcast %153 : vector<1x32xf32> to vector<8x32xf32>
    %167 = arith.addf %165, %166 : vector<8x32xf32>
    %168 = arith.addf %1, %167 : vector<8x32xf32>
    %cst_70 = arith.constant dense<0.000000e+00> : vector<8xf32>
    %169 = vector.multi_reduction <add>, %168, %cst_70 [1] : vector<8x32xf32> to vector<8xf32>
    %170 = vector.shape_cast %169 : vector<8xf32> to vector<8x1xf32>
    %cst_71 = arith.constant 3.200000e+01 : f32
    %171 = vector.broadcast %cst_71 : f32 to vector<8x1xf32>
    %172 = arith.divf %170, %171 : vector<8x1xf32>
    %173 = vector.broadcast %172 : vector<8x1xf32> to vector<8x32xf32>
    %174 = arith.subf %168, %173 : vector<8x32xf32>
    %175 = arith.mulf %174, %174 : vector<8x32xf32>
    %cst_72 = arith.constant dense<0.000000e+00> : vector<8xf32>
    %176 = vector.multi_reduction <add>, %175, %cst_72 [1] : vector<8x32xf32> to vector<8xf32>
    %177 = vector.shape_cast %176 : vector<8xf32> to vector<8x1xf32>
    %cst_73 = arith.constant 3.200000e+01 : f32
    %178 = vector.broadcast %cst_73 : f32 to vector<8x1xf32>
    %179 = arith.divf %177, %178 : vector<8x1xf32>
    %180 = vector.broadcast %172 : vector<8x1xf32> to vector<8x32xf32>
    %181 = arith.subf %168, %180 : vector<8x32xf32>
    %cst_74 = arith.constant 9.99999974E-6 : f32
    %182 = vector.broadcast %cst_74 : f32 to vector<8x1xf32>
    %183 = arith.addf %179, %182 : vector<8x1xf32>
    %184 = math.rsqrt %183 : vector<8x1xf32>
    %185 = vector.broadcast %184 : vector<8x1xf32> to vector<8x32xf32>
    %186 = arith.mulf %181, %185 : vector<8x32xf32>
    %187 = vector.broadcast %155 : vector<1x32xf32> to vector<8x32xf32>
    %188 = arith.mulf %186, %187 : vector<8x32xf32>
    %189 = vector.broadcast %157 : vector<1x32xf32> to vector<8x32xf32>
    %190 = arith.addf %188, %189 : vector<8x32xf32>
    %c1 = arith.constant 1 : index
    %c0_75 = arith.constant 0 : index
    %c0_76 = arith.constant 0 : index
    %c0_77 = arith.constant 0 : index
    %191 = vector.load %arg6[%c1, %c0_75, %c0_76, %c0_77] : memref<3x8x32x8xf32, #tpu.memory_space<vmem>>, vector<1x8x32x8xf32>
    %192 = vector.shape_cast %191 : vector<1x8x32x8xf32> to vector<8x32x8xf32>
    %c1_78 = arith.constant 1 : index
    %c0_79 = arith.constant 0 : index
    %c0_80 = arith.constant 0 : index
    %c0_81 = arith.constant 0 : index
    %193 = vector.load %arg11[%c1_78, %c0_79, %c0_80, %c0_81] : memref<3x8x1x8xf32, #tpu.memory_space<vmem>>, vector<1x8x1x8xf32>
    %194 = vector.shape_cast %193 : vector<1x8x1x8xf32> to vector<8x1x8xf32>
    %c1_82 = arith.constant 1 : index
    %c0_83 = arith.constant 0 : index
    %c0_84 = arith.constant 0 : index
    %195 = vector.load %arg10[%c1_82, %c0_83, %c0_84] : memref<3x32x4xf32, #tpu.memory_space<vmem>>, vector<1x32x4xf32>
    %196 = vector.shape_cast %195 : vector<1x32x4xf32> to vector<32x4xf32>
    %c1_85 = arith.constant 1 : index
    %c0_86 = arith.constant 0 : index
    %c0_87 = arith.constant 0 : index
    %197 = vector.load %arg15[%c1_85, %c0_86, %c0_87] : memref<3x1x4xf32, #tpu.memory_space<vmem>>, vector<1x1x4xf32>
    %198 = vector.shape_cast %197 : vector<1x1x4xf32> to vector<1x4xf32>
    %199 = vector.shape_cast %190 : vector<8x32xf32> to vector<1x8x32xf32>
    %200 = vector.shape_cast %199 : vector<1x8x32xf32> to vector<1x8x32xf32>
    %201 = vector.broadcast %200 : vector<1x8x32xf32> to vector<8x8x32xf32>
    "tpu.trace_start"() <{level = 10 : i32, message = "hnc,hcd->hnd"}> : () -> ()
    %cst_88 = arith.constant dense<0.000000e+00> : vector<8x8x8xf32>
    %202 = tpu.matmul %201, %192, %cst_88 {dimension_numbers = #tpu.dot_dimension_numbers<[2], [1], [1], [2], [0, 0, 0, 1, 1, 2], [0], [0]>} : vector<8x8x32xf32>, vector<8x32x8xf32>, vector<8x8x8xf32> -> vector<8x8x8xf32>
    "tpu.trace_stop"() : () -> ()
    %203 = vector.broadcast %194 : vector<8x1x8xf32> to vector<8x8x8xf32>
    %204 = arith.addf %202, %203 : vector<8x8x8xf32>
    %205 = vector.extract_strided_slice %204 {offsets = [0, 0, 0], sizes = [4, 8, 8], strides = [1, 1, 1]} : vector<8x8x8xf32> to vector<4x8x8xf32>
    %206 = vector.extract_strided_slice %204 {offsets = [4, 0, 0], sizes = [4, 8, 8], strides = [1, 1, 1]} : vector<8x8x8xf32> to vector<4x8x8xf32>
    %207 = arith.truncf %205 : vector<4x8x8xf32> to vector<4x8x8xbf16>
    %208 = arith.truncf %206 : vector<4x8x8xf32> to vector<4x8x8xbf16>
    "tpu.trace_start"() <{level = 10 : i32, message = "hnd,hmd->hnm"}> : () -> ()
    %cst_89 = arith.constant dense<0.000000e+00> : vector<4x8x8xf32>
    %209 = tpu.matmul %207, %208, %cst_89 {dimension_numbers = #tpu.dot_dimension_numbers<[2], [2], [1], [1], [0, 0, 0, 1, 1, 1], [0], [0]>} : vector<4x8x8xbf16>, vector<4x8x8xbf16>, vector<4x8x8xf32> -> vector<4x8x8xf32>
    "tpu.trace_stop"() : () -> ()
    %210 = arith.addf %209, %49 : vector<4x8x8xf32>
    %cst_90 = arith.constant dense<0xFF800000> : vector<4x8xf32>
    %211 = vector.multi_reduction <maximumf>, %210, %cst_90 [2] : vector<4x8x8xf32> to vector<4x8xf32>
    %212 = vector.shape_cast %211 : vector<4x8xf32> to vector<4x8x1xf32>
    %213 = vector.broadcast %212 : vector<4x8x1xf32> to vector<4x8x8xf32>
    %214 = arith.subf %210, %213 : vector<4x8x8xf32>
    %215 = math.exp %214 : vector<4x8x8xf32>
    %cst_91 = arith.constant dense<0.000000e+00> : vector<4x8xf32>
    %216 = vector.multi_reduction <add>, %215, %cst_91 [2] : vector<4x8x8xf32> to vector<4x8xf32>
    %217 = vector.shape_cast %216 : vector<4x8xf32> to vector<4x8x1xf32>
    %218 = tpu.reciprocal %217 {approx = true} : vector<4x8x1xf32> -> vector<4x8x1xf32>
    %219 = vector.broadcast %218 : vector<4x8x1xf32> to vector<4x8x8xf32>
    %220 = arith.mulf %215, %219 : vector<4x8x8xf32>
    %221 = arith.truncf %220 : vector<4x8x8xf32> to vector<4x8x8xbf16>
    %cst_92 = arith.constant dense<0.000000e+00> : vector<8x4xf32>
    %222 = tpu.matmul %190, %196, %cst_92 {dimension_numbers = #tpu.dot_dimension_numbers<[1], [0], [0], [1], [0, 0, 1, 1], [], []>} : vector<8x32xf32>, vector<32x4xf32>, vector<8x4xf32> -> vector<8x4xf32>
    %223 = vector.broadcast %198 : vector<1x4xf32> to vector<8x4xf32>
    %224 = arith.addf %222, %223 : vector<8x4xf32>
    %225 = arith.negf %224 : vector<8x4xf32>
    %226 = math.exp %225 : vector<8x4xf32>
    %cst_93 = arith.constant 1.000000e+00 : f32
    %227 = vector.broadcast %cst_93 : f32 to vector<8x4xf32>
    %228 = arith.addf %227, %226 : vector<8x4xf32>
    %229 = arith.divf %227, %228 : vector<8x4xf32>
    %230 = vector.shape_cast %221 : vector<4x8x8xbf16> to vector<32x8xbf16>
    %231 = arith.truncf %145 : vector<8x3xf32> to vector<8x3xbf16>
    %cst_94 = arith.constant dense<0.000000e+00> : vector<32x3xf32>
    %232 = tpu.matmul %230, %231, %cst_94 {dimension_numbers = #tpu.dot_dimension_numbers<[1], [0], [0], [1], [0, 0, 1, 1], [], []>} : vector<32x8xbf16>, vector<8x3xbf16>, vector<32x3xf32> -> vector<32x3xf32>
    %233 = vector.shape_cast %232 : vector<32x3xf32> to vector<4x8x3xf32>
    %cst_95 = arith.constant 0.000000e+00 : f32
    %234 = vector.broadcast %cst_95 : f32 to vector<8x3xf32>
    %235 = vector.extract_strided_slice %229 {offsets = [0, 0], sizes = [8, 1], strides = [1, 1]} : vector<8x4xf32> to vector<8x1xf32>
    %236 = vector.extract_strided_slice %233 {offsets = [0, 0, 0], sizes = [1, 8, 3], strides = [1, 1, 1]} : vector<4x8x3xf32> to vector<1x8x3xf32>
    %237 = vector.shape_cast %236 : vector<1x8x3xf32> to vector<8x3xf32>
    %238 = arith.subf %145, %237 : vector<8x3xf32>
    %239 = vector.broadcast %235 : vector<8x1xf32> to vector<8x3xf32>
    %240 = arith.mulf %239, %238 : vector<8x3xf32>
    %241 = arith.addf %234, %240 : vector<8x3xf32>
    %242 = vector.extract_strided_slice %229 {offsets = [0, 1], sizes = [8, 1], strides = [1, 1]} : vector<8x4xf32> to vector<8x1xf32>
    %243 = vector.extract_strided_slice %233 {offsets = [1, 0, 0], sizes = [1, 8, 3], strides = [1, 1, 1]} : vector<4x8x3xf32> to vector<1x8x3xf32>
    %244 = vector.shape_cast %243 : vector<1x8x3xf32> to vector<8x3xf32>
    %245 = arith.subf %145, %244 : vector<8x3xf32>
    %246 = vector.broadcast %242 : vector<8x1xf32> to vector<8x3xf32>
    %247 = arith.mulf %246, %245 : vector<8x3xf32>
    %248 = arith.addf %241, %247 : vector<8x3xf32>
    %249 = vector.extract_strided_slice %229 {offsets = [0, 2], sizes = [8, 1], strides = [1, 1]} : vector<8x4xf32> to vector<8x1xf32>
    %250 = vector.extract_strided_slice %233 {offsets = [2, 0, 0], sizes = [1, 8, 3], strides = [1, 1, 1]} : vector<4x8x3xf32> to vector<1x8x3xf32>
    %251 = vector.shape_cast %250 : vector<1x8x3xf32> to vector<8x3xf32>
    %252 = arith.subf %145, %251 : vector<8x3xf32>
    %253 = vector.broadcast %249 : vector<8x1xf32> to vector<8x3xf32>
    %254 = arith.mulf %253, %252 : vector<8x3xf32>
    %255 = arith.addf %248, %254 : vector<8x3xf32>
    %256 = vector.extract_strided_slice %229 {offsets = [0, 3], sizes = [8, 1], strides = [1, 1]} : vector<8x4xf32> to vector<8x1xf32>
    %257 = vector.extract_strided_slice %233 {offsets = [3, 0, 0], sizes = [1, 8, 3], strides = [1, 1, 1]} : vector<4x8x3xf32> to vector<1x8x3xf32>
    %258 = vector.shape_cast %257 : vector<1x8x3xf32> to vector<8x3xf32>
    %259 = arith.subf %145, %258 : vector<8x3xf32>
    %260 = vector.broadcast %256 : vector<8x1xf32> to vector<8x3xf32>
    %261 = arith.mulf %260, %259 : vector<8x3xf32>
    %262 = arith.addf %255, %261 : vector<8x3xf32>
    %cst_96 = arith.constant 2.500000e-01 : f32
    %263 = vector.broadcast %cst_96 : f32 to vector<8x3xf32>
    %264 = arith.mulf %262, %263 : vector<8x3xf32>
    %cst_97 = arith.constant -1.000000e+01 : f32
    %cst_98 = arith.constant 1.000000e+01 : f32
    %265 = vector.broadcast %cst_97 : f32 to vector<8x3xf32>
    %266 = arith.maximumf %265, %264 : vector<8x3xf32>
    %267 = vector.broadcast %cst_98 : f32 to vector<8x3xf32>
    %268 = arith.minimumf %267, %266 : vector<8x3xf32>
    %269 = vector.broadcast %8 : vector<8x1xf32> to vector<8x3xf32>
    %270 = arith.mulf %268, %269 : vector<8x3xf32>
    %271 = arith.addf %145, %270 : vector<8x3xf32>
    %c1_99 = arith.constant 1 : index
    %c0_100 = arith.constant 0 : index
    %c0_101 = arith.constant 0 : index
    %c0_102 = arith.constant 0 : index
    %272 = vector.load %arg7[%c1_99, %c0_100, %c0_101, %c0_102] : memref<3x4x32x8xf32, #tpu.memory_space<vmem>>, vector<1x4x32x8xf32>
    %273 = vector.shape_cast %272 : vector<1x4x32x8xf32> to vector<4x32x8xf32>
    %c1_103 = arith.constant 1 : index
    %c0_104 = arith.constant 0 : index
    %c0_105 = arith.constant 0 : index
    %c0_106 = arith.constant 0 : index
    %274 = vector.load %arg12[%c1_103, %c0_104, %c0_105, %c0_106] : memref<3x4x1x8xf32, #tpu.memory_space<vmem>>, vector<1x4x1x8xf32>
    %275 = vector.shape_cast %274 : vector<1x4x1x8xf32> to vector<4x1x8xf32>
    %c1_107 = arith.constant 1 : index
    %c0_108 = arith.constant 0 : index
    %c0_109 = arith.constant 0 : index
    %c0_110 = arith.constant 0 : index
    %276 = vector.load %arg8[%c1_107, %c0_108, %c0_109, %c0_110] : memref<3x4x8x32xf32, #tpu.memory_space<vmem>>, vector<1x4x8x32xf32>
    %277 = vector.shape_cast %276 : vector<1x4x8x32xf32> to vector<4x8x32xf32>
    %c1_111 = arith.constant 1 : index
    %c0_112 = arith.constant 0 : index
    %c0_113 = arith.constant 0 : index
    %278 = vector.load %arg13[%c1_111, %c0_112, %c0_113] : memref<3x1x32xf32, #tpu.memory_space<vmem>>, vector<1x1x32xf32>
    %279 = vector.shape_cast %278 : vector<1x1x32xf32> to vector<1x32xf32>
    %c1_114 = arith.constant 1 : index
    %c0_115 = arith.constant 0 : index
    %c0_116 = arith.constant 0 : index
    %280 = vector.load %arg16[%c1_114, %c0_115, %c0_116] : memref<3x1x32xf32, #tpu.memory_space<vmem>>, vector<1x1x32xf32>
    %281 = vector.shape_cast %280 : vector<1x1x32xf32> to vector<1x32xf32>
    %c1_117 = arith.constant 1 : index
    %c0_118 = arith.constant 0 : index
    %c0_119 = arith.constant 0 : index
    %282 = vector.load %arg17[%c1_117, %c0_118, %c0_119] : memref<3x1x32xf32, #tpu.memory_space<vmem>>, vector<1x1x32xf32>
    %283 = vector.shape_cast %282 : vector<1x1x32xf32> to vector<1x32xf32>
    %284 = vector.extract_strided_slice %201 {offsets = [0, 0, 0], sizes = [4, 8, 32], strides = [1, 1, 1]} : vector<8x8x32xf32> to vector<4x8x32xf32>
    "tpu.trace_start"() <{level = 10 : i32, message = "hnc,hcd->hnd"}> : () -> ()
    %cst_120 = arith.constant dense<0.000000e+00> : vector<4x8x8xf32>
    %285 = tpu.matmul %284, %273, %cst_120 {dimension_numbers = #tpu.dot_dimension_numbers<[2], [1], [1], [2], [0, 0, 0, 1, 1, 2], [0], [0]>} : vector<4x8x32xf32>, vector<4x32x8xf32>, vector<4x8x8xf32> -> vector<4x8x8xf32>
    "tpu.trace_stop"() : () -> ()
    %286 = vector.broadcast %275 : vector<4x1x8xf32> to vector<4x8x8xf32>
    %287 = arith.addf %285, %286 : vector<4x8x8xf32>
    %288 = arith.truncf %287 : vector<4x8x8xf32> to vector<4x8x8xbf16>
    "tpu.trace_start"() <{level = 10 : i32, message = "hnm,hmd->hnd"}> : () -> ()
    %cst_121 = arith.constant dense<0.000000e+00> : vector<4x8x8xf32>
    %289 = tpu.matmul %221, %288, %cst_121 {dimension_numbers = #tpu.dot_dimension_numbers<[2], [1], [1], [2], [0, 0, 0, 1, 1, 2], [0], [0]>} : vector<4x8x8xbf16>, vector<4x8x8xbf16>, vector<4x8x8xf32> -> vector<4x8x8xf32>
    "tpu.trace_stop"() : () -> ()
    "tpu.trace_start"() <{level = 10 : i32, message = "hnd,hdc->hnc"}> : () -> ()
    %cst_122 = arith.constant dense<0.000000e+00> : vector<4x8x32xf32>
    %290 = tpu.matmul %289, %277, %cst_122 {dimension_numbers = #tpu.dot_dimension_numbers<[2], [1], [1], [2], [0, 0, 0, 1, 1, 2], [0], [0]>} : vector<4x8x8xf32>, vector<4x8x32xf32>, vector<4x8x32xf32> -> vector<4x8x32xf32>
    "tpu.trace_stop"() : () -> ()
    %cst_123 = arith.constant dense<0.000000e+00> : vector<8x32xf32>
    %291 = vector.multi_reduction <add>, %290, %cst_123 [0] : vector<4x8x32xf32> to vector<8x32xf32>
    %292 = vector.broadcast %279 : vector<1x32xf32> to vector<8x32xf32>
    %293 = arith.addf %291, %292 : vector<8x32xf32>
    %294 = arith.addf %190, %293 : vector<8x32xf32>
    %cst_124 = arith.constant dense<0.000000e+00> : vector<8xf32>
    %295 = vector.multi_reduction <add>, %294, %cst_124 [1] : vector<8x32xf32> to vector<8xf32>
    %296 = vector.shape_cast %295 : vector<8xf32> to vector<8x1xf32>
    %cst_125 = arith.constant 3.200000e+01 : f32
    %297 = vector.broadcast %cst_125 : f32 to vector<8x1xf32>
    %298 = arith.divf %296, %297 : vector<8x1xf32>
    %299 = vector.broadcast %298 : vector<8x1xf32> to vector<8x32xf32>
    %300 = arith.subf %294, %299 : vector<8x32xf32>
    %301 = arith.mulf %300, %300 : vector<8x32xf32>
    %cst_126 = arith.constant dense<0.000000e+00> : vector<8xf32>
    %302 = vector.multi_reduction <add>, %301, %cst_126 [1] : vector<8x32xf32> to vector<8xf32>
    %303 = vector.shape_cast %302 : vector<8xf32> to vector<8x1xf32>
    %cst_127 = arith.constant 3.200000e+01 : f32
    %304 = vector.broadcast %cst_127 : f32 to vector<8x1xf32>
    %305 = arith.divf %303, %304 : vector<8x1xf32>
    %306 = vector.broadcast %298 : vector<8x1xf32> to vector<8x32xf32>
    %307 = arith.subf %294, %306 : vector<8x32xf32>
    %cst_128 = arith.constant 9.99999974E-6 : f32
    %308 = vector.broadcast %cst_128 : f32 to vector<8x1xf32>
    %309 = arith.addf %305, %308 : vector<8x1xf32>
    %310 = math.rsqrt %309 : vector<8x1xf32>
    %311 = vector.broadcast %310 : vector<8x1xf32> to vector<8x32xf32>
    %312 = arith.mulf %307, %311 : vector<8x32xf32>
    %313 = vector.broadcast %281 : vector<1x32xf32> to vector<8x32xf32>
    %314 = arith.mulf %312, %313 : vector<8x32xf32>
    %315 = vector.broadcast %283 : vector<1x32xf32> to vector<8x32xf32>
    %316 = arith.addf %314, %315 : vector<8x32xf32>
    %c2 = arith.constant 2 : index
    %c0_129 = arith.constant 0 : index
    %c0_130 = arith.constant 0 : index
    %c0_131 = arith.constant 0 : index
    %317 = vector.load %arg6[%c2, %c0_129, %c0_130, %c0_131] : memref<3x8x32x8xf32, #tpu.memory_space<vmem>>, vector<1x8x32x8xf32>
    %318 = vector.shape_cast %317 : vector<1x8x32x8xf32> to vector<8x32x8xf32>
    %c2_132 = arith.constant 2 : index
    %c0_133 = arith.constant 0 : index
    %c0_134 = arith.constant 0 : index
    %c0_135 = arith.constant 0 : index
    %319 = vector.load %arg11[%c2_132, %c0_133, %c0_134, %c0_135] : memref<3x8x1x8xf32, #tpu.memory_space<vmem>>, vector<1x8x1x8xf32>
    %320 = vector.shape_cast %319 : vector<1x8x1x8xf32> to vector<8x1x8xf32>
    %c2_136 = arith.constant 2 : index
    %c0_137 = arith.constant 0 : index
    %c0_138 = arith.constant 0 : index
    %321 = vector.load %arg10[%c2_136, %c0_137, %c0_138] : memref<3x32x4xf32, #tpu.memory_space<vmem>>, vector<1x32x4xf32>
    %322 = vector.shape_cast %321 : vector<1x32x4xf32> to vector<32x4xf32>
    %c2_139 = arith.constant 2 : index
    %c0_140 = arith.constant 0 : index
    %c0_141 = arith.constant 0 : index
    %323 = vector.load %arg15[%c2_139, %c0_140, %c0_141] : memref<3x1x4xf32, #tpu.memory_space<vmem>>, vector<1x1x4xf32>
    %324 = vector.shape_cast %323 : vector<1x1x4xf32> to vector<1x4xf32>
    %325 = vector.shape_cast %316 : vector<8x32xf32> to vector<1x8x32xf32>
    %326 = vector.shape_cast %325 : vector<1x8x32xf32> to vector<1x8x32xf32>
    %327 = vector.broadcast %326 : vector<1x8x32xf32> to vector<8x8x32xf32>
    "tpu.trace_start"() <{level = 10 : i32, message = "hnc,hcd->hnd"}> : () -> ()
    %cst_142 = arith.constant dense<0.000000e+00> : vector<8x8x8xf32>
    %328 = tpu.matmul %327, %318, %cst_142 {dimension_numbers = #tpu.dot_dimension_numbers<[2], [1], [1], [2], [0, 0, 0, 1, 1, 2], [0], [0]>} : vector<8x8x32xf32>, vector<8x32x8xf32>, vector<8x8x8xf32> -> vector<8x8x8xf32>
    "tpu.trace_stop"() : () -> ()
    %329 = vector.broadcast %320 : vector<8x1x8xf32> to vector<8x8x8xf32>
    %330 = arith.addf %328, %329 : vector<8x8x8xf32>
    %331 = vector.extract_strided_slice %330 {offsets = [0, 0, 0], sizes = [4, 8, 8], strides = [1, 1, 1]} : vector<8x8x8xf32> to vector<4x8x8xf32>
    %332 = vector.extract_strided_slice %330 {offsets = [4, 0, 0], sizes = [4, 8, 8], strides = [1, 1, 1]} : vector<8x8x8xf32> to vector<4x8x8xf32>
    %333 = arith.truncf %331 : vector<4x8x8xf32> to vector<4x8x8xbf16>
    %334 = arith.truncf %332 : vector<4x8x8xf32> to vector<4x8x8xbf16>
    "tpu.trace_start"() <{level = 10 : i32, message = "hnd,hmd->hnm"}> : () -> ()
    %cst_143 = arith.constant dense<0.000000e+00> : vector<4x8x8xf32>
    %335 = tpu.matmul %333, %334, %cst_143 {dimension_numbers = #tpu.dot_dimension_numbers<[2], [2], [1], [1], [0, 0, 0, 1, 1, 1], [0], [0]>} : vector<4x8x8xbf16>, vector<4x8x8xbf16>, vector<4x8x8xf32> -> vector<4x8x8xf32>
    "tpu.trace_stop"() : () -> ()
    %336 = arith.addf %335, %64 : vector<4x8x8xf32>
    %cst_144 = arith.constant dense<0xFF800000> : vector<4x8xf32>
    %337 = vector.multi_reduction <maximumf>, %336, %cst_144 [2] : vector<4x8x8xf32> to vector<4x8xf32>
    %338 = vector.shape_cast %337 : vector<4x8xf32> to vector<4x8x1xf32>
    %339 = vector.broadcast %338 : vector<4x8x1xf32> to vector<4x8x8xf32>
    %340 = arith.subf %336, %339 : vector<4x8x8xf32>
    %341 = math.exp %340 : vector<4x8x8xf32>
    %cst_145 = arith.constant dense<0.000000e+00> : vector<4x8xf32>
    %342 = vector.multi_reduction <add>, %341, %cst_145 [2] : vector<4x8x8xf32> to vector<4x8xf32>
    %343 = vector.shape_cast %342 : vector<4x8xf32> to vector<4x8x1xf32>
    %344 = tpu.reciprocal %343 {approx = true} : vector<4x8x1xf32> -> vector<4x8x1xf32>
    %345 = vector.broadcast %344 : vector<4x8x1xf32> to vector<4x8x8xf32>
    %346 = arith.mulf %341, %345 : vector<4x8x8xf32>
    %347 = arith.truncf %346 : vector<4x8x8xf32> to vector<4x8x8xbf16>
    %cst_146 = arith.constant dense<0.000000e+00> : vector<8x4xf32>
    %348 = tpu.matmul %316, %322, %cst_146 {dimension_numbers = #tpu.dot_dimension_numbers<[1], [0], [0], [1], [0, 0, 1, 1], [], []>} : vector<8x32xf32>, vector<32x4xf32>, vector<8x4xf32> -> vector<8x4xf32>
    %349 = vector.broadcast %324 : vector<1x4xf32> to vector<8x4xf32>
    %350 = arith.addf %348, %349 : vector<8x4xf32>
    %351 = arith.negf %350 : vector<8x4xf32>
    %352 = math.exp %351 : vector<8x4xf32>
    %cst_147 = arith.constant 1.000000e+00 : f32
    %353 = vector.broadcast %cst_147 : f32 to vector<8x4xf32>
    %354 = arith.addf %353, %352 : vector<8x4xf32>
    %355 = arith.divf %353, %354 : vector<8x4xf32>
    %356 = vector.shape_cast %347 : vector<4x8x8xbf16> to vector<32x8xbf16>
    %357 = arith.truncf %271 : vector<8x3xf32> to vector<8x3xbf16>
    %cst_148 = arith.constant dense<0.000000e+00> : vector<32x3xf32>
    %358 = tpu.matmul %356, %357, %cst_148 {dimension_numbers = #tpu.dot_dimension_numbers<[1], [0], [0], [1], [0, 0, 1, 1], [], []>} : vector<32x8xbf16>, vector<8x3xbf16>, vector<32x3xf32> -> vector<32x3xf32>
    %359 = vector.shape_cast %358 : vector<32x3xf32> to vector<4x8x3xf32>
    %cst_149 = arith.constant 0.000000e+00 : f32
    %360 = vector.broadcast %cst_149 : f32 to vector<8x3xf32>
    %361 = vector.extract_strided_slice %355 {offsets = [0, 0], sizes = [8, 1], strides = [1, 1]} : vector<8x4xf32> to vector<8x1xf32>
    %362 = vector.extract_strided_slice %359 {offsets = [0, 0, 0], sizes = [1, 8, 3], strides = [1, 1, 1]} : vector<4x8x3xf32> to vector<1x8x3xf32>
    %363 = vector.shape_cast %362 : vector<1x8x3xf32> to vector<8x3xf32>
    %364 = arith.subf %271, %363 : vector<8x3xf32>
    %365 = vector.broadcast %361 : vector<8x1xf32> to vector<8x3xf32>
    %366 = arith.mulf %365, %364 : vector<8x3xf32>
    %367 = arith.addf %360, %366 : vector<8x3xf32>
    %368 = vector.extract_strided_slice %355 {offsets = [0, 1], sizes = [8, 1], strides = [1, 1]} : vector<8x4xf32> to vector<8x1xf32>
    %369 = vector.extract_strided_slice %359 {offsets = [1, 0, 0], sizes = [1, 8, 3], strides = [1, 1, 1]} : vector<4x8x3xf32> to vector<1x8x3xf32>
    %370 = vector.shape_cast %369 : vector<1x8x3xf32> to vector<8x3xf32>
    %371 = arith.subf %271, %370 : vector<8x3xf32>
    %372 = vector.broadcast %368 : vector<8x1xf32> to vector<8x3xf32>
    %373 = arith.mulf %372, %371 : vector<8x3xf32>
    %374 = arith.addf %367, %373 : vector<8x3xf32>
    %375 = vector.extract_strided_slice %355 {offsets = [0, 2], sizes = [8, 1], strides = [1, 1]} : vector<8x4xf32> to vector<8x1xf32>
    %376 = vector.extract_strided_slice %359 {offsets = [2, 0, 0], sizes = [1, 8, 3], strides = [1, 1, 1]} : vector<4x8x3xf32> to vector<1x8x3xf32>
    %377 = vector.shape_cast %376 : vector<1x8x3xf32> to vector<8x3xf32>
    %378 = arith.subf %271, %377 : vector<8x3xf32>
    %379 = vector.broadcast %375 : vector<8x1xf32> to vector<8x3xf32>
    %380 = arith.mulf %379, %378 : vector<8x3xf32>
    %381 = arith.addf %374, %380 : vector<8x3xf32>
    %382 = vector.extract_strided_slice %355 {offsets = [0, 3], sizes = [8, 1], strides = [1, 1]} : vector<8x4xf32> to vector<8x1xf32>
    %383 = vector.extract_strided_slice %359 {offsets = [3, 0, 0], sizes = [1, 8, 3], strides = [1, 1, 1]} : vector<4x8x3xf32> to vector<1x8x3xf32>
    %384 = vector.shape_cast %383 : vector<1x8x3xf32> to vector<8x3xf32>
    %385 = arith.subf %271, %384 : vector<8x3xf32>
    %386 = vector.broadcast %382 : vector<8x1xf32> to vector<8x3xf32>
    %387 = arith.mulf %386, %385 : vector<8x3xf32>
    %388 = arith.addf %381, %387 : vector<8x3xf32>
    %cst_150 = arith.constant 2.500000e-01 : f32
    %389 = vector.broadcast %cst_150 : f32 to vector<8x3xf32>
    %390 = arith.mulf %388, %389 : vector<8x3xf32>
    %cst_151 = arith.constant -1.000000e+01 : f32
    %cst_152 = arith.constant 1.000000e+01 : f32
    %391 = vector.broadcast %cst_151 : f32 to vector<8x3xf32>
    %392 = arith.maximumf %391, %390 : vector<8x3xf32>
    %393 = vector.broadcast %cst_152 : f32 to vector<8x3xf32>
    %394 = arith.minimumf %393, %392 : vector<8x3xf32>
    %395 = vector.broadcast %8 : vector<8x1xf32> to vector<8x3xf32>
    %396 = arith.mulf %394, %395 : vector<8x3xf32>
    %397 = arith.addf %271, %396 : vector<8x3xf32>
    %c0_153 = arith.constant 0 : index
    %c0_154 = arith.constant 0 : index
    %c0_155 = arith.constant 0 : index
    %398 = vector.load %arg18[%c0_153, %c0_154, %c0_155] : memref<1x8x32xf32, #tpu.memory_space<vmem>>, vector<1x8x32xf32>
    %399 = vector.shape_cast %398 : vector<1x8x32xf32> to vector<8x32xf32>
    %400 = vector.shape_cast %316 : vector<8x32xf32> to vector<1x8x32xf32>
    tpu.vector_store %arg18[%c0_153, %c0_154, %c0_155], %400 {strides = array<i32>} : memref<1x8x32xf32, #tpu.memory_space<vmem>>, vector<1x8x32xf32>,
    %401 = vector.shape_cast %145 : vector<8x3xf32> to vector<1x8x3xf32>
    %402 = vector.shape_cast %271 : vector<8x3xf32> to vector<1x8x3xf32>
    %403 = vector.shape_cast %397 : vector<8x3xf32> to vector<1x8x3xf32>
    %404 = tpu.concatenate %401, %402, %403 in 0 : vector<1x8x3xf32>, vector<1x8x3xf32>, vector<1x8x3xf32> -> vector<3x8x3xf32>
    %c0_156 = arith.constant 0 : index
    %c0_157 = arith.constant 0 : index
    %c0_158 = arith.constant 0 : index
    %c0_159 = arith.constant 0 : index
    %405 = vector.load %arg19[%c0_156, %c0_157, %c0_158, %c0_159] : memref<1x3x8x3xf32, #tpu.memory_space<vmem>>, vector<1x3x8x3xf32>
    %406 = vector.shape_cast %405 : vector<1x3x8x3xf32> to vector<3x8x3xf32>
    %407 = vector.shape_cast %404 : vector<3x8x3xf32> to vector<1x3x8x3xf32>
    tpu.vector_store %arg19[%c0_156, %c0_157, %c0_158, %c0_159], %407 {strides = array<i32>} : memref<1x3x8x3xf32, #tpu.memory_space<vmem>>, vector<1x3x8x3xf32>,
    return
  }
  func.func @transform_0(%arg0: i32) -> (i32, i32, i32) {
    %c0_i32 = arith.constant 0 : i32
    %c0_i32_0 = arith.constant 0 : i32
    %c0_i32_1 = arith.constant 0 : i32
    return %arg0, %c0_i32, %c0_i32_0 : i32, i32, i32
  }
  func.func @transform_1(%arg0: i32) -> (i32, i32, i32) {
    %c0_i32 = arith.constant 0 : i32
    %c0_i32_0 = arith.constant 0 : i32
    %c0_i32_1 = arith.constant 0 : i32
    return %arg0, %c0_i32, %c0_i32_0 : i32, i32, i32
  }
  func.func @transform_2(%arg0: i32) -> (i32, i32, i32) {
    %c0_i32 = arith.constant 0 : i32
    %c0_i32_0 = arith.constant 0 : i32
    %c0_i32_1 = arith.constant 0 : i32
    return %arg0, %c0_i32, %c0_i32_0 : i32, i32, i32
  }
  func.func @transform_3(%arg0: i32) -> (i32, i32, i32) {
    %c0_i32 = arith.constant 0 : i32
    %c0_i32_0 = arith.constant 0 : i32
    %c0_i32_1 = arith.constant 0 : i32
    return %arg0, %c0_i32, %c0_i32_0 : i32, i32, i32
  }
  func.func @transform_4(%arg0: i32) -> (i32, i32, i32) {
    %c0_i32 = arith.constant 0 : i32
    %c0_i32_0 = arith.constant 0 : i32
    %c0_i32_1 = arith.constant 0 : i32
    return %arg0, %c0_i32, %c0_i32_0 : i32, i32, i32
  }
  func.func @transform_5(%arg0: i32) -> (i32, i32, i32, i32) {
    %c0_i32 = arith.constant 0 : i32
    %c0_i32_0 = arith.constant 0 : i32
    %c0_i32_1 = arith.constant 0 : i32
    %c0_i32_2 = arith.constant 0 : i32
    %c0_i32_3 = arith.constant 0 : i32
    return %c0_i32, %c0_i32_0, %c0_i32_1, %c0_i32_2 : i32, i32, i32, i32
  }
  func.func @transform_6(%arg0: i32) -> (i32, i32, i32, i32) {
    %c0_i32 = arith.constant 0 : i32
    %c0_i32_0 = arith.constant 0 : i32
    %c0_i32_1 = arith.constant 0 : i32
    %c0_i32_2 = arith.constant 0 : i32
    %c0_i32_3 = arith.constant 0 : i32
    return %c0_i32, %c0_i32_0, %c0_i32_1, %c0_i32_2 : i32, i32, i32, i32
  }
  func.func @transform_7(%arg0: i32) -> (i32, i32, i32, i32) {
    %c0_i32 = arith.constant 0 : i32
    %c0_i32_0 = arith.constant 0 : i32
    %c0_i32_1 = arith.constant 0 : i32
    %c0_i32_2 = arith.constant 0 : i32
    %c0_i32_3 = arith.constant 0 : i32
    return %c0_i32, %c0_i32_0, %c0_i32_1, %c0_i32_2 : i32, i32, i32, i32
  }
  func.func @transform_8(%arg0: i32) -> (i32, i32) {
    %c0_i32 = arith.constant 0 : i32
    %c0_i32_0 = arith.constant 0 : i32
    %c0_i32_1 = arith.constant 0 : i32
    return %c0_i32, %c0_i32_0 : i32, i32
  }
  func.func @transform_9(%arg0: i32) -> (i32, i32, i32) {
    %c0_i32 = arith.constant 0 : i32
    %c0_i32_0 = arith.constant 0 : i32
    %c0_i32_1 = arith.constant 0 : i32
    %c0_i32_2 = arith.constant 0 : i32
    return %c0_i32, %c0_i32_0, %c0_i32_1 : i32, i32, i32
  }
  func.func @transform_10(%arg0: i32) -> (i32, i32, i32, i32) {
    %c0_i32 = arith.constant 0 : i32
    %c0_i32_0 = arith.constant 0 : i32
    %c0_i32_1 = arith.constant 0 : i32
    %c0_i32_2 = arith.constant 0 : i32
    %c0_i32_3 = arith.constant 0 : i32
    return %c0_i32, %c0_i32_0, %c0_i32_1, %c0_i32_2 : i32, i32, i32, i32
  }
  func.func @transform_11(%arg0: i32) -> (i32, i32, i32, i32) {
    %c0_i32 = arith.constant 0 : i32
    %c0_i32_0 = arith.constant 0 : i32
    %c0_i32_1 = arith.constant 0 : i32
    %c0_i32_2 = arith.constant 0 : i32
    %c0_i32_3 = arith.constant 0 : i32
    return %c0_i32, %c0_i32_0, %c0_i32_1, %c0_i32_2 : i32, i32, i32, i32
  }
  func.func @transform_12(%arg0: i32) -> (i32, i32, i32) {
    %c0_i32 = arith.constant 0 : i32
    %c0_i32_0 = arith.constant 0 : i32
    %c0_i32_1 = arith.constant 0 : i32
    %c0_i32_2 = arith.constant 0 : i32
    return %c0_i32, %c0_i32_0, %c0_i32_1 : i32, i32, i32
  }
  func.func @transform_13(%arg0: i32) -> (i32, i32) {
    %c0_i32 = arith.constant 0 : i32
    %c0_i32_0 = arith.constant 0 : i32
    %c0_i32_1 = arith.constant 0 : i32
    return %c0_i32, %c0_i32_0 : i32, i32
  }
  func.func @transform_14(%arg0: i32) -> (i32, i32, i32) {
    %c0_i32 = arith.constant 0 : i32
    %c0_i32_0 = arith.constant 0 : i32
    %c0_i32_1 = arith.constant 0 : i32
    %c0_i32_2 = arith.constant 0 : i32
    return %c0_i32, %c0_i32_0, %c0_i32_1 : i32, i32, i32
  }
  func.func @transform_15(%arg0: i32) -> (i32, i32, i32) {
    %c0_i32 = arith.constant 0 : i32
    %c0_i32_0 = arith.constant 0 : i32
    %c0_i32_1 = arith.constant 0 : i32
    %c0_i32_2 = arith.constant 0 : i32
    return %c0_i32, %c0_i32_0, %c0_i32_1 : i32, i32, i32
  }
  func.func @transform_16(%arg0: i32) -> (i32, i32, i32) {
    %c0_i32 = arith.constant 0 : i32
    %c0_i32_0 = arith.constant 0 : i32
    %c0_i32_1 = arith.constant 0 : i32
    %c0_i32_2 = arith.constant 0 : i32
    return %c0_i32, %c0_i32_0, %c0_i32_1 : i32, i32, i32
  }
  func.func @transform_17(%arg0: i32) -> (i32, i32, i32) {
    %c0_i32 = arith.constant 0 : i32
    %c0_i32_0 = arith.constant 0 : i32
    %c0_i32_1 = arith.constant 0 : i32
    return %arg0, %c0_i32, %c0_i32_0 : i32, i32, i32
  }
  func.func @transform_18(%arg0: i32) -> (i32, i32, i32, i32) {
    %c0_i32 = arith.constant 0 : i32
    %c0_i32_0 = arith.constant 0 : i32
    %c0_i32_1 = arith.constant 0 : i32
    %c0_i32_2 = arith.constant 0 : i32
    return %arg0, %c0_i32, %c0_i32_0, %c0_i32_1 : i32, i32, i32, i32
  }
}

</mosaic_0001>

<bundles_post_ra>
// kernel: tpu_custom_call.1
= control target key start
LH: loop header
LB: loop body
LE: loop exit
PB: predicated region body
PF: predicated region fallthrough
CT: control target
= control target key end

     0   :  { %s5784_s0 = inlined_call_operand.vmem [shape: f32[2,8,32], index: 0, kind: input, shape index: {}]   ;;  %s5785_s1 = inlined_call_operand.vmem [shape: f32[2,8,3], index: 1, kind: input, shape index: {}]   ;;  %s5786_s2 = inlined_call_operand.vmem [shape: bf16[2,64,16], index: 2, kind: input, shape index: {}]   ;;  %s5787_s3 = inlined_call_operand.vmem [shape: f32[2,1,8], index: 3, kind: input, shape index: {}]   ;;  %s5788_s4 = inlined_call_operand.vmem [shape: f32[2,8,1], index: 4, kind: input, shape index: {}]   ;;  %s5789_s5 = inlined_call_operand.vmem [shape: f32[3,8,32,8], index: 5, kind: input, shape index: {}]   ;;  %s5790_s6 = inlined_call_operand.vmem [shape: f32[3,4,32,8], index: 6, kind: input, shape index: {}]   ;;  %s5791_s7 = inlined_call_operand.vmem [shape: f32[3,4,8,32], index: 7, kind: input, shape index: {}]   ;;  %s5792_s8 = inlined_call_operand.vmem [shape: f32[16,12], index: 8, kind: input, shape index: {}]   ;;  %s5793_s9 = inlined_call_operand.vmem [shape: f32[3,32,4], index: 9, kind: input, shape index: {}]   ;;  %s5794_s10 = inlined_call_operand.vmem [shape: f32[3,8,1,8], index: 10, kind: input, shape index: {}]   ;;  %s5795_s11 = inlined_call_operand.vmem [shape: f32[3,4,1,8], index: 11, kind: input, shape index: {}]   ;;  %s5796_s12 = inlined_call_operand.vmem [shape: f32[3,1,32], index: 12, kind: input, shape index: {}]   ;;  %s5797_s13 = inlined_call_operand.vmem [shape: f32[1,12], index: 13, kind: input, shape index: {}]   ;;  %s5798_s14 = inlined_call_operand.vmem [shape: f32[3,1,4], index: 14, kind: input, shape index: {}]   ;;  %s5799_s15 = inlined_call_operand.vmem [shape: f32[3,1,32], index: 15, kind: input, shape index: {}]   ;;  %s5800_s16 = inlined_call_operand.vmem [shape: f32[3,1,32], index: 16, kind: input, shape index: {}]   ;;  %s5801_s17 = inlined_call_operand.hbm [shape: f32[2,8,32], index: 17, kind: output, shape index: {0}]   ;;  %s5802_s18 = inlined_call_operand.vmem [shape: f32[2,3,8,3], index: 18, kind: output, shape index: {1}]  }
   0x1   :  { %5825 = sst [smem:[#allocation22_spill]] %s5784_s0 }
   0x2   :  { %5826 = sst [smem:[#allocation23_spill]] %s5785_s1 }
   0x3   :  { %5827 = sst [smem:[#allocation24_spill]] %s5786_s2 }
   0x4   :  { %5828 = sst [smem:[#allocation25_spill]] %s5787_s3 }
   0x5   :  { %5829 = sst [smem:[#allocation26_spill]] %s5788_s4 }
   0x6   :  { %5830 = sst [smem:[#allocation27_spill]] %s5792_s8 }
   0x7   :  { %5831 = sst [smem:[#allocation28_spill]] %s5801_s17 }
   0x8   :  { %24 = vsyncpa [#allocation3], 0 }
   0x9   :  { %26 = vsyncpa [#allocation3 + $0x1], 0  ;;  %s4253_s27 = smov 0   ;;  %s4255_s28 = smov 0  }
   0xa   :  { %s4257_s29 = smov 0   ;;  %s4259_s30 = smov 0  }
   0xb LB: > { %5832 = sst [smem:[#allocation5_spill]] %s4134_s27  ;;  %s4274_s0 = sadd.s32 4294967295, %s4146_s30   ;;  %s4146_s30 = sphi %s4259_s30, %s5873_s30   ;;  %s4142_s29 = sphi %s4257_s29, %s5878_s29   ;;  %s4138_s28 = sphi %s4255_s28, %s5877_s28   ;;  %s4134_s27 = sphi %s4253_s27, %s5876_s27  }
   0xc   : > { %5833 = sst [smem:[#allocation6_spill]] %s4142_s29  ;;  %s3668_s19 = sadd.s32 4294967294, %s4146_s30  }
   0xd   : > { %5834 = sst [smem:[#allocation7_spill]] %s4146_s30  ;;  %s4278_s1 = sadd.s32 1, %s4146_s30  }
   0xe   : > { %5835 = sst [smem:[#allocation8_spill]] %s4278_s1  ;;  %s421_s20 = sadd.s32 1, %s4142_s29 }
   0xf   : > { %s418_s21 = ssub.s32 %s4146_s30, %s4278_s1  ;;  %p431_p0 = scmp.ne.s32.totalorder %s4142_s29, %s4138_s28 }
  0x10   : > { %p419_p1 = scmp.eq.s32.totalorder %s418_s21, 0  ;;  %p432_p2 = scmp.eq.s32.totalorder %s4274_s0, 1 }
  0x11   : > { %p437_p3 = scmp.ne.s32.totalorder %s4138_s28, %s4134_s27  ;;  %p438_p4 = scmp.eq.s32.totalorder %s3668_s19, 1 }
  0x12   : > { %s4289_s22 = scalar_select %p419_p1, %s4142_s29, %s421_s20  }
  0x13   : > { %p4291_p5 = por %p432_p2, %p431_p0  ;;  %p4295_p6 = por %p438_p4, %p437_p3 }
  0x14   : > { %5836 = sst [smem:[#allocation9_spill]] %s4289_s22  ;;  %p3671_p7 = scmp.ge.s32.totalorder %s4146_s30, 1 }
  0x15   : > { %s5837_s2 = scalar_select %p4291_p5, 1, 0 }
  0x16   : > { %s5839_s23 = scalar_select %p4295_p6, 1, 0 }
  0x17   : > { %5838 = sst [smem:[#allocation10_spill]] %s5837_s2  ;;  %p553_p8 = scmp.lt.s32.totalorder %s4146_s30, 3 }
  0x18   : > { %5840 = sst [smem:[#allocation11_spill]] %s5839_s23 }
  0x19   : > { %p554_p9 = pnand %p3671_p7, %p553_p8 }
  0x1b   : > { %557 = sbr.rel (%p554_p9) target bundleno = 3102 (0xc1e), region = 88 }
  0x20   : > { %s5841_s8 = sld [smem:[#allocation27_spill]]  ;;  %p627_p10 = scmp.lt.s32.totalorder %s4274_s0, 1  ;;  %v818_v2 = vlaneseq  ;;  %vm694_vm0 = vcmask 130048   ;;  %v864_v8 = vld [vmem:[%s5789_s5 + $0x38] sm:$0xff]  ;;  %v863_v9 = vld [vmem:[%s5789_s5 + $0x30] sm:$0xff]  ;;  %v862_v10 = vld [vmem:[%s5789_s5 + $0x28] sm:$0xff] }
  0x21   : > { %s5842_s19 = sld [smem:[#allocation24_spill]]  ;;  %962 = vmatpush.msra.mxu2 %v864_v8  ;;  %v861_v12 = vld [vmem:[%s5789_s5 + $0x20] sm:$0xff]  ;;  %vm926_vm1 = vcmask 261120   ;;  %v876_v15 = vld [vmem:[%s5789_s5 + $0x98] sm:$0xff]  ;;  %v875_v16 = vld [vmem:[%s5789_s5 + $0x90] sm:$0xff]  ;;  %v5812_v37 = vmov 0  }
  0x22   : > { %s4309_s20 = scalar_select %p627_p10, %s4274_s0, 1  ;;  %v819_v4 = vshrl.u32 %v818_v2, 7  ;;  %v874_v17 = vld [vmem:[%s5789_s5 + $0x88] sm:$0xff]  ;;  %v873_v19 = vld [vmem:[%s5789_s5 + $0x80] sm:$0xff]  ;;  %v860_v20 = vld [vmem:[%s5789_s5 + $0x18] sm:$0xff]  ;;  %3952 = vset.pattern.permute.xlu2 %v5812_v37  ;;  %3953 = vset.pattern.permute.xlu0 %v5812_v37  ;;  %vm1155_vm2 = vcmask 64512  }
  0x23   : > { %s5843_s3 = sld [smem:[#allocation25_spill]]  ;;  %963 = vmatpush.msra.mxu2 %v863_v9  ;;  %v859_v21 = vld [vmem:[%s5789_s5 + $0x10] sm:$0xff]  ;;  %942 = vmatpush.msra.mxu1 %v860_v20  ;;  %v868_v22 = vld [vmem:[%s5789_s5 + $0x58] sm:$0xff]  ;;  %v858_v23 = vld [vmem:[%s5789_s5 + $0x8] sm:$0xff]  ;;  %s4149_s2 = smov 125   ;;  %vm1140_vm3 = vcmask 1041409  }
  0x24   : > { %s4313_s21 = sshll.u32 %s4309_s20, 3  ;;  %s3895_s24 = sshll.u32 %s4309_s20, 5  ;;  %3950 = vset.pattern.permute.xlu1 %v819_v4  ;;  %982 = vmatpush.msra.mxu3 %v868_v22  ;;  %v867_v24 = vld [vmem:[%s5789_s5 + $0x50] sm:$0xff]  ;;  %v866_v25 = vld [vmem:[%s5789_s5 + $0x48] sm:$0xff]  ;;  %v857_v26 = vld [vmem:[%s5789_s5] sm:$0xff]  ;;  %vm1142_vm4 = vcmask 1042434  }
  0x25   : > { %s5844_s30 = sld [smem:[#allocation22_spill]]  ;;  %964 = vmatpush.msra.mxu2 %v862_v10  ;;  %943 = vmatpush.msra.mxu1 %v859_v21  ;;  %v865_v27 = vld [vmem:[%s5789_s5 + $0x40] sm:$0xff]  ;;  %v880_v28 = vld [vmem:[%s5789_s5 + $0xb8] sm:$0xff]  ;;  %v879_v29 = vld [vmem:[%s5789_s5 + $0xb0] sm:$0xff]  ;;  %s4150_s23 = smov 127   ;;  %vm1144_vm5 = vcmask 1043459  }
  0x26   : > { %v667_v0 = vld [vmem:[%s5841_s8] sm:$0xff]  ;;  %v668_v1 = vld [vmem:[%s5841_s8 + $0x8] sm:$0xff]  ;;  %983 = vmatpush.msra.mxu3 %v867_v24  ;;  %v872_v34 = vld [vmem:[%s5789_s5 + $0x78] sm:$0xff]  ;;  %vm1146_vm6 = vcmask 1044484   ;;  %vm1148_vm7 = vcmask 1045509   ;;  %vm1150_vm8 = vcmask 1046534  }
  0x27   : > { %v669_v3 = vpack.c.bf16 %v668_v1, %v667_v0  ;;  %s4319_s8 = scalar_lea.vmem %s5842_s19, %s3895_s24  ;;  %965 = vmatpush.msra.mxu2 %v861_v12  ;;  %944 = vmatpush.msra.mxu1 %v858_v23  ;;  %v878_v30 = vld [vmem:[%s5789_s5 + $0xa8] sm:$0xff]  ;;  %v877_v32 = vld [vmem:[%s5789_s5 + $0xa0] sm:$0xff]  ;;  %v871_v35 = vld [vmem:[%s5789_s5 + $0x70] sm:$0xff]  ;;  %s4151_s19 = smov 126   ;;  %vm1152_vm9 = vcmask 1047559   ;;  %vm1483_vm10 = vcmask 1043456  }
  0x28   : > { %v3896_v5 = vld [vmem:[%s4319_s8] sm:$0xff]  ;;  %v3897_v18 = vld [vmem:[%s4319_s8 + $0x8] sm:$0xff]  ;;  %984 = vmatpush.msra.mxu3 %v866_v25  ;;  %v3898_v31 = vld [vmem:[%s4319_s8 + $0x10] sm:$0xff]  ;;  %s5854_s24 = sld [smem:[#allocation23_spill]] }
  0x29   : > { %714 = vmatpush.bf16.msra.mxu0 %v669_v3  ;;  %s642_s1 = scalar_lea.vmem %s5843_s3, %s4309_s20  ;;  %1022 = vmatpush.msrb.mxu2 %v876_v15  ;;  %v3899_v33 = vld [vmem:[%s4319_s8 + $0x18] sm:$0xff]  ;;  %v870_v36 = vld [vmem:[%s5789_s5 + $0x68] sm:$0xff]  ;;  %v869_v38 = vld [vmem:[%s5789_s5 + $0x60] sm:$0xff]  ;;  %s5856_s4 = sld [smem:[#allocation26_spill]] }
  0x2a   : > { %v663_v6 = vld [vmem:[%s642_s1] sm:$0x1]  ;;  %945 = vmatpush.msra.mxu1 %v857_v26  ;;  %985 = vmatpush.msra.mxu3 %v865_v27  ;;  %v884_v39 = vld [vmem:[%s5789_s5 + $0xd8] sm:$0xff]  ;;  %v883_v40 = vld [vmem:[%s5789_s5 + $0xd0] sm:$0xff]  ;;  %s3892_s1 = sshll.u32 %s4274_s0, 3  ;;  %s5869_s22 = sld [smem:[#allocation28_spill]] }
  0x2b   : > { %s4330_s17 = scalar_lea.vmem %s5844_s30, %s4313_s21  ;;  %v665_v7 = vsub.f32 1.0, %v663_v6  ;;  %1023 = vmatpush.msrb.mxu2 %v875_v16  ;;  %v882_v41 = vld [vmem:[%s5789_s5 + $0xc8] sm:$0xff]  ;;  %v888_v42 = vld [vmem:[%s5789_s5 + $0xf8] sm:$0xff]  ;;  %v881_v43 = vld [vmem:[%s5789_s5 + $0xc0] sm:$0xff] }
  0x2c   : > { %3695 = vmatmul.msk.bf16.vlgmr.msra.gmra.mxu0 %vm694_vm0, %v3896_v5  ;;  %v4346_v13 = vld [vmem:[%s4330_s17] sm:$0xff]  ;;  %1042 = vmatpush.msrb.mxu3 %v880_v28  ;;  %v887_v44 = vld [vmem:[%s5789_s5 + $0xf0] sm:$0xff]  ;;  %v886_v45 = vld [vmem:[%s5789_s5 + $0xe8] sm:$0xff] }
  0x2d   : > { %v666_v11 = vmul.f32 -1e+09, %v665_v7  ;;  %3700 = vmatmul.msk.f32.vlgmr.msra.gmra.mxu2 %vm926_vm1, %v4346_v13  ;;  %3699 = vmatmul.msk.f32.vlgmr.msra.gmra.mxu1 %vm926_vm1, %v4346_v13  ;;  %v885_v46 = vld [vmem:[%s5789_s5 + $0xe0] sm:$0xff] }
  0x2e   : > { %1024 = vmatpush.msrb.mxu2 %v874_v17  ;;  %3701 = vmatmul.msk.f32.vlgmr.msra.gmra.mxu3 %vm926_vm1, %v4346_v13  ;;  %v4460_v47 = vld [vmem:[%s5797_s13] ss:$0 sm:$0xff]  ;;  %v3976_v58 = vld [vmem:[%s5794_s10 + $0x4] ss:$0 sm:$0xff]  ;;  %v3979_v15 = vld [vmem:[%s5794_s10 + $0x5] ss:$0 sm:$0xff]  ;;  %s4862_s26 = scalar_lea.vmem %s5854_s24, %s4313_s21 }
  0x2f   : > { %v817_v14 = vperm.slane %v666_v11, 0  ;;  %1043 = vmatpush.msrb.mxu3 %v879_v29  ;;  %1002 = vmatpush.msrb.mxu1 %v872_v34  ;;  %v3977_v1 = vld [vmem:[%s5794_s10] ss:$0 sm:$0xff]  ;;  %v3975_v17 = vld [vmem:[%s5794_s10 + $0x1] ss:$0 sm:$0xff]  ;;  %s646_s25 = scalar_lea.vmem %s5856_s4, %s4313_s21  ;;  %s3900_s21 = smul.u32 24, %s4309_s20 }
  0x30   : > { %1025 = vmatpush.msrb.mxu2 %v873_v19  ;;  %v3981_v34 = vld [vmem:[%s5794_s10 + $0x6] ss:$0 sm:$0xff]  ;;  %s4104_s4 = scalar_lea.hbm %s5869_s22, 16 }
  0x31   : > { %822 = vperm.xlu1 %3950, %v817_v14   ;;  %1044 = vmatpush.msrb.mxu3 %v878_v30 }
  0x32   : > { %1003 = vmatpush.msrb.mxu1 %v871_v35  ;;  %1082 = vmatpush.msra.mxu2 %v888_v42 }
  0x33   : > { %1045 = vmatpush.msrb.mxu3 %v877_v32 }
  0x34   : > { %1004 = vmatpush.msrb.mxu1 %v870_v36  ;;  %1083 = vmatpush.msra.mxu2 %v887_v44  ;;  %v3978_v36 = vld [vmem:[%s5794_s10 + $0x2] ss:$0 sm:$0xff] }
  0x35   : > { %3703 = vmatmul.msk.f32.vlgmr.msrb.gmra.mxu2 %vm926_vm1, %v4346_v13 }
  0x36   : > { %3704 = vmatmul.msk.f32.vlgmr.msrb.gmra.mxu3 %vm926_vm1, %v4346_v13  ;;  %1005 = vmatpush.msrb.mxu1 %v869_v38 }
  0x37   : > { %3702 = vmatmul.msk.f32.vlgmr.msrb.gmra.mxu1 %vm926_vm1, %v4346_v13  ;;  %1084 = vmatpush.msra.mxu2 %v886_v45 }
  0x38   : > { %1062 = vmatpush.msra.mxu1 %v884_v39 }
  0x39   : > { %3951 = vset.pattern.permute.xlu1 %v5812_v37  ;;  %1085 = vmatpush.msra.mxu2 %v885_v46 }
  0x3a   : > { %1063 = vmatpush.msra.mxu1 %v883_v40 }
  0x3c   : > { %3696 = vmatmul.msk.bf16.gmra.mxu0 %vm694_vm0, %v3897_v18  ;;  %1064 = vmatpush.msra.mxu1 %v882_v41 }
  0x3d   : > { %3706 = vmatmul.msk.f32.vlgmr.msra.gmra.mxu2 %vm926_vm1, %v4346_v13 }
  0x3e   : > { %1065 = vmatpush.msra.mxu1 %v881_v43 }
  0x3f   : > { %3705 = vmatmul.msk.f32.vlgmr.msra.gmra.mxu1 %vm926_vm1, %v4346_v13 }
  0x4c   : > { %3697 = vmatmul.msk.bf16.gmra.mxu0 %vm694_vm0, %v3898_v31 }
  0x5c   : > { %3698 = vmatmul.msk.bf16.gmra.mxu0 %vm694_vm0, %v3899_v33 }
  0xa3   : > { %v4462_v49 = vpop.permute.xlu1 %822 }
  0xa9   : > { %v716_v48 = vpop.f32.mrf.mxu0 }
  0xaa   : > { %v717_v50 = vadd.f32 %v4460_v47, %v716_v48  ;;  %v947_v3 = vpop.f32.mrf.mxu1 }
  0xab   : > { %v948_v4 = vadd.f32 %v3977_v1, %v947_v3 }
  0xac   : > { %792 = vrot.lane.b32.xlu2 %v717_v50, %s4149_s2  ;;  %744 = vrot.lane.b32.xlu0 %v717_v50, %s4150_s23  ;;  %v4468_v51 = vadd.f32 %v4462_v49, %v717_v50 }
  0xad   : > { %v1090_v6 = vpack.c.bf16 %v948_v4, %v948_v4 }
  0xae   : > { %1107 = vperm.xlu1 %3951, %v4468_v51  }
  0xb0   : > { %v967_v56 = vpop.f32.mrf.mxu2 }
  0xb1   : > { %v718_v52 = vpop.f32.mrf.mxu0  ;;  %v987_v11 = vpop.f32.mrf.mxu3  ;;  %v968_v23 = vadd.f32 %v3975_v17, %v967_v56 }
  0xb2   : > { %v719_v53 = vadd.f32 %v4460_v47, %v718_v52  ;;  %v988_v42 = vadd.f32 %v3978_v36, %v987_v11 }
  0xb3   : > { %v1091_v25 = vpack.c.bf16 %v968_v23, %v968_v23 }
  0xb4   : > { %768 = vrot.lane.b32.xlu0 %v717_v50, %s4151_s19  ;;  %v4474_v54 = vadd.f32 %v4462_v49, %v719_v53  ;;  %v1007_v32 = vpop.f32.mrf.mxu1  ;;  %v1092_v45 = vpack.c.bf16 %v988_v42, %v988_v42 }
  0xb6   : > { %1110 = vperm.xlu2 %3952, %v4474_v54   ;;  %770 = vrot.lane.b32.xlu1 %v719_v53, %s4151_s19 }
  0xb8   : > { %v1027_v59 = vpop.f32.mrf.mxu2 }
  0xb9   : > { %v721_v55 = vpop.f32.mrf.mxu0  ;;  %v1028_v60 = vadd.f32 %v3976_v58, %v1027_v59  ;;  %v1047_v16 = vpop.f32.mrf.mxu3 }
  0xba   : > { %v722_v57 = vadd.f32 %v4460_v47, %v721_v55  ;;  %v1048_v18 = vadd.f32 %v3979_v15, %v1047_v16 }
  0xbb   : > { %v1094_v63 = vpack.c.bf16 %v1028_v60, %v1028_v60 }
  0xbc   : > { %746 = vrot.lane.b32.xlu0 %v719_v53, %s4150_s23  ;;  %v4487_v62 = vadd.f32 %v4462_v49, %v722_v57  ;;  %v1095_v21 = vpack.c.bf16 %v1048_v18, %v1048_v18  ;;  %v1067_v35 = vpop.f32.mrf.mxu1 }
  0xbd   : > { %v1160_v0 = vsel %vm1155_vm2, %v1094_v63, 0  ;;  %v1068_v38 = vadd.f32 %v3981_v34, %v1067_v35 }
  0xbe   : > { %796 = vrot.lane.b32.xlu2 %v722_v57, %s4149_s2  ;;  %748 = vrot.lane.b32.xlu1 %v722_v57, %s4150_s23  ;;  %5845 = vst [vmem:[#allocation12_spill] sm:$0xff] %v4487_v62  ;;  %v1227_v24 = vsel %vm1155_vm2, %v1095_v21, 0 }
  0xbf   : > { %1169 = vmatpush.bf16.xpose.msrb.mxu0 %v1160_v0  ;;  %1236 = vmatpush.bf16.xpose.msrb.mxu1 %v1227_v24  ;;  %v1096_v41 = vpack.c.bf16 %v1068_v38, %v1068_v38 }
  0xc0   : > { %v1087_v52 = vpop.f32.mrf.mxu2 }
  0xc1   : > { %v723_v61 = vpop.f32.mrf.mxu0  ;;  %v1294_v43 = vsel %vm1155_vm2, %v1096_v41, 0 }
  0xc2   : > { %v724_v5 = vadd.f32 %v4460_v47, %v723_v61  ;;  %1303 = vmatpush.bf16.xpose.msrb.mxu2 %v1294_v43 }
  0xc4   : > { %794 = vrot.lane.b32.xlu0 %v719_v53, %s4149_s2  ;;  %v4503_v9 = vadd.f32 %v4462_v49, %v724_v5  ;;  %v3980_v53 = vld [vmem:[%s5794_s10 + $0x3] ss:$0 sm:$0xff] }
  0xc5   : > { %v1008_v58 = vadd.f32 %v3980_v53, %v1007_v32 }
  0xc6   : > { %1113 = vperm.xlu2 %3952, %v4487_v62   ;;  %772 = vrot.lane.b32.xlu1 %v722_v57, %s4151_s19 }
  0xc7   : > { %3707 = vmatmul.msk.bf16.vlgmr.msrb.gmra.mxu0 %vm1155_vm2, %v1090_v6  ;;  %3708 = vmatmul.msk.bf16.vlgmr.msrb.gmra.mxu1 %vm1155_vm2, %v1091_v25  ;;  %v1093_v0 = vpack.c.bf16 %v1008_v58, %v1008_v58 }
  0xc9   : > { %v726_v7 = vpop.f32.mrf.mxu0  ;;  %3709 = vmatmul.msk.bf16.vlgmr.msrb.gmra.mxu2 %vm1155_vm2, %v1092_v45  ;;  %v4635_v45 = vand.u32 127, %v818_v2 }
  0xca   : > { %v727_v8 = vadd.f32 %v4460_v47, %v726_v7 }
  0xcc   : > { %774 = vrot.lane.b32.xlu0 %v724_v5, %s4151_s19  ;;  %v4506_v10 = vadd.f32 %v4462_v49, %v727_v8 }
  0xce   : > { %750 = vrot.lane.b32.xlu2 %v724_v5, %s4150_s23  ;;  %798 = vrot.lane.b32.xlu1 %v724_v5, %s4149_s2 }
  0xd1   : > { %v728_v12 = vpop.f32.mrf.mxu0 }
  0xd2   : > { %v729_v14 = vadd.f32 %v4460_v47, %v728_v12 }
  0xd4   : > { %800 = vrot.lane.b32.xlu0 %v727_v8, %s4149_s2  ;;  %v4521_v20 = vadd.f32 %v4462_v49, %v729_v14 }
  0xd6   : > { %1116 = vperm.xlu2 %3952, %v4503_v9   ;;  %1119 = vperm.xlu1 %3951, %v4506_v10  }
  0xd9   : > { %v731_v19 = vpop.f32.mrf.mxu0 }
  0xda   : > { %v732_v22 = vadd.f32 %v4460_v47, %v731_v19 }
  0xdc   : > { %754 = vrot.lane.b32.xlu0 %v729_v14, %s4150_s23  ;;  %v4535_v28 = vadd.f32 %v4462_v49, %v732_v22 }
  0xde   : > { %752 = vrot.lane.b32.xlu2 %v727_v8, %s4150_s23  ;;  %778 = vrot.lane.b32.xlu1 %v729_v14, %s4151_s19  ;;  %5846 = vst [vmem:[#allocation13_spill] sm:$0xff] %v4535_v28 }
  0xe1   : > { %v733_v26 = vpop.f32.mrf.mxu0 }
  0xe2   : > { %v734_v27 = vadd.f32 %v4460_v47, %v733_v26  ;;  %v3982_v47 = vld [vmem:[%s5794_s10 + $0x7] ss:$0 sm:$0xff] }
  0xe3   : > { %v1088_v55 = vadd.f32 %v3982_v47, %v1087_v52 }
  0xe4   : > { %1122 = vperm.xlu0 %3953, %v4521_v20   ;;  %v4538_v29 = vadd.f32 %v4462_v49, %v734_v27 }
  0xe5   : > { %v1097_v56 = vpack.c.bf16 %v1088_v55, %v1088_v55 }
  0xe6   : > { %776 = vrot.lane.b32.xlu2 %v727_v8, %s4151_s19  ;;  %756 = vrot.lane.b32.xlu1 %v732_v22, %s4150_s23 }
  0xe7   : > { %v1361_v59 = vsel %vm1155_vm2, %v1097_v56, 0 }
  0xe8   : > { %1370 = vmatpush.bf16.xpose.msra.mxu3 %v1361_v59 }
  0xec   : > { %780 = vrot.lane.b32.xlu0 %v732_v22, %s4151_s19 }
  0xee   : > { %802 = vrot.lane.b32.xlu2 %v729_v14, %s4149_s2  ;;  %804 = vrot.lane.b32.xlu1 %v732_v22, %s4149_s2 }
  0xef   : > { %3710 = vmatmul.msk.bf16.vlgmr.msra.gmra.mxu3 %vm1155_vm2, %v1093_v0 }
  0xf4   : > { %806 = vrot.lane.b32.xlu0 %v734_v27, %s4149_s2  ;;  %s3531_s2 = scalar_lea.hbm %s5869_s22, %s3892_s1 }
  0xf5   : > { %s3535_s8 = sshll.u32 %s3531_s2, 4  ;;  %s3536_s8 = int_to_ptr.hbm [resolvable:$true] %s3535_s8 }
  0xf6   : > { %1125 = vperm.xlu2 %3952, %v4535_v28   ;;  %1128 = vperm.xlu1 %3951, %v4538_v29  }
  0xfe   : > { %758 = vrot.lane.b32.xlu2 %v734_v27, %s4150_s23  ;;  %s5352_s23 = scalar_lea.vmem %s5802_s18, %s3900_s21 }
 0x106   : > { %782 = vrot.lane.b32.xlu2 %v734_v27, %s4151_s19  ;;  %v793_v30 = vpop.permute.xlu2 %792  ;;  %s4098_s19 = sshra.s32 %s3536_s8, 4  ;;  %s4099_s19 = int_to_ptr.hbm [resolvable:$true] %s4098_s19 }
 0x107   : > { %v4545_v31 = vadd.f32 %v4462_v49, %v793_v30  ;;  %s4100_s24 = scalar_lea.hbm %s4099_s19, 8  ;;  %p4105_p0 = scmp.lt.s32.totalorder %s4099_s19, %s5869_s22 }
 0x108   : > { %p4101_p11 = scmp.ne.s32.totalorder %s4099_s19, %s4100_s24  ;;  %p4106_p1 = scmp.lt.s32.totalorder %s4104_s4, %s4100_s24 }
 0x109   : > { %5847 = vst [vmem:[#allocation14_spill] sm:$0xff] %v4545_v31 }
 0x10a   : > { %p4102_p12 = pnand %p4101_p11, %p4291_p5  ;;  %p4107_p2 = por %p4106_p1, %p4105_p0 }
 0x10c   : > { %p4103_p13 = pneg %p4102_p12 }
 0x10e   : > { %1318 = vperm.xlu2 %3952, %v4545_v31   ;;  %p4108_p3 = pnand %p4107_p2, %p4103_p13 }
 0x110   : > { %v4548_v33 = vpop.permute.xlu2 %1110 }
 0x111   : > { %v1133_v52 = vperm.slane %v4548_v33, %v4635_v45 }
 0x118   : > { %v797_v39 = vpop.permute.xlu2 %796 }
 0x119   : > { %v4557_v40 = vadd.f32 %v4462_v49, %v797_v39 }
 0x11b   : > { %5848 = vst [vmem:[#allocation15_spill] sm:$0xff] %v4557_v40  ;;  %1324 = vperm.xlu2 %3952, %v4557_v40  }
 0x11e   : > { %v745_v44 = vpop.permute.xlu0 %744 }
 0x11f   : > { %v4562_v46 = vadd.f32 %v4462_v49, %v745_v44 }
 0x120   : > { %v4567_v48 = vpop.permute.xlu2 %1113  ;;  %v4569_v50 = vpop.permute.xlu1 %1107 }
 0x121   : > { %1184 = vperm.xlu0 %3953, %v4562_v46   ;;  %v1132_v47 = vperm.slane %v4569_v50, %v4635_v45  ;;  %v1134_v55 = vperm.slane %v4567_v48, %v4635_v45 }
 0x123   : > { %v1141_v56 = vsel %vm1140_vm3, %v1133_v52, %v1132_v47 }
 0x124   : > { %v1143_v59 = vsel %vm1142_vm4, %v1134_v55, %v1141_v56 }
 0x126   : > { %v769_v57 = vpop.permute.xlu0 %768 }
 0x127   : > { %v4578_v60 = vadd.f32 %v4462_v49, %v769_v57 }
 0x128   : > { %v751_v61 = vpop.permute.xlu2 %750  ;;  %v771_v63 = vpop.permute.xlu1 %770 }
 0x129   : > { %1251 = vperm.xlu0 %3953, %v4578_v60   ;;  %v4589_v7 = vadd.f32 %v4462_v49, %v771_v63  ;;  %v4601_v16 = vadd.f32 %v4462_v49, %v751_v61 }
 0x12e   : > { %v747_v1 = vpop.permute.xlu0 %746 }
 0x12f   : > { %v4583_v3 = vadd.f32 %v4462_v49, %v747_v1 }
 0x130   : > { %v4585_v4 = vpop.permute.xlu2 %1116  ;;  %v749_v5 = vpop.permute.xlu1 %748 }
 0x131   : > { %1187 = vperm.xlu1 %3951, %v4583_v3   ;;  %v4604_v17 = vadd.f32 %v4462_v49, %v749_v5  ;;  %v1135_v57 = vperm.slane %v4585_v4, %v4635_v45 }
 0x133   : > { %v1145_v63 = vsel %vm1144_vm5, %v1135_v57, %v1143_v59 }
 0x136   : > { %v795_v6 = vpop.permute.xlu0 %794 }
 0x137   : > { %v4592_v8 = vadd.f32 %v4462_v49, %v795_v6 }
 0x138   : > { %v753_v11 = vpop.permute.xlu2 %752  ;;  %v773_v12 = vpop.permute.xlu1 %772 }
 0x139   : > { %v4595_v14 = vadd.f32 %v4462_v49, %v753_v11  ;;  %1321 = vperm.xlu0 %3953, %v4592_v8   ;;  %1254 = vperm.xlu1 %3951, %v4589_v7   ;;  %v4613_v23 = vadd.f32 %v4462_v49, %v773_v12 }
 0x13b   : > { %5849 = vst [vmem:[#allocation16_spill] sm:$0xff] %v4595_v14  ;;  %1196 = vperm.xlu2 %3952, %v4595_v14  }
 0x13e   : > { %v775_v15 = vpop.permute.xlu0 %774 }
 0x13f   : > { %v4616_v24 = vadd.f32 %v4462_v49, %v775_v15 }
 0x140   : > { %v777_v18 = vpop.permute.xlu2 %776  ;;  %v799_v19 = vpop.permute.xlu1 %798 }
 0x141   : > { %v4607_v21 = vadd.f32 %v4462_v49, %v777_v18  ;;  %1193 = vperm.xlu0 %3953, %v4601_v16   ;;  %1190 = vperm.xlu1 %3951, %v4604_v17   ;;  %v4625_v38 = vadd.f32 %v4462_v49, %v799_v19 }
 0x143   : > { %5850 = vst [vmem:[#allocation17_spill] sm:$0xff] %v4607_v21  ;;  %1263 = vperm.xlu2 %3952, %v4607_v21  }
 0x144   : > { %v1171_v27 = vpop.f32.mrf.mxu0  ;;  %v1238_v19 = vpop.f32.mrf.mxu1 }
 0x146   : > { %v801_v22 = vpop.permute.xlu0 %800 }
 0x147   : > { %v4652_v58 = vadd.f32 %v4462_v49, %v801_v22 }
 0x148   : > { %v803_v25 = vpop.permute.xlu2 %802  ;;  %v1120_v26 = vpop.permute.xlu1 %1119 }
 0x149   : > { %1260 = vperm.xlu0 %3953, %v4616_v24   ;;  %1257 = vperm.xlu1 %3951, %v4613_v23   ;;  %v4655_v50 = vadd.f32 %v4462_v49, %v803_v25  ;;  %v1136_v33 = vperm.slane %v1120_v26, %v4635_v45 }
 0x14b   : > { %5852 = vst [vmem:[#allocation19_spill] sm:$0xff] %v4655_v50  ;;  %v1147_v0 = vsel %vm1146_vm6, %v1136_v33, %v1145_v63 }
 0x14c   : > { %v1173_v36 = vpop.f32.mrf.mxu0  ;;  %v4692_v47 = vpop.f32.mrf.mxu2 }
 0x14e   : > { %v755_v30 = vpop.permute.xlu0 %754 }
 0x14f   : > { %v4621_v32 = vadd.f32 %v4462_v49, %v755_v30 }
 0x150   : > { %v1126_v34 = vpop.permute.xlu2 %1125  ;;  %v779_v35 = vpop.permute.xlu1 %778 }
 0x151   : > { %1199 = vperm.xlu1 %3951, %v4621_v32   ;;  %v4644_v53 = vadd.f32 %v4462_v49, %v779_v35  ;;  %v1138_v6 = vperm.slane %v1126_v34, %v4635_v45  ;;  %v1240_v35 = vpop.f32.mrf.mxu1 }
 0x156   : > { %v1123_v44 = vpop.permute.xlu0 %1122 }
 0x157   : > { %v1137_v48 = vperm.slane %v1123_v44, %v4635_v45 }
 0x158   : > { %v759_v39 = vpop.permute.xlu2 %758  ;;  %v757_v41 = vpop.permute.xlu1 %756 }
 0x159   : > { %v4628_v42 = vadd.f32 %v4462_v49, %v759_v39  ;;  %v4631_v43 = vadd.f32 %v4462_v49, %v757_v41  ;;  %1327 = vperm.xlu1 %3951, %v4625_v38   ;;  %v1149_v4 = vsel %vm1148_vm7, %v1137_v48, %v1147_v0 }
 0x15a   : > { %v1151_v22 = vsel %vm1150_vm8, %v1138_v6, %v1149_v4 }
 0x15b   : > { %5851 = vst [vmem:[#allocation18_spill] sm:$0xff] %v4628_v42  ;;  %1205 = vperm.xlu2 %3952, %v4628_v42   ;;  %1202 = vperm.xlu0 %3953, %v4631_v43  }
 0x15e   : > { %v781_v61 = vpop.permute.xlu0 %780 }
 0x15f   : > { %v4671_v12 = vadd.f32 %v4462_v49, %v781_v61 }
 0x160   : > { %v805_v2 = vpop.permute.xlu1 %804  ;;  %v783_v1 = vpop.permute.xlu2 %782 }
 0x161   : > { %1266 = vperm.xlu1 %3951, %v4644_v53   ;;  %v4667_v5 = vadd.f32 %v4462_v49, %v805_v2  ;;  %v4674_v15 = vadd.f32 %v4462_v49, %v783_v1  ;;  %v1307_v2 = vpop.f32.mrf.mxu2 }
 0x163   : > { %1333 = vperm.xlu2 %3952, %v4655_v50   ;;  %1330 = vperm.xlu0 %3953, %v4652_v58   ;;  %5853 = vst [vmem:[#allocation20_spill] sm:$0xff] %v4674_v15 }
 0x166   : > { %v807_v30 = vpop.permute.xlu0 %806 }
 0x167   : > { %v4685_v34 = vadd.f32 %v4462_v49, %v807_v30 }
 0x168   : > { %v1129_v11 = vpop.permute.xlu1 %1128  ;;  %v4690_v44 = vpop.permute.xlu2 %1318 }
 0x169   : > { %v1139_v18 = vperm.slane %v1129_v11, %v4635_v45  ;;  %1336 = vperm.xlu1 %3951, %v4667_v5  }
 0x16b   : > { %1272 = vperm.xlu2 %3952, %v4674_v15   ;;  %1269 = vperm.xlu0 %3953, %v4671_v12   ;;  %v1153_v25 = vsel %vm1152_vm9, %v1139_v18, %v1151_v22 }
 0x16c   : > { %v4682_v26 = vadd.f32 %v1171_v27, %v1153_v25 }
 0x16e   : > { %v1376_v36 = vsel %vm1155_vm2, %v4682_v26, -inf }
 0x172   : > { %v4696_v56 = vpop.f32.mrf.mxu3 }
 0x173   : > { %1339 = vperm.xlu0 %3953, %v4685_v34  }
 0x175   : > { %v4694_v55 = vpop.permute.xlu2 %1324 }
 0x17a   : > { %v1374_v48 = vpop.f32.mrf.mxu3 }
 0x193   : > { %1377 = vmax.xlane.f32.xlu1 %v1376_v36  ;;  %v1185_v39 = vpop.permute.xlu0 %1184 }
 0x194   : > { %v1207_v6 = vperm.slane %v1185_v39, %v4635_v45  ;;  %v899_v39 = vld [vmem:[%s5793_s9 + $0x10] sm:$0xff] }
 0x195   : > { %v1197_v33 = vpop.permute.xlu2 %1196 }
 0x196   : > { %v1211_v2 = vperm.slane %v1197_v33, %v4635_v45 }
 0x19b   : > { %v1252_v52 = vpop.permute.xlu0 %1251 }
 0x19d   : > { %v1264_v63 = vpop.permute.xlu2 %1263 }
 0x1a3   : > { %v1188_v41 = vpop.permute.xlu1 %1187 }
 0x1a4   : > { %v1208_v0 = vperm.slane %v1188_v41, %v4635_v45 }
 0x1a6   : > { %v1215_v18 = vsel %vm1140_vm3, %v1208_v0, %v1207_v6 }
 0x1ab   : > { %v1255_v27 = vpop.permute.xlu1 %1254  ;;  %v1322_v49 = vpop.permute.xlu0 %1321 }
 0x1b3   : > { %v1191_v57 = vpop.permute.xlu1 %1190  ;;  %v1194_v59 = vpop.permute.xlu0 %1193 }
 0x1b4   : > { %v1209_v4 = vperm.slane %v1191_v57, %v4635_v45  ;;  %v1210_v22 = vperm.slane %v1194_v59, %v4635_v45  ;;  %v900_v57 = vld [vmem:[%s5793_s9 + $0x18] sm:$0xff] }
 0x1b5   : > { %v1206_v30 = vpop.permute.xlu2 %1205  ;;  %1439 = vmatpush.msra.mxu1 %v900_v57 }
 0x1b6   : > { %v1216_v25 = vsel %vm1142_vm4, %v1209_v4, %v1215_v18  ;;  %v1214_v33 = vperm.slane %v1206_v30, %v4635_v45  ;;  %v897_v18 = vld [vmem:[%s5793_s9] sm:$0xff]  ;;  %v1275_v30 = vperm.slane %v1255_v27, %v4635_v45 }
 0x1b7   : > { %v1217_v35 = vsel %vm1144_vm5, %v1210_v22, %v1216_v25  ;;  %1440 = vmatpush.msra.mxu1 %v899_v39  ;;  %v1274_v39 = vperm.slane %v1252_v52, %v4635_v45  ;;  %v1278_v52 = vperm.slane %v1264_v63, %v4635_v45 }
 0x1b8   : > { %v1218_v59 = vsel %vm1146_vm6, %v1211_v2, %v1217_v35  ;;  %v1548_v2 = vld [vmem:[%s5790_s6 + $0x18] sm:$0xff] }
 0x1bb   : > { %v1258_v61 = vpop.permute.xlu1 %1257  ;;  %v1261_v11 = vpop.permute.xlu0 %1260 }
 0x1bd   : > { %v1334_v25 = vpop.permute.xlu2 %1333 }
 0x1c3   : > { %v1200_v1 = vpop.permute.xlu1 %1199 }
 0x1c4   : > { %v1212_v36 = vperm.slane %v1200_v1, %v4635_v45  ;;  %v898_v1 = vld [vmem:[%s5793_s9 + $0x8] sm:$0xff] }
 0x1c5   : > { %1441 = vmatpush.msra.mxu1 %v898_v1 }
 0x1c6   : > { %v1219_v4 = vsel %vm1148_vm7, %v1212_v36, %v1218_v59  ;;  %v1276_v36 = vperm.slane %v1258_v61, %v4635_v45  ;;  %v1282_v59 = vsel %vm1140_vm3, %v1275_v30, %v1274_v39  ;;  %v1342_v61 = vperm.slane %v1322_v49, %v4635_v45 }
 0x1c7   : > { %1442 = vmatpush.msra.mxu1 %v897_v18  ;;  %v1343_v49 = vperm.slane %v4694_v55, %v4635_v45 }
 0x1c8   : > { %3711 = vmatmul.msk.f32.vlgmr.msra.gmra.mxu1 %vm926_vm1, %v4346_v13  ;;  %v1283_v27 = vsel %vm1142_vm4, %v1276_v36, %v1282_v59 }
 0x1c9   : > { %1596 = vmatpush.msrb.mxu1 %v1548_v2 }
 0x1cb   : > { %v1328_v41 = vpop.permute.xlu1 %1327 }
 0x1cc   : > { %v1344_v2 = vperm.slane %v1328_v41, %v4635_v45 }
 0x1cd   : > { %v1203_v48 = vpop.permute.xlu0 %1202 }
 0x1ce   : > { %v1213_v0 = vperm.slane %v1203_v48, %v4635_v45 }
 0x1d0   : > { %v1220_v6 = vsel %vm1150_vm8, %v1213_v0, %v1219_v4  ;;  %v1277_v0 = vperm.slane %v1261_v11, %v4635_v45  ;;  %v1341_v4 = vperm.slane %v4690_v44, %v4635_v45 }
 0x1d1   : > { %v1221_v22 = vsel %vm1152_vm9, %v1214_v33, %v1220_v6  ;;  %v1273_v6 = vpop.permute.xlu2 %1272 }
 0x1d2   : > { %v4725_v35 = vadd.f32 %v1238_v19, %v1221_v22  ;;  %v1284_v1 = vsel %vm1144_vm5, %v1277_v0, %v1283_v27  ;;  %v1349_v22 = vsel %vm1140_vm3, %v1342_v61, %v1341_v4  ;;  %v1281_v36 = vperm.slane %v1273_v6, %v4635_v45 }
 0x1d3   : > { %v1267_v19 = vpop.permute.xlu1 %1266  ;;  %v1285_v11 = vsel %vm1146_vm6, %v1278_v52, %v1284_v1  ;;  %v1346_v61 = vperm.slane %v1334_v25, %v4635_v45  ;;  %v1546_v25 = vld [vmem:[%s5790_s6 + $0x8] sm:$0xff] }
 0x1d4   : > { %v1379_v57 = vsel %vm1155_vm2, %v4725_v35, -inf  ;;  %v1279_v33 = vperm.slane %v1267_v19, %v4635_v45  ;;  %v1350_v19 = vsel %vm1142_vm4, %v1343_v49, %v1349_v22  ;;  %v1545_v22 = vld [vmem:[%s5790_s6] sm:$0xff] }
 0x1d5   : > { %v1331_v48 = vpop.permute.xlu0 %1330  ;;  %1380 = vmax.xlane.f32.xlu2 %v1379_v57  ;;  %v1351_v59 = vsel %vm1144_vm5, %v1344_v2, %v1350_v19  ;;  %v1549_v49 = vld [vmem:[%s5790_s6 + $0x20] sm:$0xff]  ;;  %v1560_v19 = vld [vmem:[%s5790_s6 + $0x78] sm:$0xff] }
 0x1d6   : > { %v1286_v57 = vsel %vm1148_vm7, %v1279_v33, %v1285_v11  ;;  %v1345_v44 = vperm.slane %v1331_v48, %v4635_v45  ;;  %v1552_v11 = vld [vmem:[%s5790_s6 + $0x38] sm:$0xff] }
 0x1d7   : > { %1616 = vmatpush.msrb.mxu3 %v1552_v11 }
 0x1d8   : > { %v1352_v55 = vsel %vm1146_vm6, %v1345_v44, %v1351_v59  ;;  %v1558_v59 = vld [vmem:[%s5790_s6 + $0x68] sm:$0xff] }
 0x1d9   : > { %v1353_v33 = vsel %vm1148_vm7, %v1346_v61, %v1352_v55  ;;  %v1556_v55 = vld [vmem:[%s5790_s6 + $0x58] sm:$0xff]  ;;  %v1554_v61 = vld [vmem:[%s5790_s6 + $0x48] sm:$0xff] }
 0x1db   : > { %v1337_v63 = vpop.permute.xlu1 %1336 }
 0x1dc   : > { %v1347_v27 = vperm.slane %v1337_v63, %v4635_v45 }
 0x1dd   : > { %v1270_v18 = vpop.permute.xlu0 %1269 }
 0x1de   : > { %v1280_v30 = vperm.slane %v1270_v18, %v4635_v45  ;;  %v1354_v52 = vsel %vm1150_vm8, %v1347_v27, %v1353_v33  ;;  %v1555_v27 = vld [vmem:[%s5790_s6 + $0x50] sm:$0xff] }
 0x1e0   : > { %v1287_v39 = vsel %vm1150_vm8, %v1280_v30, %v1286_v57  ;;  %v1550_v30 = vld [vmem:[%s5790_s6 + $0x28] sm:$0xff] }
 0x1e1   : > { %v1288_v41 = vsel %vm1152_vm9, %v1281_v36, %v1287_v39 }
 0x1e2   : > { %v4760_v0 = vadd.f32 %v4692_v47, %v1288_v41  ;;  %v1547_v47 = vld [vmem:[%s5790_s6 + $0x10] sm:$0xff] }
 0x1e3   : > { %1597 = vmatpush.msrb.mxu1 %v1547_v47  ;;  %v1559_v41 = vld [vmem:[%s5790_s6 + $0x70] sm:$0xff]  ;;  %v4152_v47 = vmov 4  }
 0x1e4   : > { %v1382_v48 = vsel %vm1155_vm2, %v4760_v0, -inf  ;;  %3954 = vset.pattern.permute.xlu1 %v4152_v47  ;;  %3955 = vset.pattern.permute.xlu2 %v4152_v47 }
 0x1e5   : > { %v1340_v1 = vpop.permute.xlu0 %1339  ;;  %1383 = vmax.xlane.f32.xlu0 %v1382_v48  ;;  %1598 = vmatpush.msrb.mxu1 %v1546_v25  ;;  %v1553_v48 = vld [vmem:[%s5790_s6 + $0x40] sm:$0xff] }
 0x1e6   : > { %v1348_v4 = vperm.slane %v1340_v1, %v4635_v45  ;;  %3956 = vset.pattern.permute.xlu0 %v4152_v47 }
 0x1e7   : > { %1599 = vmatpush.msrb.mxu1 %v1545_v22 }
 0x1e8   : > { %v1355_v6 = vsel %vm1152_vm9, %v1348_v4, %v1354_v52  ;;  %3716 = vmatmul.msk.f32.vlgmr.msrb.gmra.mxu1 %vm926_vm1, %v4346_v13 }
 0x1e9   : > { %v1373_v18 = vadd.f32 %v4696_v56, %v1355_v6  ;;  %v1551_v56 = vld [vmem:[%s5790_s6 + $0x30] sm:$0xff]  ;;  %1636 = vmatpush.msra.mxu1 %v1556_v55 }
 0x1ea   : > { %1617 = vmatpush.msrb.mxu3 %v1551_v56 }
 0x1eb   : > { %v1385_v2 = vsel %vm1155_vm2, %v1373_v18, -inf  ;;  %1637 = vmatpush.msra.mxu1 %v1555_v27  ;;  %v3985_v27 = vld [vmem:[%s5795_s11 + $0x1] ss:$0 sm:$0xff] }
 0x1ec   : > { %1386 = vmax.xlane.f32.xlu2 %v1385_v2  ;;  %1618 = vmatpush.msrb.mxu3 %v1550_v30 }
 0x1ed   : > { %1638 = vmatpush.msra.mxu1 %v1554_v61 }
 0x1ee   : > { %1619 = vmatpush.msrb.mxu3 %v1549_v49 }
 0x1ef   : > { %3717 = vmatmul.msk.f32.vlgmr.msrb.gmra.mxu3 %vm926_vm1, %v4346_v13  ;;  %1639 = vmatpush.msra.mxu1 %v1553_v48 }
 0x1f0   : > { %1656 = vmatpush.msra.mxu3 %v1560_v19  ;;  %3718 = vmatmul.msk.f32.vlgmr.msra.gmra.mxu1 %vm926_vm1, %v4346_v13 }
 0x1f2   : > { %1657 = vmatpush.msra.mxu3 %v1559_v41 }
 0x1f4   : > { %1658 = vmatpush.msra.mxu3 %v1558_v59 }
 0x206   : > { %v1378_v36 = vpop.xlane.xlu1 %1377 }
 0x207   : > { %v1388_v57 = vsub.f32 %v4682_v26, %v1378_v36  ;;  %v1557_v26 = vld [vmem:[%s5790_s6 + $0x60] sm:$0xff] }
 0x208   : > { %1659 = vmatpush.msra.mxu3 %v1557_v26  ;;  %v3984_v36 = vld [vmem:[%s5795_s11] ss:$0 sm:$0xff] }
 0x209   : > { %v1392_v44 = vmul.f32 1.442695, %v1388_v57  ;;  %3719 = vmatmul.msk.f32.vlgmr.msra.gmra.mxu3 %vm926_vm1, %v4346_v13 }
 0x20b   : > { %4016 = vpow2.f32 %v1392_v44 }
 0x211   : > { %v4017_v63 = vpop.eup %4016 }
 0x212   : > { %v1400_v39 = vsel %vm1155_vm2, %v4017_v63, 0.0 }
 0x213   : > { %1401 = vadd.xlane.f32.xlu1 %v1400_v39 }
 0x245   : > { %v4834_v11 = vpop.f32.mrf.mxu1 }
 0x248   : > { %v1381_v1 = vpop.xlane.xlu2 %1380 }
 0x249   : > { %v1389_v33 = vsub.f32 %v4725_v35, %v1381_v1 }
 0x24b   : > { %v1394_v4 = vmul.f32 1.442695, %v1389_v33  ;;  %v654_v33 = vld [vmem:[%s4862_s26] sm:$0xff] }
 0x24d   : > { %4018 = vpow2.f32 %v1394_v4  ;;  %v1466_v4 = vpack.c.bf16 %v654_v33, %v654_v33 }
 0x24f   : > { %v1485_v47 = vsel %vm1483_vm10, %v1466_v4, 0 }
 0x250   : > { %1494 = vmatpush.bf16.msra.mxu2 %v1485_v47 }
 0x253   : > { %v4829_v52 = vpop.eup %4018 }
 0x254   : > { %v1403_v6 = vsel %vm1155_vm2, %v4829_v52, 0.0 }
 0x255   : > { %1404 = vadd.xlane.f32.xlu2 %v1403_v6  ;;  %v3987_v6 = vld [vmem:[%s5795_s11 + $0x2] ss:$0 sm:$0xff] }
 0x258   : > { %v1384_v25 = vpop.xlane.xlu0 %1383 }
 0x259   : > { %v1390_v22 = vsub.f32 %v4760_v0, %v1384_v25 }
 0x25b   : > { %v1396_v2 = vmul.f32 1.442695, %v1390_v22 }
 0x25d   : > { %4020 = vpow2.f32 %v1396_v2 }
 0x25f   : > { %v1387_v13 = vpop.xlane.xlu2 %1386 }
 0x260   : > { %v1391_v35 = vsub.f32 %v1373_v18, %v1387_v13 }
 0x262   : > { %v1398_v56 = vmul.f32 1.442695, %v1391_v35  ;;  %v3986_v35 = vld [vmem:[%s5795_s11 + $0x3] ss:$0 sm:$0xff] }
 0x263   : > { %v4836_v30 = vpop.eup %4020 }
 0x264   : > { %4022 = vpow2.f32 %v1398_v56  ;;  %v1406_v49 = vsel %vm1155_vm2, %v4836_v30, 0.0 }
 0x265   : > { %1407 = vadd.xlane.f32.xlu0 %v1406_v49  ;;  %v1601_v57 = vpop.f32.mrf.mxu1 }
 0x266   : > { %v1602_v44 = vadd.f32 %v3984_v36, %v1601_v57 }
 0x268   : > { %v1664_v18 = vpack.c.bf16 %v1602_v44, %v1602_v44 }
 0x26a   : > { %v4843_v0 = vpop.eup %4022  ;;  %v1672_v19 = vsel %vm1483_vm10, %v1664_v18, 0 }
 0x26b   : > { %v1409_v39 = vsel %vm1155_vm2, %v4843_v0, 0.0  ;;  %1681 = vmatpush.bf16.msra.mxu0 %v1672_v19 }
 0x26c   : > { %1410 = vadd.xlane.f32.xlu1 %v1409_v39 }
 0x26d   : > { %v1641_v25 = vpop.f32.mrf.mxu1 }
 0x26e   : > { %v1642_v22 = vadd.f32 %v3987_v6, %v1641_v25  ;;  %v1565_v25 = vld [vmem:[%s5791_s7] sm:$0xff] }
 0x270   : > { %v1666_v2 = vpack.c.bf16 %v1642_v22, %v1642_v22 }
 0x272   : > { %v1621_v61 = vpop.f32.mrf.mxu3  ;;  %v1710_v13 = vsel %vm1483_vm10, %v1666_v2, 0  ;;  %v1567_v2 = vld [vmem:[%s5791_s7 + $0x10] sm:$0xff] }
 0x273   : > { %v1622_v48 = vadd.f32 %v3985_v27, %v1621_v61  ;;  %1719 = vmatpush.bf16.msrb.mxu3 %v1710_v13 }
 0x275   : > { %v1665_v1 = vpack.c.bf16 %v1622_v48, %v1622_v48 }
 0x277   : > { %1808 = vmatpush.msra.mxu3 %v1567_v2 }
 0x285   : > { %2130 = vperm.xlu1 %3954, %v4468_v51  }
 0x286   : > { %v1402_v41 = vpop.xlane.xlu1 %1401 }
 0x287   : > { %4024 = vrcp.f32 %v1402_v41 }
 0x28c   : > { %v1661_v56 = vpop.f32.mrf.mxu3 }
 0x28d   : > { %v4025_v59 = vpop.eup %4024  ;;  %2139 = vperm.xlu1 %3954, %v4503_v9   ;;  %v1662_v49 = vadd.f32 %v3986_v35, %v1661_v56  ;;  %v1568_v35 = vld [vmem:[%s5791_s7 + $0x18] sm:$0xff] }
 0x28e   : > { %v1416_v26 = vmul.f32 %v4025_v59, %v4017_v63  ;;  %v1691_v63 = vsel %vm1483_vm10, %v1665_v1, 0  ;;  %1831 = vmatpush.msrb.mxu0 %v1568_v35 }
 0x28f   : > { %1700 = vmatpush.bf16.msrb.mxu1 %v1691_v63  ;;  %v1667_v36 = vpack.c.bf16 %v1662_v49, %v1662_v49 }
 0x290   : > { %v1420_v55 = vpack.c.bf16 %v1416_v26, %v1416_v26 }
 0x291   : > { %v1729_v44 = vsel %vm1483_vm10, %v1667_v36, 0 }
 0x292   : > { %3720 = vmatmul.msk.bf16.vlgmr.msra.gmra.mxu0 %vm1155_vm2, %v1420_v55  ;;  %1738 = vmatpush.bf16.msrb.mxu2 %v1729_v44  ;;  %v1471_v41 = vunpack.c.l.b16 %v1420_v55 }
 0x293   : > { %1762 = vmatpush.msra.mxu1 %v1565_v25  ;;  %v4082_v25 = vld [vmem:[%s4330_s17] sm:$0xff]  ;;  %s617_s17 = sand.u32 1, %s4138_s28  }
 0x294   : > { %s5566_s21 = sshll.u32 %s617_s17, 3  ;;  %s3516_s20 = scalar_lea.sflag [#allocation3], %s617_s17 }
 0x295   : > { %2251 = vperm.xlu1 %3954, %v4589_v7  }
 0x29d   : > { %2254 = vperm.xlu1 %3954, %v4613_v23  }
 0x2a5   : > { %2148 = vperm.xlu1 %3954, %v4535_v28  }
 0x2ad   : > { %2189 = vperm.xlu1 %3954, %v4562_v46  }
 0x2b5   : > { %2195 = vperm.xlu1 %3954, %v4604_v17  }
 0x2bd   : > { %2269 = vperm.xlu1 %3954, %v4674_v15  }
 0x2c5   : > { %2207 = vperm.xlu1 %3954, %v4631_v43  }
 0x2c8   : > { %v1405_v57 = vpop.xlane.xlu2 %1404 }
 0x2c9   : > { %4026 = vrcp.f32 %v1405_v57 }
 0x2cd   : > { %2310 = vperm.xlu1 %3954, %v4592_v8  }
 0x2cf   : > { %v4027_v39 = vpop.eup %4026 }
 0x2d0   : > { %v1417_v18 = vmul.f32 %v4027_v39, %v4829_v52 }
 0x2d2   : > { %v1421_v19 = vpack.c.bf16 %v1417_v18, %v1417_v18 }
 0x2d4   : > { %v1472_v59 = vunpack.c.l.b16 %v1421_v19  ;;  %3721 = vmatmul.msk.bf16.vlgmr.msrb.gmra.mxu1 %vm1155_vm2, %v1421_v19 }
 0x2d5   : > { %2319 = vperm.xlu1 %3954, %v4652_v58  }
 0x2d6   : > { %v1475_v26 = vpack.c.b16 %v1472_v59, %v1471_v41 }
 0x2d8   : > { %v1408_v27 = vpop.xlane.xlu0 %1407  ;;  %3713 = vmatmul.msk.bf16.vlgmr.msra.gmra.mxu2 %vm1155_vm2, %v1475_v26 }
 0x2d9   : > { %4028 = vrcp.f32 %v1408_v27 }
 0x2dd   : > { %2328 = vperm.xlu1 %3954, %v4685_v34  }
 0x2df   : > { %v4029_v61 = vpop.eup %4028  ;;  %v1411_v48 = vpop.xlane.xlu1 %1410 }
 0x2e0   : > { %v1418_v1 = vmul.f32 %v4029_v61, %v4836_v30  ;;  %4030 = vrcp.f32 %v1411_v48 }
 0x2e2   : > { %v1422_v52 = vpack.c.bf16 %v1418_v1, %v1418_v1 }
 0x2e4   : > { %3722 = vmatmul.msk.bf16.vlgmr.msrb.gmra.mxu3 %vm1155_vm2, %v1422_v52  ;;  %v1473_v4 = vunpack.c.l.b16 %v1422_v52 }
 0x2e5   : > { %3957 = vset.pattern.permute.xlu1 %v5812_v37 }
 0x2e6   : > { %v4031_v55 = vpop.eup %4030 }
 0x2e7   : > { %v1419_v63 = vmul.f32 %v4031_v55, %v4843_v0  ;;  %v1566_v0 = vld [vmem:[%s5791_s7 + $0x8] sm:$0xff] }
 0x2e8   : > { %1785 = vmatpush.msrb.mxu1 %v1566_v0  ;;  %v4153_v0 = vmov 32.0  }
 0x2e9   : > { %v1423_v33 = vpack.c.bf16 %v1419_v63, %v1419_v63  ;;  %4032 = vrcp.f32 %v4153_v0 }
 0x2eb   : > { %v1474_v47 = vunpack.c.l.b16 %v1423_v33 }
 0x2ed   : > { %v1476_v6 = vpack.c.b16 %v1474_v47, %v1473_v4 }
 0x2ef   : > { %3714 = vmatmul.msk.bf16.gmra.mxu2 %vm1155_vm2, %v1476_v6  ;;  %v4033_v2 = vpop.eup %4032 }
 0x2f0   : > { %vm1856_vm11 = vweird.f32 %v4033_v2 }
 0x2f7   : > { %v2131_v35 = vpop.permute.xlu1 %2130 }
 0x2ff   : > { %3723 = vmatmul.msk.bf16.vlgmr.msrb.gmra.mxu2 %vm1155_vm2, %v1423_v33  ;;  %v3988_v33 = vld [vmem:[%s5796_s12] ss:$0 sm:$0xff] }
 0x30f   : > { %v1683_v30 = vpop.f32.mrf.mxu0 }
 0x310   : > { %3724 = vmatmul.msk.f32.vlgmr.msra.gmra.mxu1 %vm1155_vm2, %v1683_v30 }
 0x317   : > { %v1685_v22 = vpop.f32.mrf.mxu0 }
 0x351   : > { %v1702_v13 = vpop.f32.mrf.mxu1 }
 0x352   : > { %3725 = vmatmul.msk.f32.vlgmr.msrb.gmra.mxu1 %vm1155_vm2, %v1702_v13  ;;  %v1852_v13 = vmul.f32 32.0, %v4033_v2 }
 0x359   : > { %v1704_v56 = vpop.f32.mrf.mxu1 }
 0x35a   : > { %v1853_v56 = vsub.f32 1.0, %v1852_v13  ;;  %v3731_v13 = vld [vmem:[%s5789_s5 + $0x118] sm:$0xff] }
 0x35b   : > { %v4904_v49 = vpop.f32.mrf.mxu2  ;;  %1973 = vmatpush.msra.mxu1 %v3731_v13  ;;  %v3750_v13 = vld [vmem:[%s5789_s5 + $0x1b0] sm:$0xff] }
 0x363   : > { %v4907_v57 = vpop.f32.mrf.mxu2 }
 0x367   : > { %v1721_v36 = vpop.f32.mrf.mxu3 }
 0x368   : > { %3726 = vmatmul.msk.f32.vlgmr.msra.gmra.mxu3 %vm1155_vm2, %v1721_v36  ;;  %v1854_v36 = vmul.f32 %v4033_v2, %v1853_v56  ;;  %v3743_v56 = vld [vmem:[%s5789_s5 + $0x178] sm:$0xff] }
 0x369   : > { %2033 = vmatpush.msra.mxu0 %v3743_v56  ;;  %v3754_v56 = vld [vmem:[%s5789_s5 + $0x1d0] sm:$0xff] }
 0x36f   : > { %v1723_v44 = vpop.f32.mrf.mxu3 }
 0x370   : > { %v1855_v44 = vadd.f32 %v4033_v2, %v1854_v36  ;;  %v3734_v36 = vld [vmem:[%s5789_s5 + $0x130] sm:$0xff] }
 0x372   : > { %v4909_v39 = vpop.f32.mrf.mxu2 }
 0x37a   : > { %v4911_v18 = vpop.f32.mrf.mxu2 }
 0x382   : > { %v1740_v19 = vpop.f32.mrf.mxu2 }
 0x383   : > { %3727 = vmatmul.msk.f32.vlgmr.msrb.gmra.mxu0 %vm1155_vm2, %v1740_v19  ;;  %v4934_v19 = vpop.permute.xlu1 %2139 }
 0x38a   : > { %v1742_v41 = vpop.f32.mrf.mxu2 }
 0x38b   : > { %v4936_v41 = vsel %vm1856_vm11, %v4033_v2, %v1855_v44  ;;  %v3735_v2 = vld [vmem:[%s5789_s5 + $0x138] sm:$0xff]  ;;  %v3730_v44 = vld [vmem:[%s5789_s5 + $0x110] sm:$0xff] }
 0x38c   : > { %5855 = vst [vmem:[#allocation21_spill] sm:$0xff] %v4936_v41  ;;  %1993 = vmatpush.msra.mxu2 %v3735_v2  ;;  %1974 = vmatpush.msra.mxu1 %v3730_v44  ;;  %v3746_v2 = vld [vmem:[%s5789_s5 + $0x190] sm:$0xff]  ;;  %v3745_v44 = vld [vmem:[%s5789_s5 + $0x188] sm:$0xff] }
 0x38d   : > { %v1764_v59 = vpop.f32.mrf.mxu1 }
 0x38e   : > { %v1836_v48 = vsel %vm926_vm1, %v1764_v59, 0.0  ;;  %1994 = vmatpush.msra.mxu2 %v3734_v36  ;;  %v3758_v36 = vld [vmem:[%s5789_s5 + $0x1f0] sm:$0xff] }
 0x3cf   : > { %v1787_v26 = vpop.f32.mrf.mxu1 }
 0x3d0   : > { %v1837_v61 = vsel %vm926_vm1, %v1787_v26, 0.0 }
 0x3d1   : > { %v1838_v52 = vadd.f32 %v1837_v61, %v1836_v48  ;;  %v2252_v61 = vpop.permute.xlu1 %2251 }
 0x3eb   : > { %v1810_v27 = vpop.f32.mrf.mxu3 }
 0x3ec   : > { %v1839_v1 = vsel %vm926_vm1, %v1810_v27, 0.0 }
 0x3ed   : > { %v1840_v55 = vadd.f32 %v1839_v1, %v1838_v52 }
 0x400   : > { %v1833_v63 = vpop.f32.mrf.mxu0 }
 0x401   : > { %v1841_v4 = vsel %vm926_vm1, %v1833_v63, 0.0 }
 0x402   : > { %v1842_v47 = vadd.f32 %v1841_v4, %v1840_v55  ;;  %v2153_v55 = vperm.slane %v2131_v35, %v4635_v45  ;;  %v2255_v4 = vpop.permute.xlu1 %2254  ;;  %v3739_v35 = vld [vmem:[%s5789_s5 + $0x158] sm:$0xff] }
 0x403   : > { %2013 = vmatpush.msrb.mxu3 %v3739_v35 }
 0x404   : > { %v1846_v6 = vadd.f32 %v3988_v33, %v1842_v47 }
 0x406   : > { %v1847_v30 = vadd.f32 %v4082_v25, %v1846_v6  ;;  %v2272_v6 = vperm.slane %v2252_v61, %v4635_v45  ;;  %v3729_v61 = vld [vmem:[%s5789_s5 + $0x108] sm:$0xff] }
 0x407   : > { %1975 = vmatpush.msra.mxu1 %v3729_v61  ;;  %v3753_v61 = vld [vmem:[%s5789_s5 + $0x1c8] sm:$0xff] }
 0x408   : > { %v1848_v22 = vsel %vm926_vm1, %v1847_v30, 0.0 }
 0x409   : > { %1849 = vadd.xlane.f32.xlu2 %v1848_v22 }
 0x421   : > { %2133 = vperm.xlu2 %3955, %v4474_v54  }
 0x429   : > { %2248 = vperm.xlu2 %3955, %v4578_v60  }
 0x431   : > { %2142 = vperm.xlu2 %3955, %v4506_v10  }
 0x439   : > { %2145 = vperm.xlu2 %3955, %v4521_v20  }
 0x441   : > { %2260 = vperm.xlu2 %3955, %v4607_v21  }
 0x449   : > { %2192 = vperm.xlu2 %3955, %v4583_v3  }
 0x451   : > { %2266 = vperm.xlu2 %3955, %v4671_v12  }
 0x459   : > { %2201 = vperm.xlu2 %3955, %v4595_v14  }
 0x461   : > { %2210 = vperm.xlu2 %3955, %v4628_v42  }
 0x469   : > { %2313 = vperm.xlu2 %3955, %v4557_v40  }
 0x471   : > { %2322 = vperm.xlu2 %3955, %v4655_v50  }
 0x47c   : > { %v1850_v59 = vpop.xlane.xlu2 %1849 }
 0x47d   : > { %v1858_v26 = vmul.f32 %v4936_v41, %v1850_v59  ;;  %v3738_v59 = vld [vmem:[%s5789_s5 + $0x150] sm:$0xff] }
 0x47e   : > { %2014 = vmatpush.msrb.mxu3 %v3738_v59 }
 0x47f   : > { %v4939_v27 = vsub.f32 %v1847_v30, %v1858_v26  ;;  %v2273_v30 = vperm.slane %v2255_v4, %v4635_v45  ;;  %v3742_v26 = vld [vmem:[%s5789_s5 + $0x170] sm:$0xff]  ;;  %v3736_v4 = vld [vmem:[%s5789_s5 + $0x140] sm:$0xff] }
 0x480   : > { %2034 = vmatpush.msra.mxu0 %v3742_v26  ;;  %v3749_v26 = vld [vmem:[%s5789_s5 + $0x1a8] sm:$0xff] }
 0x481   : > { %v1860_v48 = vmul.f32 %v4939_v27, %v4939_v27 }
 0x483   : > { %v1861_v1 = vsel %vm926_vm1, %v1860_v48, 0.0  ;;  %v3733_v48 = vld [vmem:[%s5789_s5 + $0x128] sm:$0xff] }
 0x484   : > { %1862 = vadd.xlane.f32.xlu0 %v1861_v1  ;;  %v2134_v52 = vpop.permute.xlu2 %2133  ;;  %v3737_v1 = vld [vmem:[%s5789_s5 + $0x148] sm:$0xff]  ;;  %1995 = vmatpush.msra.mxu2 %v3733_v48 }
 0x485   : > { %v2154_v63 = vperm.slane %v2134_v52, %v4635_v45  ;;  %v3741_v52 = vld [vmem:[%s5789_s5 + $0x168] sm:$0xff]  ;;  %2015 = vmatpush.msrb.mxu3 %v3737_v1 }
 0x486   : > { %2035 = vmatpush.msra.mxu0 %v3741_v52  ;;  %v3757_v48 = vld [vmem:[%s5789_s5 + $0x1e8] sm:$0xff]  ;;  %v3744_v52 = vld [vmem:[%s5789_s5 + $0x180] sm:$0xff] }
 0x487   : > { %v4947_v33 = vsel %vm1140_vm3, %v2154_v63, %v2153_v55  ;;  %v3728_v55 = vld [vmem:[%s5789_s5 + $0x100] sm:$0xff]  ;;  %2016 = vmatpush.msrb.mxu3 %v3736_v4 }
 0x488   : > { %v3732_v63 = vld [vmem:[%s5789_s5 + $0x120] sm:$0xff]  ;;  %1976 = vmatpush.msra.mxu1 %v3728_v55 }
 0x489   : > { %1996 = vmatpush.msra.mxu2 %v3732_v63  ;;  %v3748_v55 = vld [vmem:[%s5789_s5 + $0x1a0] sm:$0xff] }
 0x48a   : > { %v3752_v63 = vld [vmem:[%s5789_s5 + $0x1c0] sm:$0xff] }
 0x48b   : > { %v3756_v4 = vld [vmem:[%s5789_s5 + $0x1e0] sm:$0xff] }
 0x48c   : > { %v2249_v47 = vpop.permute.xlu2 %2248 }
 0x48d   : > { %v2271_v25 = vperm.slane %v2249_v47, %v4635_v45  ;;  %v3740_v47 = vld [vmem:[%s5789_s5 + $0x160] sm:$0xff] }
 0x48e   : > { %2036 = vmatpush.msra.mxu0 %v3740_v47 }
 0x48f   : > { %v2279_v22 = vsel %vm1140_vm3, %v2272_v6, %v2271_v25  ;;  %v3747_v6 = vld [vmem:[%s5789_s5 + $0x198] sm:$0xff] }
 0x490   : > { %v4954_v0 = vsel %vm1142_vm4, %v2273_v30, %v2279_v22  ;;  %v3751_v25 = vld [vmem:[%s5789_s5 + $0x1b8] sm:$0xff]  ;;  %2053 = vmatpush.msrb.mxu1 %v3747_v6 }
 0x491   : > { %v3755_v30 = vld [vmem:[%s5789_s5 + $0x1d8] sm:$0xff]  ;;  %2073 = vmatpush.msrb.mxu2 %v3751_v25 }
 0x492   : > { %v3759_v22 = vld [vmem:[%s5789_s5 + $0x1f8] sm:$0xff]  ;;  %2093 = vmatpush.msra.mxu3 %v3755_v30  ;;  %2054 = vmatpush.msrb.mxu1 %v3746_v2 }
 0x493   : > { %2113 = vmatpush.msrb.mxu0 %v3759_v22  ;;  %2074 = vmatpush.msrb.mxu2 %v3750_v13 }
 0x494   : > { %2094 = vmatpush.msra.mxu3 %v3754_v56  ;;  %2055 = vmatpush.msrb.mxu1 %v3745_v44  ;;  %v2156_v56 = vperm.slane %v4934_v19, %v4635_v45 }
 0x495   : > { %2114 = vmatpush.msrb.mxu0 %v3758_v36  ;;  %2075 = vmatpush.msrb.mxu2 %v3749_v26  ;;  %v3989_v36 = vld [vmem:[%s5799_s15] ss:$0 sm:$0xff] }
 0x496   : > { %2095 = vmatpush.msra.mxu3 %v3753_v61  ;;  %2056 = vmatpush.msrb.mxu1 %v3744_v52  ;;  %v3990_v26 = vld [vmem:[%s5800_s16] ss:$0 sm:$0xff]  ;;  %v3995_v52 = vld [vmem:[%s5794_s10 + $0xc] ss:$0 sm:$0xff] }
 0x497   : > { %2115 = vmatpush.msrb.mxu0 %v3757_v48  ;;  %2076 = vmatpush.msrb.mxu2 %v3748_v55 }
 0x498   : > { %2136 = vperm.xlu0 %3956, %v4487_v62   ;;  %2096 = vmatpush.msra.mxu3 %v3752_v63  ;;  %v3996_v63 = vld [vmem:[%s5794_s10 + $0xf] ss:$0 sm:$0xff] }
 0x499   : > { %2116 = vmatpush.msrb.mxu0 %v3756_v4 }
 0x4a0   : > { %2257 = vperm.xlu0 %3956, %v4616_v24  }
 0x4a8   : > { %2151 = vperm.xlu0 %3956, %v4538_v29  }
 0x4b0   : > { %2263 = vperm.xlu0 %3956, %v4644_v53  }
 0x4b8   : > { %2198 = vperm.xlu0 %3956, %v4601_v16  }
 0x4c0   : > { %2204 = vperm.xlu0 %3956, %v4621_v32  }
 0x4c8   : > { %2307 = vperm.xlu0 %3956, %v4545_v31  }
 0x4d0   : > { %2316 = vperm.xlu0 %3956, %v4625_v38  }
 0x4d8   : > { %2325 = vperm.xlu0 %3956, %v4667_v5  }
 0x4f7   : > { %v1863_v35 = vpop.xlane.xlu0 %1862 }
 0x4f8   : > { %v1864_v59 = vmul.f32 %v1863_v35, %v4936_v41 }
 0x4fa   : > { %v1865_v1 = vadd.f32 1e-05, %v1864_v59 }
 0x4fc   : > { %4034 = vrsqrt.f32 %v1865_v1  ;;  %vm1872_vm13 = vweird.f32 %v1865_v1 }
 0x502   : > { %v4035_v47 = vpop.eup %4034 }
 0x503   : > { %v1867_v6 = vmul.f32 %v4035_v47, %v1865_v1  ;;  %vm1873_vm12 = vweird.f32 %v4035_v47 }
 0x504   : > { %vm1874_vm14 = vmor %vm1872_vm13, %vm1873_vm12  ;;  %vm3511_vm13 = vcmask 23552  }
 0x505   : > { %v1868_v25 = vmul.f32 %v4035_v47, %v1867_v6 }
 0x507   : > { %v1869_v30 = vmul.f32 0.5, %v1868_v25 }
 0x509   : > { %v1870_v22 = vsub.f32 1.5, %v1869_v30 }
 0x50a   : > { %v2137_v2 = vpop.permute.xlu0 %2136 }
 0x50b   : > { %v1871_v13 = vmul.f32 %v4035_v47, %v1870_v22  ;;  %v2155_v35 = vperm.slane %v2137_v2, %v4635_v45  ;;  %v3991_v22 = vld [vmem:[%s5794_s10 + $0x8] ss:$0 sm:$0xff] }
 0x50d   : > { %v1875_v44 = vsel %vm1874_vm14, %v4035_v47, %v1871_v13  ;;  %v2162_v59 = vsel %vm1142_vm4, %v2155_v35, %v4947_v33  ;;  %v3997_v13 = vld [vmem:[%s5794_s10 + $0xd] ss:$0 sm:$0xff]  ;;  %v3992_v35 = vld [vmem:[%s5794_s10 + $0xb] ss:$0 sm:$0xff] }
 0x50e   : > { %v1876_v61 = vmul.f32 %v1875_v44, %v4939_v27  ;;  %v5075_v48 = vsel %vm1144_vm5, %v2156_v56, %v2162_v59  ;;  %v3771_v44 = vld [vmem:[%s5793_s9 + $0x38] sm:$0xff] }
 0x510   : > { %v1880_v1 = vmul.f32 %v3989_v36, %v1876_v61  ;;  %v3998_v36 = vld [vmem:[%s5794_s10 + $0xe] ss:$0 sm:$0xff] }
 0x512   : > { %v5077_v19 = vadd.f32 %v3990_v26, %v1880_v1  ;;  %v3797_v26 = vld [vmem:[%s5790_s6 + $0xb8] sm:$0xff] }
 0x514   : > { %3773 = vmatmul.msk.f32.vlgmr.msra.gmra.mxu1 %vm926_vm1, %v5077_v19  ;;  %3774 = vmatmul.msk.f32.vlgmr.msra.gmra.mxu2 %vm926_vm1, %v5077_v19 }
 0x515   : > { %3775 = vmatmul.msk.f32.vlgmr.msrb.gmra.mxu3 %vm926_vm1, %v5077_v19  ;;  %3776 = vmatmul.msk.f32.vlgmr.msra.gmra.mxu0 %vm926_vm1, %v5077_v19 }
 0x51c   : > { %3777 = vmatmul.msk.f32.vlgmr.msrb.gmra.mxu1 %vm926_vm1, %v5077_v19  ;;  %3778 = vmatmul.msk.f32.vlgmr.msrb.gmra.mxu2 %vm926_vm1, %v5077_v19 }
 0x51d   : > { %3779 = vmatmul.msk.f32.vlgmr.msra.gmra.mxu3 %vm926_vm1, %v5077_v19  ;;  %3780 = vmatmul.msk.f32.vlgmr.msrb.gmra.mxu0 %vm926_vm1, %v5077_v19 }
 0x591   : > { %v1978_v27 = vpop.f32.mrf.mxu1 }
 0x592   : > { %v2038_v33 = vpop.f32.mrf.mxu0 }
 0x597   : > { %v1998_v55 = vpop.f32.mrf.mxu2 }
 0x598   : > { %v2018_v4 = vpop.f32.mrf.mxu3 }
 0x599   : > { %v2058_v47 = vpop.f32.mrf.mxu1 }
 0x59a   : > { %v2059_v6 = vadd.f32 %v3995_v52, %v2058_v47  ;;  %v2118_v25 = vpop.f32.mrf.mxu0  ;;  %v3770_v52 = vld [vmem:[%s5793_s9 + $0x30] sm:$0xff] }
 0x59b   : > { %v2119_v30 = vadd.f32 %v3996_v63, %v2118_v25  ;;  %v1979_v63 = vadd.f32 %v3991_v22, %v1978_v27  ;;  %v3796_v25 = vld [vmem:[%s5790_s6 + $0xb0] sm:$0xff]  ;;  %v3795_v22 = vld [vmem:[%s5790_s6 + $0xa8] sm:$0xff] }
 0x59c   : > { %v2125_v2 = vpack.c.bf16 %v2059_v6, %v2059_v6 }
 0x59d   : > { %v2128_v56 = vpack.c.bf16 %v2119_v30, %v2119_v30  ;;  %v2039_v30 = vadd.f32 %v3992_v35, %v2038_v33  ;;  %v3994_v33 = vld [vmem:[%s5794_s10 + $0xa] ss:$0 sm:$0xff]  ;;  %v2121_v35 = vpack.c.bf16 %v1979_v63, %v1979_v63 }
 0x59e   : > { %v2173_v59 = vsel %vm1155_vm2, %v2125_v2, 0 }
 0x59f   : > { %v2350_v61 = vsel %vm1155_vm2, %v2128_v56, 0  ;;  %v2078_v1 = vpop.f32.mrf.mxu2  ;;  %2182 = vmatpush.bf16.xpose.msra.mxu1 %v2173_v59  ;;  %v3769_v56 = vld [vmem:[%s5793_s9 + $0x28] sm:$0xff] }
 0x5a0   : > { %v2079_v47 = vadd.f32 %v3997_v13, %v2078_v1  ;;  %v2098_v6 = vpop.f32.mrf.mxu3  ;;  %2359 = vmatpush.bf16.xpose.msra.mxu0 %v2350_v61  ;;  %v3993_v59 = vld [vmem:[%s5794_s10 + $0x9] ss:$0 sm:$0xff]  ;;  %v3793_v1 = vld [vmem:[%s5790_s6 + $0x98] sm:$0xff] }
 0x5a1   : > { %v2099_v2 = vadd.f32 %v3998_v36, %v2098_v6  ;;  %v1999_v63 = vadd.f32 %v3993_v59, %v1998_v55  ;;  %v2019_v6 = vadd.f32 %v3994_v33, %v2018_v4  ;;  %v3800_v55 = vld [vmem:[%s5790_s6 + $0xd0] sm:$0xff]  ;;  %v3799_v4 = vld [vmem:[%s5790_s6 + $0xc8] sm:$0xff]  ;;  %v3790_v59 = vld [vmem:[%s5790_s6 + $0x80] sm:$0xff] }
 0x5a2   : > { %v2126_v27 = vpack.c.bf16 %v2079_v47, %v2079_v47  ;;  %v3801_v47 = vld [vmem:[%s5790_s6 + $0xd8] sm:$0xff]  ;;  %v3804_v33 = vld [vmem:[%s5790_s6 + $0xf0] sm:$0xff] }
 0x5a3   : > { %v2127_v13 = vpack.c.bf16 %v2099_v2, %v2099_v2  ;;  %v2122_v2 = vpack.c.bf16 %v1999_v63, %v1999_v63 }
 0x5a4   : > { %v2232_v36 = vsel %vm1155_vm2, %v2126_v27, 0  ;;  %v3798_v27 = vld [vmem:[%s5790_s6 + $0xc0] sm:$0xff] }
 0x5a5   : > { %v2291_v61 = vsel %vm1155_vm2, %v2127_v13, 0  ;;  %2241 = vmatpush.bf16.xpose.msra.mxu2 %v2232_v36  ;;  %v3803_v13 = vld [vmem:[%s5790_s6 + $0xe8] sm:$0xff]  ;;  %v2143_v36 = vpop.permute.xlu2 %2142 }
 0x5a6   : > { %2300 = vmatpush.bf16.xpose.msrb.mxu3 %v2291_v61  ;;  %3781 = vmatmul.msk.bf16.vlgmr.msra.gmra.mxu1 %vm1155_vm2, %v2121_v35  ;;  %v3802_v35 = vld [vmem:[%s5790_s6 + $0xe0] sm:$0xff]  ;;  %v2149_v61 = vpop.permute.xlu1 %2148  ;;  %v2157_v21 = vperm.slane %v2143_v36, %v4635_v45 }
 0x5a7   : > { %2428 = vmatpush.msrb.mxu1 %v3771_v44  ;;  %v3768_v44 = vld [vmem:[%s5793_s9 + $0x20] sm:$0xff] }
 0x5a8   : > { %2605 = vmatpush.msrb.mxu0 %v3797_v26  ;;  %v2124_v26 = vpack.c.bf16 %v2039_v30, %v2039_v30  ;;  %v3791_v30 = vld [vmem:[%s5790_s6 + $0x88] sm:$0xff]  ;;  %v2164_v28 = vsel %vm1146_vm6, %v2157_v21, %v5075_v48 }
 0x5a9   : > { %2429 = vmatpush.msrb.mxu1 %v3770_v52  ;;  %v3794_v52 = vld [vmem:[%s5790_s6 + $0xa0] sm:$0xff] }
 0x5aa   : > { %2606 = vmatpush.msrb.mxu0 %v3796_v25  ;;  %v3792_v25 = vld [vmem:[%s5790_s6 + $0x90] sm:$0xff] }
 0x5ab   : > { %2430 = vmatpush.msrb.mxu1 %v3769_v56  ;;  %3784 = vmatmul.msk.bf16.vlgmr.msra.gmra.mxu0 %vm1155_vm2, %v2124_v26  ;;  %v2123_v56 = vpack.c.bf16 %v2019_v6, %v2019_v6 }
 0x5ac   : > { %2607 = vmatpush.msrb.mxu0 %v3795_v22  ;;  %3782 = vmatmul.msk.bf16.vlgmr.msra.gmra.mxu2 %vm1155_vm2, %v2122_v2  ;;  %v3805_v22 = vld [vmem:[%s5790_s6 + $0xf8] sm:$0xff] }
 0x5ad   : > { %2431 = vmatpush.msrb.mxu1 %v3768_v44  ;;  %3783 = vmatmul.msk.bf16.vlgmr.msrb.gmra.mxu3 %vm1155_vm2, %v2123_v56  ;;  %v2258_v44 = vpop.permute.xlu0 %2257  ;;  %v2146_v26 = vpop.permute.xlu2 %2145 }
 0x5ae   : > { %2585 = vmatpush.msra.mxu3 %v3793_v1  ;;  %2608 = vmatpush.msrb.mxu0 %v3794_v52  ;;  %v2190_v63 = vpop.permute.xlu1 %2189  ;;  %v2158_v14 = vperm.slane %v2146_v26, %v4635_v45 }
 0x5af   : > { %2625 = vmatpush.msra.mxu1 %v3801_v47 }
 0x5b0   : > { %2586 = vmatpush.msra.mxu3 %v3792_v25 }
 0x5b1   : > { %2626 = vmatpush.msra.mxu1 %v3800_v55 }
 0x5b2   : > { %2587 = vmatpush.msra.mxu3 %v3791_v30 }
 0x5b3   : > { %2627 = vmatpush.msra.mxu1 %v3799_v4 }
 0x5b4   : > { %2588 = vmatpush.msra.mxu3 %v3790_v59 }
 0x5b5   : > { %2628 = vmatpush.msra.mxu1 %v3798_v27  ;;  %v2152_v1 = vpop.permute.xlu0 %2151  ;;  %v5197_v52 = vpop.permute.xlu2 %2260 }
 0x5b6   : > { %2645 = vmatpush.msrb.mxu3 %v3805_v22  ;;  %3785 = vmatmul.msk.f32.vlgmr.msrb.gmra.mxu1 %vm926_vm1, %v5077_v19  ;;  %v2196_v25 = vpop.permute.xlu1 %2195  ;;  %v2160_v41 = vperm.slane %v2152_v1, %v4635_v45 }
 0x5b7   : > { %v2214_v48 = vperm.slane %v2196_v25, %v4635_v45 }
 0x5b8   : > { %2646 = vmatpush.msrb.mxu3 %v3804_v33 }
 0x5ba   : > { %2647 = vmatpush.msrb.mxu3 %v3803_v13 }
 0x5bb   : > { %3818 = vmatmul.msk.f32.vlgmr.msrb.gmra.mxu0 %vm926_vm1, %v5077_v19 }
 0x5bc   : > { %2648 = vmatpush.msrb.mxu3 %v3802_v35 }
 0x5bd   : > { %3817 = vmatmul.msk.f32.vlgmr.msra.gmra.mxu3 %vm926_vm1, %v5077_v19  ;;  %v5199_v47 = vpop.permute.xlu0 %2263  ;;  %v2193_v6 = vpop.permute.xlu2 %2192 }
 0x5be   : > { %3819 = vmatmul.msk.f32.vlgmr.msra.gmra.mxu1 %vm926_vm1, %v5077_v19  ;;  %v5203_v2 = vpop.permute.xlu1 %2269  ;;  %v2213_v62 = vperm.slane %v2193_v6, %v4635_v45 }
 0x5c5   : > { %3820 = vmatmul.msk.f32.vlgmr.msrb.gmra.mxu3 %vm926_vm1, %v5077_v19  ;;  %v2199_v55 = vpop.permute.xlu0 %2198  ;;  %v5201_v30 = vpop.permute.xlu2 %2266 }
 0x5c6   : > { %v2208_v59 = vpop.permute.xlu1 %2207 }
 0x5cd   : > { %v2205_v4 = vpop.permute.xlu0 %2204  ;;  %v2202_v56 = vpop.permute.xlu2 %2201 }
 0x5ce   : > { %v2311_v33 = vpop.permute.xlu1 %2310 }
 0x5cf   : > { %v2331_v15 = vperm.slane %v2311_v33, %v4635_v45  ;;  %v2212_v33 = vperm.slane %v2190_v63, %v4635_v45 }
 0x5d1   : > { %v2220_v26 = vsel %vm1140_vm3, %v2213_v62, %v2212_v33 }
 0x5d2   : > { %v2221_v6 = vsel %vm1142_vm4, %v2214_v48, %v2220_v26 }
 0x5d5   : > { %v2308_v27 = vpop.permute.xlu0 %2307  ;;  %v5205_v22 = vpop.permute.xlu2 %2210 }
 0x5d6   : > { %v2330_v37 = vperm.slane %v2308_v27, %v4635_v45  ;;  %v2320_v50 = vpop.permute.xlu1 %2319 }
 0x5d8   : > { %v2338_v40 = vsel %vm1140_vm3, %v2331_v15, %v2330_v37  ;;  %v2165_v15 = vsel %vm1148_vm7, %v2158_v14, %v2164_v28 }
 0x5dd   : > { %v2317_v13 = vpop.permute.xlu0 %2316  ;;  %v2314_v35 = vpop.permute.xlu2 %2313 }
 0x5de   : > { %v2333_v31 = vperm.slane %v2317_v13, %v4635_v45  ;;  %v2332_v42 = vperm.slane %v2314_v35, %v4635_v45  ;;  %v2159_v13 = vperm.slane %v2149_v61, %v4635_v45  ;;  %v2334_v35 = vperm.slane %v2320_v50, %v4635_v45  ;;  %v2329_v61 = vpop.permute.xlu1 %2328 }
 0x5e0   : > { %v2339_v27 = vsel %vm1142_vm4, %v2332_v42, %v2338_v40  ;;  %v2215_v40 = vperm.slane %v2199_v55, %v4635_v45  ;;  %v2274_v42 = vperm.slane %v2258_v44, %v4635_v45  ;;  %v2166_v63 = vsel %vm1150_vm8, %v2159_v13, %v2165_v15 }
 0x5e1   : > { %v2340_v36 = vsel %vm1144_vm5, %v2333_v31, %v2339_v27  ;;  %v2167_v14 = vsel %vm1152_vm9, %v2160_v41, %v2166_v63  ;;  %v2216_v55 = vperm.slane %v2202_v56, %v4635_v45  ;;  %v2217_v27 = vperm.slane %v2205_v4, %v4635_v45 }
 0x5e2   : > { %v2341_v1 = vsel %vm1146_vm6, %v2334_v35, %v2340_v36  ;;  %v2222_v44 = vsel %vm1144_vm5, %v2215_v40, %v2221_v6  ;;  %v2281_v36 = vsel %vm1144_vm5, %v2274_v42, %v4954_v0  ;;  %v2276_v41 = vperm.slane %v5199_v47, %v4635_v45 }
 0x5e3   : > { %v2337_v13 = vperm.slane %v2329_v61, %v4635_v45  ;;  %v2275_v56 = vperm.slane %v5197_v52, %v4635_v45  ;;  %v2223_v4 = vsel %vm1146_vm6, %v2216_v55, %v2222_v44  ;;  %v2218_v47 = vperm.slane %v2208_v59, %v4635_v45 }
 0x5e4   : > { %v2224_v0 = vsel %vm1148_vm7, %v2217_v27, %v2223_v4  ;;  %v2277_v40 = vperm.slane %v5201_v30, %v4635_v45 }
 0x5e5   : > { %v2326_v37 = vpop.permute.xlu0 %2325  ;;  %v2323_v21 = vpop.permute.xlu2 %2322  ;;  %v2282_v35 = vsel %vm1146_vm6, %v2275_v56, %v2281_v36 }
 0x5e6   : > { %v2336_v31 = vperm.slane %v2326_v37, %v4635_v45  ;;  %v2335_v28 = vperm.slane %v2323_v21, %v4635_v45  ;;  %v2283_v48 = vsel %vm1148_vm7, %v2276_v41, %v2282_v35  ;;  %v4002_v35 = vld [vmem:[%s5795_s11 + $0x4] ss:$0 sm:$0xff] }
 0x5e7   : > { %v2284_v63 = vsel %vm1150_vm8, %v2277_v40, %v2283_v48 }
 0x5e8   : > { %v2342_v33 = vsel %vm1148_vm7, %v2335_v28, %v2341_v1  ;;  %v2225_v1 = vsel %vm1150_vm8, %v2218_v47, %v2224_v0  ;;  %v2278_v28 = vperm.slane %v5203_v2, %v4635_v45 }
 0x5e9   : > { %v2343_v37 = vsel %vm1150_vm8, %v2336_v31, %v2342_v33  ;;  %v2219_v31 = vperm.slane %v5205_v22, %v4635_v45  ;;  %v4000_v22 = vld [vmem:[%s5795_s11 + $0x5] ss:$0 sm:$0xff] }
 0x5ea   : > { %v2344_v21 = vsel %vm1152_vm9, %v2337_v13, %v2343_v37  ;;  %v2285_v61 = vsel %vm1152_vm9, %v2278_v28, %v2284_v63 }
 0x623   : > { %v2184_v50 = vpop.f32.mrf.mxu1 }
 0x624   : > { %v5234_v25 = vadd.f32 %v2184_v50, %v2167_v14  ;;  %v2226_v14 = vsel %vm1152_vm9, %v2219_v31, %v2225_v1 }
 0x626   : > { %v2365_v15 = vsel %vm1155_vm2, %v5234_v25, -inf }
 0x627   : > { %2366 = vmax.xlane.f32.xlu2 %v2365_v15  ;;  %v4001_v15 = vld [vmem:[%s5795_s11 + $0x6] ss:$0 sm:$0xff] }
 0x628   : > { %v2361_v62 = vpop.f32.mrf.mxu0 }
 0x629   : > { %v5256_v26 = vadd.f32 %v2361_v62, %v2344_v21 }
 0x62b   : > { %v2186_v42 = vpop.f32.mrf.mxu1  ;;  %v2374_v59 = vsel %vm1155_vm2, %v5256_v26, -inf }
 0x62f   : > { %v2243_v50 = vpop.f32.mrf.mxu2  ;;  %2375 = vmax.xlane.f32.xlu2 %v2374_v59  ;;  %v3983_v59 = vld [vmem:[%s5798_s14] ss:$0 sm:$0xff] }
 0x630   : > { %v2363_v52 = vpop.f32.mrf.mxu0  ;;  %v2244_v30 = vadd.f32 %v2243_v50, %v2226_v14  ;;  %v2302_v6 = vpop.f32.mrf.mxu3  ;;  %v1445_v14 = vadd.f32 %v3983_v59, %v4834_v11 }
 0x631   : > { %v2303_v62 = vadd.f32 %v2302_v6, %v2285_v61  ;;  %v4003_v52 = vld [vmem:[%s5795_s11 + $0x7] ss:$0 sm:$0xff]  ;;  %v4154_v61 = vmov 2  }
 0x632   : > { %v2368_v55 = vsel %vm1155_vm2, %v2244_v30, -inf  ;;  %v3712_v50 = vmul.f32 -1.442695, %v1445_v14  ;;  %3959 = vset.pattern.permute.xlu0 %v4154_v61 }
 0x633   : > { %v5274_v44 = vpop.f32.mrf.mxu1  ;;  %v2371_v2 = vsel %vm1155_vm2, %v2303_v62, -inf  ;;  %2369 = vmax.xlane.f32.xlu1 %v2368_v55 }
 0x634   : > { %2372 = vmax.xlane.f32.xlu0 %v2371_v2  ;;  %4036 = vpow2.f32 %v3712_v50 }
 0x637   : > { %v2245_v41 = vpop.f32.mrf.mxu2 }
 0x638   : > { %v2610_v27 = vpop.f32.mrf.mxu0  ;;  %v2304_v37 = vpop.f32.mrf.mxu3  ;;  %v4155_v41 = vmov 1  }
 0x639   : > { %v2611_v33 = vadd.f32 %v4000_v22, %v2610_v27  ;;  %3958 = vset.pattern.permute.xlu2 %v4155_v41 }
 0x63a   : > { %v4037_v2 = vpop.eup %4036 }
 0x63b   : > { %v2654_v36 = vpack.c.bf16 %v2611_v33, %v2611_v33  ;;  %v2630_v56 = vpop.f32.mrf.mxu1  ;;  %v1450_v27 = vadd.f32 1.0, %v4037_v2  ;;  %v4157_v2 = vmov 3  }
 0x63c   : > { %v2631_v4 = vadd.f32 %v4001_v15, %v2630_v56 }
 0x63d   : > { %v2680_v13 = vsel %vm1483_vm10, %v2654_v36, 0  ;;  %vm1456_vm15 = vweird.f32 %v1450_v27 }
 0x63e   : > { %2689 = vmatpush.bf16.msrb.mxu1 %v2680_v13  ;;  %v2655_v0 = vpack.c.bf16 %v2631_v4, %v2631_v4 }
 0x640   : > { %v2699_v21 = vsel %vm1483_vm10, %v2655_v0, 0  ;;  %v2590_v47 = vpop.f32.mrf.mxu3 }
 0x641   : > { %v2591_v48 = vadd.f32 %v4002_v35, %v2590_v47  ;;  %2708 = vmatpush.bf16.msra.mxu3 %v2699_v21 }
 0x643   : > { %v2653_v40 = vpack.c.bf16 %v2591_v48, %v2591_v48 }
 0x645   : > { %v2661_v42 = vsel %vm1483_vm10, %v2653_v40, 0 }
 0x646   : > { %2670 = vmatpush.bf16.msra.mxu0 %v2661_v42 }
 0x648   : > { %v2650_v1 = vpop.f32.mrf.mxu3 }
 0x649   : > { %v2651_v31 = vadd.f32 %v4003_v52, %v2650_v1 }
 0x64b   : > { %v2656_v63 = vpack.c.bf16 %v2651_v31, %v2651_v31  ;;  %v1462_v31 = vand.u32 2147483648, %v1450_v27 }
 0x64d   : > { %v2718_v28 = vsel %vm1483_vm10, %v2656_v63, 0  ;;  %v1463_v59 = vor.u32 1.1754944e-38, %v1462_v31 }
 0x64e   : > { %2727 = vmatpush.bf16.msrb.mxu0 %v2718_v28  ;;  %v1460_v28 = vand.u32 2147483647, %v1450_v27 }
 0x650   : > { %vm1461_vm12 = vcmp.eq.f32.partialorder %v1460_v28, 8.507059e+37 }
 0x69a   : > { %v2367_v6 = vpop.xlane.xlu2 %2366 }
 0x69b   : > { %v2377_v22 = vsub.f32 %v5234_v25, %v2367_v6  ;;  %v4156_v6 = vmov 8  }
 0x69d   : > { %v2381_v55 = vmul.f32 1.442695, %v2377_v22  ;;  %v5857_v22 = vmov 0  }
 0x69f   : > { %4038 = vpow2.f32 %v2381_v55  ;;  %v664_v55 = vld [vmem:[%s646_s25] sm:$0xff] }
 0x6a0   : > { %4040 = vrcp.f32 %v1450_v27 }
 0x6a2   : > { %v2376_v33 = vpop.xlane.xlu2 %2375 }
 0x6a3   : > { %v2380_v36 = vsub.f32 %v5256_v26, %v2376_v33 }
 0x6a5   : > { %v5298_v37 = vpop.eup %4038  ;;  %v2387_v11 = vmul.f32 1.442695, %v2380_v36 }
 0x6a6   : > { %v2370_v15 = vpop.xlane.xlu1 %2369  ;;  %v2389_v13 = vsel %vm1155_vm2, %v5298_v37, 0.0  ;;  %v4041_v26 = vpop.eup %4040 }
 0x6a7   : > { %4042 = vpow2.f32 %v2387_v11  ;;  %v2373_v25 = vpop.xlane.xlu0 %2372  ;;  %v2378_v56 = vsub.f32 %v2244_v30, %v2370_v15  ;;  %2390 = vadd.xlane.f32.xlu0 %v2389_v13  ;;  %v1452_v48 = vmul.f32 %v4041_v26, %v1450_v27  ;;  %vm1457_vm0 = vweird.f32 %v4041_v26  ;;  %v4083_v15 = vld [vmem:[%s4862_s26] sm:$0xff]  ;;  %s619_s26 = scalar_lea.vmem [#allocation2], %s5566_s21 }
 0x6a8   : > { %v2379_v4 = vsub.f32 %v2303_v62, %v2373_v25  ;;  %vm1458_vm11 = vmor %vm1456_vm15, %vm1457_vm0  ;;  %v1506_v13 = vsub.f32 %v4083_v15, %v4904_v49  ;;  %v1514_v25 = vsub.f32 %v4083_v15, %v4907_v57  ;;  %s3533_s25 = sshll.u32 %s619_s26, 4  ;;  %s3534_s25 = int_to_ptr.vmem [resolvable:$true] %s3533_s25 }
 0x6a9   : > { %v2383_v35 = vmul.f32 1.442695, %v2378_v56  ;;  %v1453_v62 = vsub.f32 1.0, %v1452_v48 }
 0x6aa   : > { %v2385_v0 = vmul.f32 1.442695, %v2379_v4 }
 0x6ab   : > { %4044 = vpow2.f32 %v2383_v35  ;;  %v1454_v1 = vmul.f32 %v4041_v26, %v1453_v62  ;;  %v1521_v35 = vsub.f32 %v4083_v15, %v4909_v39 }
 0x6ac   : > { %4046 = vpow2.f32 %v2385_v0 }
 0x6ad   : > { %v5302_v21 = vpop.eup %4042  ;;  %v1455_v63 = vadd.f32 %v4041_v26, %v1454_v1 }
 0x6ae   : > { %v2398_v47 = vsel %vm1155_vm2, %v5302_v21, 0.0 }
 0x6af   : > { %2399 = vadd.xlane.f32.xlu0 %v2398_v47  ;;  %v1459_v14 = vsel %vm1458_vm11, %v4041_v26, %v1455_v63 }
 0x6b0   : > { %v1464_v50 = vsel %vm1461_vm12, %v1463_v59, %v1459_v14 }
 0x6b1   : > { %v4045_v40 = vpop.eup %4044 }
 0x6b2   : > { %v4047_v42 = vpop.eup %4046  ;;  %v2392_v52 = vsel %vm1155_vm2, %v4045_v40, 0.0 }
 0x6b3   : > { %v2395_v30 = vsel %vm1155_vm2, %v4047_v42, 0.0  ;;  %2393 = vadd.xlane.f32.xlu2 %v2392_v52 }
 0x6b4   : > { %2396 = vadd.xlane.f32.xlu1 %v2395_v30 }
 0x6c3   : > { %1523 = vperm.xlu0 %3959, %v1464_v50  }
 0x6cb   : > { %3962 = vset.pattern.permute.xlu0 %v4156_v6  ;;  %1516 = vperm.xlu2 %3958, %v1464_v50  }
 0x6cc   : > { %3112 = vperm.xlu0 %3962, %v4468_v51  }
 0x6cd   : > { %1509 = vperm.xlu1 %3957, %v1464_v50  }
 0x6d3   : > { %3961 = vset.pattern.permute.xlu2 %v5857_v22 }
 0x6d4   : > { %3115 = vperm.xlu0 %3962, %v4474_v54   ;;  %1540 = vperm.xlu2 %3961, %v664_v55  }
 0x6d5   : > { %3960 = vset.pattern.permute.xlu1 %v4157_v2 }
 0x6d6   : > { %1530 = vperm.xlu1 %3960, %v1464_v50  }
 0x6dc   : > { %3171 = vperm.xlu0 %3962, %v4562_v46   ;;  %3964 = vset.pattern.permute.xlu2 %v4156_v6 }
 0x6de   : > { %3963 = vset.pattern.permute.xlu1 %v4156_v6 }
 0x6e4   : > { %3177 = vperm.xlu0 %3962, %v4604_v17  }
 0x6ec   : > { %3121 = vperm.xlu0 %3962, %v4503_v9  }
 0x6f4   : > { %3180 = vperm.xlu0 %3962, %v4601_v16  }
 0x6fc   : > { %3127 = vperm.xlu0 %3962, %v4521_v20  }
 0x704   : > { %3189 = vperm.xlu0 %3962, %v4631_v43  }
 0x70c   : > { %3230 = vperm.xlu0 %3962, %v4578_v60  }
 0x714   : > { %3292 = vperm.xlu0 %3962, %v4592_v8  }
 0x71a   : > { %v2391_v51 = vpop.xlane.xlu0 %2390 }
 0x71b   : > { %4048 = vrcp.f32 %v2391_v51 }
 0x71c   : > { %3239 = vperm.xlu0 %3962, %v4616_v24  }
 0x721   : > { %v4049_v54 = vpop.eup %4048 }
 0x722   : > { %v2405_v46 = vmul.f32 %v4049_v54, %v5298_v37  ;;  %v2400_v17 = vpop.xlane.xlu0 %2399 }
 0x723   : > { %4050 = vrcp.f32 %v2400_v17  ;;  %v3810_v17 = vld [vmem:[%s5791_s7 + $0x20] sm:$0xff] }
 0x724   : > { %v2409_v27 = vpack.c.bf16 %v2405_v46, %v2405_v46  ;;  %3301 = vperm.xlu0 %3962, %v4652_v58   ;;  %v3811_v46 = vld [vmem:[%s5791_s7 + $0x28] sm:$0xff]  ;;  %2751 = vmatpush.msra.mxu1 %v3810_v17  ;;  %v5863_v17 = vld [vmem:[#allocation14_spill] sm:$0xff] }
 0x726   : > { %3821 = vmatmul.msk.bf16.vlgmr.msra.gmra.mxu0 %vm1155_vm2, %v2409_v27  ;;  %v2394_v9 = vpop.xlane.xlu2 %2393  ;;  %v2460_v14 = vunpack.c.l.b16 %v2409_v27  ;;  %v3812_v27 = vld [vmem:[%s5791_s7 + $0x30] sm:$0xff] }
 0x727   : > { %4052 = vrcp.f32 %v2394_v9  ;;  %v2397_v20 = vpop.xlane.xlu1 %2396  ;;  %2797 = vmatpush.msrb.mxu3 %v3812_v27  ;;  %v3813_v9 = vld [vmem:[%s5791_s7 + $0x38] sm:$0xff] }
 0x728   : > { %4054 = vrcp.f32 %v2397_v20 }
 0x729   : > { %v4051_v60 = vpop.eup %4050 }
 0x72a   : > { %v2408_v33 = vmul.f32 %v4051_v60, %v5302_v21 }
 0x72c   : > { %3248 = vperm.xlu0 %3962, %v4671_v12   ;;  %v2412_v58 = vpack.c.bf16 %v2408_v33, %v2408_v33 }
 0x72d   : > { %v4053_v8 = vpop.eup %4052 }
 0x72e   : > { %v4055_v16 = vpop.eup %4054  ;;  %v2406_v24 = vmul.f32 %v4053_v8, %v4045_v40  ;;  %v1517_v12 = vpop.permute.xlu2 %1516  ;;  %v1528_v40 = vsub.f32 %v4083_v15, %v4911_v18  ;;  %v2463_v51 = vunpack.c.l.b16 %v2412_v58 }
 0x72f   : > { %v2407_v43 = vmul.f32 %v4055_v16, %v4047_v42  ;;  %v1519_v0 = vmul.f32 %v1517_v12, %v1514_v25 }
 0x730   : > { %v2410_v36 = vpack.c.bf16 %v2406_v24, %v2406_v24 }
 0x731   : > { %v2411_v37 = vpack.c.bf16 %v2407_v43, %v2407_v43 }
 0x732   : > { %3822 = vmatmul.msk.bf16.vlgmr.msrb.gmra.mxu1 %vm1155_vm2, %v2410_v36  ;;  %v2461_v28 = vunpack.c.l.b16 %v2410_v36 }
 0x733   : > { %3823 = vmatmul.msk.bf16.vlgmr.msra.gmra.mxu3 %vm1155_vm2, %v2411_v37  ;;  %v2462_v55 = vunpack.c.l.b16 %v2411_v37  ;;  %2820 = vmatpush.msrb.mxu1 %v3813_v9 }
 0x734   : > { %3310 = vperm.xlu0 %3962, %v4685_v34   ;;  %v2464_v6 = vpack.c.b16 %v2461_v28, %v2460_v14  ;;  %v5859_v14 = vld [vmem:[#allocation12_spill] sm:$0xff] }
 0x735   : > { %v1524_v11 = vpop.permute.xlu0 %1523  ;;  %v2465_v54 = vpack.c.b16 %v2463_v51, %v2462_v55  ;;  %v3999_v55 = vld [vmem:[%s5798_s14 + $0x1] ss:$0 sm:$0xff] }
 0x736   : > { %3824 = vmatmul.msk.bf16.vlgmr.msrb.gmra.mxu0 %vm1155_vm2, %v2412_v58  ;;  %v1526_v21 = vmul.f32 %v1524_v11, %v1521_v35  ;;  %v5345_v1 = vpop.permute.xlu2 %1540  ;;  %v2434_v51 = vadd.f32 %v3999_v55, %v5274_v44  ;;  %v5867_v44 = vld [vmem:[#allocation20_spill] sm:$0xff]  ;;  %v3850_v55 = vld [vmem:[%s5789_s5 + $0x2a8] sm:$0xff] }
 0x73c   : > { %3966 = vset.pattern.permute.xlu0 %v4155_v41 }
 0x73e   : > { %v3113_v56 = vpop.permute.xlu0 %3112 }
 0x73f   : > { %v1510_v4 = vpop.permute.xlu1 %1509  ;;  %v3135_v42 = vperm.slane %v3113_v56, %v4635_v45 }
 0x740   : > { %v1512_v26 = vmul.f32 %v1510_v4, %v1506_v13 }
 0x742   : > { %v1520_v34 = vadd.f32 %v1519_v0, %v1512_v26 }
 0x744   : > { %v1527_v47 = vadd.f32 %v1526_v21, %v1520_v34  ;;  %v4004_v34 = vld [vmem:[%s5796_s12 + $0x1] ss:$0 sm:$0xff] }
 0x746   : > { %v3116_v48 = vpop.permute.xlu0 %3115 }
 0x747   : > { %v3136_v52 = vperm.slane %v3116_v48, %v4635_v45 }
 0x748   : > { %v1531_v49 = vpop.permute.xlu1 %1530 }
 0x749   : > { %v5343_v57 = vsel %vm1140_vm3, %v3136_v52, %v3135_v42  ;;  %v1533_v30 = vmul.f32 %v1531_v49, %v1528_v40  ;;  %v5858_v49 = vld [vmem:[#allocation21_spill] sm:$0xff] }
 0x74b   : > { %v1534_v62 = vadd.f32 %v1533_v30, %v1527_v47 }
 0x74d   : > { %v1535_v39 = vmul.f32 0.25, %v1534_v62 }
 0x74f   : > { %v3715_v31 = vclamps-f32 %v1535_v39, 10.0 }
 0x751   : > { %v1543_v63 = vmul.f32 %v3715_v31, %v5345_v1 }
 0x753   : > { %v5354_v18 = vadd.f32 %v4083_v15, %v1543_v63 }
 0x755   : > { %v2455_v59 = vpack.c.bf16 %v5354_v18, %v5354_v18  ;;  %3512 = vst.msk [vmem:[%s5352_s23] sm:$0xff] %vm3511_vm13, %v5354_v18 }
 0x757   : > { %v2473_v50 = vsel %vm1483_vm10, %v2455_v59, 0 }
 0x758   : > { %2482 = vmatpush.bf16.msrb.mxu2 %v2473_v50  ;;  %v5860_v50 = vld [vmem:[#allocation16_spill] sm:$0xff] }
 0x75b   : > { %3787 = vmatmul.msk.bf16.vlgmr.msrb.gmra.mxu2 %vm1155_vm2, %v2464_v6  ;;  %v5861_v6 = vld [vmem:[#allocation13_spill] sm:$0xff] }
 0x75c   : > { %2774 = vmatpush.msra.mxu2 %v3811_v46  ;;  %v3786_v46 = vmul.f32 -1.442695, %v2434_v51  ;;  %v3854_v51 = vld [vmem:[%s5789_s5 + $0x2c8] sm:$0xff] }
 0x75e   : > { %4056 = vpow2.f32 %v3786_v46  ;;  %v3849_v46 = vld [vmem:[%s5789_s5 + $0x2a0] sm:$0xff] }
 0x764   : > { %v4057_v27 = vpop.eup %4056 }
 0x765   : > { %v2439_v9 = vadd.f32 1.0, %v4057_v27  ;;  %v3853_v27 = vld [vmem:[%s5789_s5 + $0x2c0] sm:$0xff] }
 0x767   : > { %4058 = vrcp.f32 %v2439_v9  ;;  %vm2445_vm15 = vweird.f32 %v2439_v9 }
 0x76b   : > { %3788 = vmatmul.msk.bf16.gmra.mxu2 %vm1155_vm2, %v2465_v54  ;;  %v5862_v54 = vld [vmem:[#allocation18_spill] sm:$0xff] }
 0x7a3   : > { %v2672_v20 = vpop.f32.mrf.mxu0 }
 0x7a4   : > { %3825 = vmatmul.msk.f32.vlgmr.msra.gmra.mxu1 %vm1155_vm2, %v2672_v20  ;;  %v5864_v20 = vld [vmem:[#allocation15_spill] sm:$0xff] }
 0x7ab   : > { %v2674_v60 = vpop.f32.mrf.mxu0 }
 0x7ac   : > { %v5865_v60 = vld [vmem:[#allocation17_spill] sm:$0xff] }
 0x7af   : > { %v2691_v8 = vpop.f32.mrf.mxu1 }
 0x7b0   : > { %3826 = vmatmul.msk.f32.vlgmr.msra.gmra.mxu2 %vm1155_vm2, %v2691_v8  ;;  %v4059_v8 = vpop.eup %4058 }
 0x7b1   : > { %vm2446_vm14 = vweird.f32 %v4059_v8 }
 0x7b2   : > { %vm2447_vm0 = vmor %vm2445_vm15, %vm2446_vm14 }
 0x7b3   : > { %v2729_v16 = vpop.f32.mrf.mxu0 }
 0x7b4   : > { %3828 = vmatmul.msk.f32.vlgmr.msrb.gmra.mxu1 %vm1155_vm2, %v2729_v16  ;;  %v2441_v16 = vmul.f32 %v4059_v8, %v2439_v9 }
 0x7b6   : > { %v2710_v24 = vpop.f32.mrf.mxu3 }
 0x7b7   : > { %3827 = vmatmul.msk.f32.vlgmr.msrb.gmra.mxu3 %vm1155_vm2, %v2710_v24  ;;  %v2693_v43 = vpop.f32.mrf.mxu1  ;;  %v5866_v24 = vld [vmem:[#allocation19_spill] sm:$0xff] }
 0x7b8   : > { %v2442_v43 = vsub.f32 1.0, %v2441_v16 }
 0x7bb   : > { %v2731_v33 = vpop.f32.mrf.mxu0 }
 0x7bc   : > { %v2443_v33 = vmul.f32 %v4059_v8, %v2442_v43 }
 0x7be   : > { %v2712_v36 = vpop.f32.mrf.mxu3 }
 0x7bf   : > { %v2444_v36 = vadd.f32 %v4059_v8, %v2443_v33 }
 0x7de   : > { %v5380_v37 = vpop.f32.mrf.mxu2 }
 0x7e6   : > { %v5382_v58 = vpop.f32.mrf.mxu2 }
 0x7ee   : > { %v5384_v11 = vpop.f32.mrf.mxu2 }
 0x7f6   : > { %v5386_v12 = vpop.f32.mrf.mxu2 }
 0x821   : > { %v2753_v15 = vpop.f32.mrf.mxu1 }
 0x822   : > { %v2825_v56 = vsel %vm926_vm1, %v2753_v15, 0.0  ;;  %v2451_v15 = vand.u32 2147483648, %v2439_v9 }
 0x831   : > { %v2822_v4 = vpop.f32.mrf.mxu1 }
 0x832   : > { %v2830_v47 = vsel %vm926_vm1, %v2822_v4, 0.0 }
 0x833   : > { %v2776_v13 = vpop.f32.mrf.mxu2 }
 0x834   : > { %v2826_v25 = vsel %vm926_vm1, %v2776_v13, 0.0  ;;  %v2449_v13 = vand.u32 2147483647, %v2439_v9  ;;  %v3857_v9 = vld [vmem:[%s5789_s5 + $0x2e0] sm:$0xff] }
 0x835   : > { %v2827_v35 = vadd.f32 %v2826_v25, %v2825_v56  ;;  %v2448_v25 = vsel %vm2447_vm0, %v4059_v8, %v2444_v36  ;;  %v2452_v56 = vor.u32 1.1754944e-38, %v2451_v15 }
 0x836   : > { %vm2450_vm11 = vcmp.eq.f32.partialorder %v2449_v13, 8.507059e+37 }
 0x837   : > { %v5438_v4 = vsel %vm2450_vm11, %v2452_v56, %v2448_v25 }
 0x83a   : > { %v2799_v0 = vpop.f32.mrf.mxu3 }
 0x83b   : > { %v2828_v26 = vsel %vm926_vm1, %v2799_v0, 0.0  ;;  %v3836_v0 = vld [vmem:[%s5789_s5 + $0x238] sm:$0xff] }
 0x83c   : > { %v2829_v21 = vadd.f32 %v2828_v26, %v2827_v35  ;;  %v3832_v35 = vld [vmem:[%s5789_s5 + $0x218] sm:$0xff]  ;;  %2975 = vmatpush.msra.mxu3 %v3836_v0 }
 0x83d   : > { %v3840_v26 = vld [vmem:[%s5789_s5 + $0x258] sm:$0xff]  ;;  %2955 = vmatpush.msrb.mxu2 %v3832_v35 }
 0x83e   : > { %v2831_v48 = vadd.f32 %v2830_v47, %v2829_v21  ;;  %v3844_v21 = vld [vmem:[%s5789_s5 + $0x278] sm:$0xff]  ;;  %2995 = vmatpush.msra.mxu0 %v3840_v26  ;;  %v3835_v47 = vld [vmem:[%s5789_s5 + $0x230] sm:$0xff] }
 0x83f   : > { %3015 = vmatpush.msra.mxu1 %v3844_v21  ;;  %2976 = vmatpush.msra.mxu3 %v3835_v47  ;;  %v4005_v47 = vld [vmem:[%s5799_s15 + $0x1] ss:$0 sm:$0xff] }
 0x840   : > { %v2835_v40 = vadd.f32 %v4004_v34, %v2831_v48  ;;  %v3831_v34 = vld [vmem:[%s5789_s5 + $0x210] sm:$0xff] }
 0x841   : > { %v3839_v48 = vld [vmem:[%s5789_s5 + $0x250] sm:$0xff]  ;;  %2956 = vmatpush.msrb.mxu2 %v3831_v34 }
 0x842   : > { %v2836_v42 = vadd.f32 %v2835_v40, %v5077_v19  ;;  %v3172_v19 = vpop.permute.xlu0 %3171  ;;  %v3843_v40 = vld [vmem:[%s5789_s5 + $0x270] sm:$0xff]  ;;  %2996 = vmatpush.msra.mxu0 %v3839_v48 }
 0x843   : > { %3016 = vmatpush.msra.mxu1 %v3843_v40  ;;  %v4006_v40 = vld [vmem:[%s5800_s16 + $0x1] ss:$0 sm:$0xff] }
 0x844   : > { %v2837_v52 = vsel %vm926_vm1, %v2836_v42, 0.0 }
 0x845   : > { %2838 = vadd.xlane.f32.xlu1 %v2837_v52  ;;  %v3834_v52 = vld [vmem:[%s5789_s5 + $0x228] sm:$0xff] }
 0x846   : > { %2977 = vmatpush.msra.mxu3 %v3834_v52 }
 0x85e   : > { %3174 = vperm.xlu1 %3963, %v4583_v3  }
 0x866   : > { %3124 = vperm.xlu1 %3963, %v4506_v10  }
 0x86e   : > { %3186 = vperm.xlu1 %3963, %v4621_v32   ;;  %v3178_v32 = vpop.permute.xlu0 %3177 }
 0x86f   : > { %v3196_v39 = vperm.slane %v3178_v32, %v4635_v45  ;;  %v3833_v32 = vld [vmem:[%s5789_s5 + $0x220] sm:$0xff] }
 0x870   : > { %2978 = vmatpush.msra.mxu3 %v3833_v32  ;;  %v4011_v32 = vld [vmem:[%s5794_s10 + $0x16] ss:$0 sm:$0xff] }
 0x876   : > { %3133 = vperm.xlu1 %3963, %v4538_v29  }
 0x87e   : > { %3233 = vperm.xlu1 %3963, %v4589_v7  }
 0x886   : > { %3236 = vperm.xlu1 %3963, %v4613_v23   ;;  %v5413_v23 = vpop.permute.xlu0 %3121 }
 0x88e   : > { %3298 = vperm.xlu1 %3963, %v4625_v38   ;;  %v3181_v38 = vpop.permute.xlu0 %3180 }
 0x88f   : > { %v3197_v31 = vperm.slane %v3181_v38, %v4635_v45  ;;  %v3848_v38 = vld [vmem:[%s5789_s5 + $0x298] sm:$0xff] }
 0x896   : > { %3245 = vperm.xlu1 %3963, %v4644_v53   ;;  %v3128_v8 = vpop.permute.xlu0 %3127 }
 0x897   : > { %v3140_v36 = vperm.slane %v3128_v8, %v4635_v45  ;;  %v3872_v8 = vld [vmem:[%s5793_s9 + $0x58] sm:$0xff] }
 0x89e   : > { %3307 = vperm.xlu1 %3963, %v4667_v5   ;;  %v3194_v5 = vperm.slane %v3172_v19, %v4635_v45  ;;  %v3838_v19 = vld [vmem:[%s5789_s5 + $0x248] sm:$0xff] }
 0x89f   : > { %2997 = vmatpush.msra.mxu0 %v3838_v19 }
 0x8a6   : > { %3967 = vset.pattern.permute.xlu1 %v4154_v61 }
 0x8b8   : > { %v2839_v3 = vpop.xlane.xlu1 %2838 }
 0x8b9   : > { %v2840_v10 = vmul.f32 %v2839_v3, %v5858_v49  ;;  %v3842_v3 = vld [vmem:[%s5789_s5 + $0x268] sm:$0xff] }
 0x8ba   : > { %3017 = vmatpush.msra.mxu1 %v3842_v3 }
 0x8bb   : > { %v5408_v30 = vsub.f32 %v2836_v42, %v2840_v10  ;;  %v3830_v42 = vld [vmem:[%s5789_s5 + $0x208] sm:$0xff]  ;;  %v3829_v10 = vld [vmem:[%s5789_s5 + $0x200] sm:$0xff] }
 0x8bc   : > { %2957 = vmatpush.msrb.mxu2 %v3830_v42 }
 0x8bd   : > { %v2842_v29 = vmul.f32 %v5408_v30, %v5408_v30 }
 0x8be   : > { %2958 = vmatpush.msrb.mxu2 %v3829_v10 }
 0x8bf   : > { %v2843_v7 = vsel %vm926_vm1, %v2842_v29, 0.0  ;;  %v3837_v29 = vld [vmem:[%s5789_s5 + $0x240] sm:$0xff] }
 0x8c0   : > { %2844 = vadd.xlane.f32.xlu2 %v2843_v7  ;;  %v3841_v7 = vld [vmem:[%s5789_s5 + $0x260] sm:$0xff]  ;;  %2998 = vmatpush.msra.mxu0 %v3837_v29  ;;  %v4012_v29 = vld [vmem:[%s5794_s10 + $0x17] ss:$0 sm:$0xff] }
 0x8c1   : > { %3018 = vmatpush.msra.mxu1 %v3841_v7  ;;  %3035 = vmatpush.msra.mxu2 %v3848_v38 }
 0x8d0   : > { %v3175_v53 = vpop.permute.xlu1 %3174 }
 0x8d1   : > { %v3195_v62 = vperm.slane %v3175_v53, %v4635_v45  ;;  %v3852_v53 = vld [vmem:[%s5789_s5 + $0x2b8] sm:$0xff] }
 0x8d2   : > { %3055 = vmatpush.msrb.mxu3 %v3852_v53 }
 0x8d3   : > { %v3202_v63 = vsel %vm1140_vm3, %v3195_v62, %v3194_v5  ;;  %v3856_v5 = vld [vmem:[%s5789_s5 + $0x2d8] sm:$0xff] }
 0x8d4   : > { %v3203_v28 = vsel %vm1142_vm4, %v3196_v39, %v3202_v63  ;;  %v3860_v62 = vld [vmem:[%s5789_s5 + $0x2f8] sm:$0xff]  ;;  %v3847_v39 = vld [vmem:[%s5789_s5 + $0x290] sm:$0xff]  ;;  %3075 = vmatpush.msrb.mxu0 %v3856_v5 }
 0x8d5   : > { %v5422_v59 = vsel %vm1144_vm5, %v3197_v31, %v3203_v28  ;;  %v3851_v31 = vld [vmem:[%s5789_s5 + $0x2b0] sm:$0xff]  ;;  %3095 = vmatpush.msrb.mxu1 %v3860_v62  ;;  %3036 = vmatpush.msra.mxu2 %v3847_v39 }
 0x8d6   : > { %v3855_v28 = vld [vmem:[%s5789_s5 + $0x2d0] sm:$0xff]  ;;  %3056 = vmatpush.msrb.mxu3 %v3851_v31 }
 0x8d7   : > { %3076 = vmatpush.msrb.mxu0 %v3855_v28  ;;  %v4013_v62 = vld [vmem:[%s5794_s10 + $0x14] ss:$0 sm:$0xff]  ;;  %v4014_v39 = vld [vmem:[%s5794_s10 + $0x15] ss:$0 sm:$0xff]  ;;  %v4007_v31 = vld [vmem:[%s5794_s10 + $0x12] ss:$0 sm:$0xff] }
 0x8d8   : > { %3118 = vperm.xlu2 %3964, %v5859_v14   ;;  %v3859_v14 = vld [vmem:[%s5789_s5 + $0x2f0] sm:$0xff]  ;;  %3057 = vmatpush.msrb.mxu3 %v3850_v55 }
 0x8d9   : > { %3096 = vmatpush.msrb.mxu1 %v3859_v14  ;;  %3077 = vmatpush.msrb.mxu0 %v3854_v51 }
 0x8da   : > { %3058 = vmatpush.msrb.mxu3 %v3849_v46 }
 0x8db   : > { %3078 = vmatpush.msrb.mxu0 %v3853_v27  ;;  %v4009_v27 = vld [vmem:[%s5794_s10 + $0x10] ss:$0 sm:$0xff] }
 0x8e0   : > { %3183 = vperm.xlu2 %3964, %v5860_v50  }
 0x8e8   : > { %3130 = vperm.xlu2 %3964, %v5861_v6   ;;  %v3846_v6 = vld [vmem:[%s5789_s5 + $0x288] sm:$0xff] }
 0x8e9   : > { %3037 = vmatpush.msra.mxu2 %v3846_v6 }
 0x8f0   : > { %3192 = vperm.xlu2 %3964, %v5862_v54   ;;  %v3845_v54 = vld [vmem:[%s5789_s5 + $0x280] sm:$0xff] }
 0x8f1   : > { %3038 = vmatpush.msra.mxu2 %v3845_v54 }
 0x8f8   : > { %3289 = vperm.xlu2 %3964, %v5863_v17  }
 0x900   : > { %3295 = vperm.xlu2 %3964, %v5864_v20   ;;  %v3125_v20 = vpop.permute.xlu1 %3124 }
 0x901   : > { %v3139_v33 = vperm.slane %v3125_v20, %v4635_v45 }
 0x908   : > { %3242 = vperm.xlu2 %3964, %v5865_v60  }
 0x910   : > { %3304 = vperm.xlu2 %3964, %v5866_v24   ;;  %v3138_v24 = vperm.slane %v5413_v23, %v4635_v45 }
 0x918   : > { %3251 = vperm.xlu2 %3964, %v5867_v44  }
 0x920   : > { %3965 = vset.pattern.permute.xlu2 %v5857_v22 }
 0x921   : > { %2497 = vperm.xlu2 %3965, %v5438_v4  }
 0x929   : > { %3968 = vset.pattern.permute.xlu2 %v4157_v2 }
 0x933   : > { %v2845_v63 = vpop.xlane.xlu2 %2844 }
 0x934   : > { %v2846_v50 = vmul.f32 %v2845_v63, %v5858_v49  ;;  %v3858_v49 = vld [vmem:[%s5789_s5 + $0x2e8] sm:$0xff]  ;;  %v4008_v63 = vld [vmem:[%s5794_s10 + $0x13] ss:$0 sm:$0xff] }
 0x935   : > { %3097 = vmatpush.msrb.mxu1 %v3858_v49 }
 0x936   : > { %v2847_v17 = vadd.f32 1e-05, %v2846_v50 }
 0x937   : > { %3098 = vmatpush.msrb.mxu1 %v3857_v9  ;;  %v4010_v9 = vld [vmem:[%s5794_s10 + $0x11] ss:$0 sm:$0xff] }
 0x938   : > { %4060 = vrsqrt.f32 %v2847_v17  ;;  %vm2854_vm14 = vweird.f32 %v2847_v17 }
 0x93b   : > { %v3119_v60 = vpop.permute.xlu2 %3118 }
 0x93c   : > { %v3137_v16 = vperm.slane %v3119_v60, %v4635_v45 }
 0x93e   : > { %v4061_v43 = vpop.eup %4060  ;;  %v3144_v44 = vsel %vm1142_vm4, %v3137_v16, %v5343_v57 }
 0x93f   : > { %v2849_v15 = vmul.f32 %v4061_v43, %v2847_v17  ;;  %v3145_v13 = vsel %vm1144_vm5, %v3138_v24, %v3144_v44  ;;  %vm2855_vm12 = vweird.f32 %v4061_v43  ;;  %v3871_v44 = vld [vmem:[%s5793_s9 + $0x50] sm:$0xff] }
 0x940   : > { %v3146_v25 = vsel %vm1146_vm6, %v3139_v33, %v3145_v13  ;;  %vm2856_vm15 = vmor %vm2854_vm14, %vm2855_vm12  ;;  %v3870_v13 = vld [vmem:[%s5793_s9 + $0x48] sm:$0xff] }
 0x941   : > { %v2850_v56 = vmul.f32 %v4061_v43, %v2849_v15  ;;  %v5549_v35 = vsel %vm1148_vm7, %v3140_v36, %v3146_v25 }
 0x943   : > { %v2851_v23 = vmul.f32 0.5, %v2850_v56  ;;  %v3184_v0 = vpop.permute.xlu2 %3183 }
 0x944   : > { %v3198_v26 = vperm.slane %v3184_v0, %v4635_v45  ;;  %v5637_v0 = vpop.permute.xlu1 %3186 }
 0x945   : > { %v2852_v21 = vsub.f32 1.5, %v2851_v23  ;;  %v3869_v23 = vld [vmem:[%s5793_s9 + $0x40] sm:$0xff] }
 0x946   : > { %v5554_v57 = vsel %vm1146_vm6, %v3198_v26, %v5422_v59 }
 0x947   : > { %v2853_v34 = vmul.f32 %v4061_v43, %v2852_v21  ;;  %v5641_v21 = vpop.permute.xlu0 %3189 }
 0x949   : > { %v2857_v48 = vsel %vm2856_vm15, %v4061_v43, %v2853_v34 }
 0x94a   : > { %v2858_v42 = vmul.f32 %v2857_v48, %v5408_v30 }
 0x94b   : > { %v5639_v26 = vpop.permute.xlu2 %3130 }
 0x94c   : > { %v2862_v59 = vmul.f32 %v4005_v47, %v2858_v42  ;;  %v5643_v34 = vpop.permute.xlu1 %3133 }
 0x94e   : > { %v5568_v52 = vadd.f32 %v4006_v40, %v2862_v59 }
 0x94f   : > { %v3231_v48 = vpop.permute.xlu0 %3230 }
 0x950   : > { %3874 = vmatmul.msk.f32.vlgmr.msrb.gmra.mxu2 %vm926_vm1, %v5568_v52  ;;  %3875 = vmatmul.msk.f32.vlgmr.msra.gmra.mxu3 %vm926_vm1, %v5568_v52  ;;  %3510 = vst.msk [vmem:[%s619_s26] sm:$0xff] %vm926_vm1, %v5568_v52 }
 0x951   : > { %3876 = vmatmul.msk.f32.vlgmr.msra.gmra.mxu0 %vm926_vm1, %v5568_v52  ;;  %3877 = vmatmul.msk.f32.vlgmr.msra.gmra.mxu1 %vm926_vm1, %v5568_v52 }
 0x953   : > { %v5645_v47 = vpop.permute.xlu2 %3192 }
 0x954   : > { %v3234_v40 = vpop.permute.xlu1 %3233 }
 0x957   : > { %v3293_v59 = vpop.permute.xlu0 %3292 }
 0x958   : > { %3878 = vmatmul.msk.f32.vlgmr.msra.gmra.mxu2 %vm926_vm1, %v5568_v52  ;;  %3879 = vmatmul.msk.f32.vlgmr.msrb.gmra.mxu3 %vm926_vm1, %v5568_v52 }
 0x959   : > { %3880 = vmatmul.msk.f32.vlgmr.msrb.gmra.mxu0 %vm926_vm1, %v5568_v52  ;;  %3881 = vmatmul.msk.f32.vlgmr.msrb.gmra.mxu1 %vm926_vm1, %v5568_v52 }
 0x95b   : > { %v3290_v42 = vpop.permute.xlu2 %3289 }
 0x9ce   : > { %v3000_v30 = vpop.f32.mrf.mxu0  ;;  %v3020_v19 = vpop.f32.mrf.mxu1 }
 0x9cf   : > { %v3001_v46 = vadd.f32 %v4007_v31, %v3000_v30  ;;  %v3021_v17 = vadd.f32 %v4008_v63, %v3020_v19  ;;  %v3237_v30 = vpop.permute.xlu1 %3236  ;;  %v3296_v19 = vpop.permute.xlu2 %3295  ;;  %v3253_v63 = vperm.slane %v3231_v48, %v4635_v45 }
 0x9d0   : > { %v3255_v31 = vperm.slane %v3237_v30, %v4635_v45 }
 0x9d1   : > { %v3105_v43 = vpack.c.bf16 %v3001_v46, %v3001_v46  ;;  %v3106_v33 = vpack.c.bf16 %v3021_v17, %v3021_v17 }
 0x9d3   : > { %v2960_v3 = vpop.f32.mrf.mxu2  ;;  %v2980_v10 = vpop.f32.mrf.mxu3 }
 0x9d4   : > { %v2961_v36 = vadd.f32 %v4009_v27, %v2960_v3  ;;  %v2981_v15 = vadd.f32 %v4010_v9, %v2980_v10  ;;  %v3240_v3 = vpop.permute.xlu0 %3239 }
 0x9d6   : > { %v3080_v7 = vpop.f32.mrf.mxu0  ;;  %v3100_v38 = vpop.f32.mrf.mxu1  ;;  %v3103_v25 = vpack.c.bf16 %v2961_v36, %v2961_v36  ;;  %v3104_v56 = vpack.c.bf16 %v2981_v15, %v2981_v15 }
 0x9d7   : > { %v3081_v53 = vadd.f32 %v4011_v32, %v3080_v7  ;;  %v3101_v5 = vadd.f32 %v4012_v29, %v3100_v38  ;;  %v3299_v10 = vpop.permute.xlu1 %3298  ;;  %v3243_v32 = vpop.permute.xlu2 %3242  ;;  %v3312_v7 = vperm.slane %v3290_v42, %v4635_v45  ;;  %v3314_v38 = vperm.slane %v3296_v19, %v4635_v45 }
 0x9d9   : > { %v3109_v28 = vpack.c.bf16 %v3081_v53, %v3081_v53  ;;  %v3110_v14 = vpack.c.bf16 %v3101_v5, %v3101_v5  ;;  %v3313_v5 = vperm.slane %v3293_v59, %v4635_v45 }
 0x9db   : > { %v3273_v50 = vsel %vm1155_vm2, %v3109_v28, 0  ;;  %v3332_v6 = vsel %vm1155_vm2, %v3110_v14, 0  ;;  %v3040_v55 = vpop.f32.mrf.mxu2  ;;  %v3060_v51 = vpop.f32.mrf.mxu3  ;;  %v3320_v28 = vsel %vm1140_vm3, %v3313_v5, %v3312_v7  ;;  %v3200_v7 = vperm.slane %v5641_v21, %v4635_v45 }
 0x9dc   : > { %v3041_v49 = vadd.f32 %v4013_v62, %v3040_v55  ;;  %v3061_v54 = vadd.f32 %v4014_v39, %v3060_v51  ;;  %3282 = vmatpush.bf16.xpose.msra.mxu0 %v3273_v50  ;;  %3341 = vmatpush.bf16.xpose.msra.mxu1 %v3332_v6  ;;  %v3254_v62 = vperm.slane %v3234_v40, %v4635_v45 }
 0x9dd   : > { %v3321_v14 = vsel %vm1142_vm4, %v3314_v38, %v3320_v28  ;;  %v3315_v6 = vperm.slane %v3299_v10, %v4635_v45  ;;  %v3257_v51 = vperm.slane %v3243_v32, %v4635_v45  ;;  %v3141_v10 = vperm.slane %v5639_v26, %v4635_v45 }
 0x9de   : > { %v3107_v20 = vpack.c.bf16 %v3041_v49, %v3041_v49  ;;  %v3108_v60 = vpack.c.bf16 %v3061_v54, %v3061_v54  ;;  %v3261_v50 = vsel %vm1140_vm3, %v3254_v62, %v3253_v63  ;;  %v3256_v49 = vperm.slane %v3240_v3, %v4635_v45 }
 0x9df   : > { %v3246_v29 = vpop.permute.xlu1 %3245  ;;  %v3305_v53 = vpop.permute.xlu2 %3304  ;;  %v3262_v55 = vsel %vm1142_vm4, %v3255_v31, %v3261_v50  ;;  %v3322_v54 = vsel %vm1144_vm5, %v3315_v6, %v3321_v14  ;;  %v3199_v32 = vperm.slane %v5637_v0, %v4635_v45  ;;  %v3148_v5 = vsel %vm1150_vm8, %v3141_v10, %v5549_v35 }
 0x9e0   : > { %v3155_v16 = vsel %vm1155_vm2, %v3107_v20, 0  ;;  %v3214_v24 = vsel %vm1155_vm2, %v3108_v60, 0  ;;  %v3317_v46 = vperm.slane %v3305_v53, %v4635_v45  ;;  %v3263_v9 = vsel %vm1144_vm5, %v3256_v49, %v3262_v55 }
 0x9e1   : > { %3164 = vmatpush.bf16.xpose.msrb.mxu2 %v3155_v16  ;;  %3223 = vmatpush.bf16.xpose.msra.mxu3 %v3214_v24  ;;  %v3264_v20 = vsel %vm1146_vm6, %v3257_v51, %v3263_v9  ;;  %v3258_v16 = vperm.slane %v3246_v29, %v4635_v45  ;;  %v3206_v29 = vsel %vm1148_vm7, %v3199_v32, %v5554_v57 }
 0x9e2   : > { %v3142_v26 = vperm.slane %v5643_v34, %v4635_v45  ;;  %v3207_v62 = vsel %vm1150_vm8, %v3200_v7, %v3206_v29  ;;  %v2509_v7 = vsub.f32 %v5354_v18, %v5384_v11 }
 0x9e3   : > { %3884 = vmatmul.msk.bf16.vlgmr.msra.gmra.mxu0 %vm1155_vm2, %v3105_v43  ;;  %3885 = vmatmul.msk.bf16.vlgmr.msra.gmra.mxu1 %vm1155_vm2, %v3106_v33  ;;  %v3265_v36 = vsel %vm1148_vm7, %v3258_v16, %v3264_v20 }
 0x9e4   : > { %v3149_v0 = vsel %vm1152_vm9, %v3142_v26, %v3148_v5  ;;  %v2516_v5 = vsub.f32 %v5354_v18, %v5386_v12 }
 0x9e7   : > { %v3308_v27 = vpop.permute.xlu1 %3307 }
 0x9e8   : > { %3882 = vmatmul.msk.bf16.vlgmr.msrb.gmra.mxu2 %vm1155_vm2, %v3103_v25  ;;  %3883 = vmatmul.msk.bf16.vlgmr.msra.gmra.mxu3 %vm1155_vm2, %v3104_v56  ;;  %v3318_v33 = vperm.slane %v3308_v27, %v4635_v45 }
 0x9e9   : > { %3410 = vmatpush.msra.mxu2 %v3872_v8  ;;  %v3252_v8 = vpop.permute.xlu2 %3251 }
 0x9eb   : > { %3411 = vmatpush.msra.mxu2 %v3871_v44  ;;  %v3260_v44 = vperm.slane %v3252_v8, %v4635_v45 }
 0x9ed   : > { %3412 = vmatpush.msra.mxu2 %v3870_v13 }
 0x9ef   : > { %3413 = vmatpush.msra.mxu2 %v3869_v23 }
 0x9f8   : > { %3886 = vmatmul.msk.f32.vlgmr.msra.gmra.mxu2 %vm926_vm1, %v5568_v52  ;;  %v3302_v52 = vpop.permute.xlu0 %3301 }
 0x9f9   : > { %v3316_v17 = vperm.slane %v3302_v52, %v4635_v45  ;;  %v3201_v52 = vperm.slane %v5645_v47, %v4635_v45 }
 0x9fb   : > { %v3323_v60 = vsel %vm1146_vm6, %v3316_v17, %v3322_v54  ;;  %v3208_v47 = vsel %vm1152_vm9, %v3201_v52, %v3207_v62  ;;  %v2498_v54 = vpop.permute.xlu2 %2497 }
 0x9fc   : > { %v3324_v24 = vsel %vm1148_vm7, %v3317_v46, %v3323_v60 }
 0x9fd   : > { %v3325_v13 = vsel %vm1150_vm8, %v3318_v33, %v3324_v24 }
 0xa00   : > { %v3249_v39 = vpop.permute.xlu0 %3248 }
 0xa01   : > { %v3259_v15 = vperm.slane %v3249_v39, %v4635_v45 }
 0xa03   : > { %v3266_v56 = vsel %vm1150_vm8, %v3259_v15, %v3265_v36  ;;  %v2502_v36 = vsub.f32 %v5354_v18, %v5382_v58 }
 0xa04   : > { %v3267_v23 = vsel %vm1152_vm9, %v3260_v44, %v3266_v56  ;;  %v2494_v44 = vsub.f32 %v5354_v18, %v5380_v37 }
 0xa08   : > { %v3311_v43 = vpop.permute.xlu0 %3310 }
 0xa09   : > { %v3319_v25 = vperm.slane %v3311_v43, %v4635_v45  ;;  %v4015_v45 = vld [vmem:[%s5798_s14 + $0x2] ss:$0 sm:$0xff] }
 0xa0b   : > { %v3326_v40 = vsel %vm1152_vm9, %v3319_v25, %v3325_v13  ;;  %v2500_v25 = vmul.f32 %v2498_v54, %v2494_v44 }
 0xa60   : > { %v3284_v48 = vpop.f32.mrf.mxu0  ;;  %v3343_v42 = vpop.f32.mrf.mxu1 }
 0xa61   : > { %v3285_v59 = vadd.f32 %v3284_v48, %v3267_v23  ;;  %v5677_v30 = vadd.f32 %v3343_v42, %v3326_v40 }
 0xa63   : > { %v3353_v19 = vsel %vm1155_vm2, %v3285_v59, -inf  ;;  %v3356_v3 = vsel %vm1155_vm2, %v5677_v30, -inf }
 0xa64   : > { %3354 = vmax.xlane.f32.xlu0 %v3353_v19  ;;  %3357 = vmax.xlane.f32.xlu1 %v3356_v3 }
 0xa68   : > { %v3286_v38 = vpop.f32.mrf.mxu0  ;;  %v3345_v53 = vpop.f32.mrf.mxu1 }
 0xa6b   : > { %v3166_v39 = vpop.f32.mrf.mxu2  ;;  %v3225_v31 = vpop.f32.mrf.mxu3 }
 0xa6c   : > { %v3167_v57 = vadd.f32 %v3166_v39, %v3149_v0  ;;  %v3226_v63 = vadd.f32 %v3225_v31, %v3208_v47 }
 0xa6e   : > { %v3350_v21 = vsel %vm1155_vm2, %v3226_v63, -inf  ;;  %v3347_v28 = vsel %vm1155_vm2, %v3167_v57, -inf }
 0xa6f   : > { %3351 = vmax.xlane.f32.xlu2 %v3350_v21  ;;  %3348 = vmax.xlane.f32.xlu1 %v3347_v28 }
 0xa73   : > { %v3168_v35 = vpop.f32.mrf.mxu2  ;;  %v3227_v14 = vpop.f32.mrf.mxu3 }
 0xa78   : > { %2504 = vperm.xlu0 %3966, %v5438_v4  }
 0xa7b   : > { %v3415_v34 = vpop.f32.mrf.mxu2 }
 0xa7c   : > { %v3416_v50 = vadd.f32 %v4015_v45, %v3415_v34 }
 0xa7e   : > { %v3887_v6 = vmul.f32 -1.442695, %v3416_v50 }
 0xa80   : > { %3971 = vset.pattern.permute.xlu0 %v4154_v61  ;;  %4062 = vpow2.f32 %v3887_v6 }
 0xa86   : > { %v4063_v55 = vpop.eup %4062 }
 0xa87   : > { %2518 = vperm.xlu2 %3968, %v5438_v4   ;;  %v3421_v51 = vadd.f32 1.0, %v4063_v55 }
 0xa88   : > { %2511 = vperm.xlu1 %3967, %v5438_v4  }
 0xa89   : > { %4064 = vrcp.f32 %v3421_v51  ;;  %v3433_v37 = vand.u32 2147483648, %v3421_v51  ;;  %vm3427_vm3 = vweird.f32 %v3421_v51  ;;  %v3431_v58 = vand.u32 2147483647, %v3421_v51 }
 0xa8b   : > { %v3434_v32 = vor.u32 1.1754944e-38, %v3433_v37  ;;  %vm3432_vm5 = vcmp.eq.f32.partialorder %v3431_v58, 8.507059e+37 }
 0xa8f   : > { %3970 = vset.pattern.permute.xlu2 %v4155_v41  ;;  %v4065_v41 = vpop.eup %4064 }
 0xa90   : > { %3969 = vset.pattern.permute.xlu1 %v5857_v22  ;;  %v3423_v8 = vmul.f32 %v4065_v41, %v3421_v51  ;;  %vm3428_vm1 = vweird.f32 %v4065_v41 }
 0xa91   : > { %vm3429_vm4 = vmor %vm3427_vm3, %vm3428_vm1 }
 0xa92   : > { %v3424_v33 = vsub.f32 1.0, %v3423_v8 }
 0xa94   : > { %v3425_v23 = vmul.f32 %v4065_v41, %v3424_v33 }
 0xa96   : > { %v3426_v19 = vadd.f32 %v4065_v41, %v3425_v23 }
 0xa98   : > { %v3430_v10 = vsel %vm3429_vm4, %v4065_v41, %v3426_v19 }
 0xa99   : > { %v3435_v29 = vsel %vm3432_vm5, %v3434_v32, %v3430_v10 }
 0xad7   : > { %v3355_v49 = vpop.xlane.xlu0 %3354  ;;  %v3358_v17 = vpop.xlane.xlu1 %3357 }
 0xad8   : > { %v3361_v61 = vsub.f32 %v3285_v59, %v3355_v49  ;;  %v3362_v16 = vsub.f32 %v5677_v30, %v3358_v17 }
 0xada   : > { %v3367_v46 = vmul.f32 1.442695, %v3361_v61  ;;  %v3369_v15 = vmul.f32 1.442695, %v3362_v16 }
 0xadc   : > { %4066 = vpow2.f32 %v3367_v46 }
 0xae2   : > { %v5710_v4 = vpop.eup %4066  ;;  %v3352_v22 = vpop.xlane.xlu2 %3351 }
 0xae3   : > { %v3349_v27 = vpop.xlane.xlu1 %3348  ;;  %v3360_v9 = vsub.f32 %v3226_v63, %v3352_v22  ;;  %v3377_v60 = vsel %vm1155_vm2, %v5710_v4, 0.0 }
 0xae4   : > { %v3359_v20 = vsub.f32 %v3167_v57, %v3349_v27  ;;  %3378 = vadd.xlane.f32.xlu0 %v3377_v60 }
 0xae5   : > { %v3365_v24 = vmul.f32 1.442695, %v3360_v9 }
 0xae6   : > { %v3363_v43 = vmul.f32 1.442695, %v3359_v20 }
 0xae7   : > { %4068 = vpow2.f32 %v3365_v24 }
 0xae8   : > { %4070 = vpow2.f32 %v3363_v43 }
 0xae9   : > { %4072 = vpow2.f32 %v3369_v15 }
 0xaea   : > { %v2505_v13 = vpop.permute.xlu0 %2504  ;;  %v2519_v38 = vpop.permute.xlu2 %2518 }
 0xaeb   : > { %v2507_v56 = vmul.f32 %v2505_v13, %v2502_v36  ;;  %v2521_v62 = vmul.f32 %v2519_v38, %v2516_v5 }
 0xaed   : > { %v4069_v48 = vpop.eup %4068  ;;  %v2508_v40 = vadd.f32 %v2507_v56, %v2500_v25 }
 0xaee   : > { %v4071_v42 = vpop.eup %4070  ;;  %v3374_v59 = vsel %vm1155_vm2, %v4069_v48, 0.0 }
 0xaef   : > { %3375 = vadd.xlane.f32.xlu2 %v3374_v59  ;;  %v3371_v30 = vsel %vm1155_vm2, %v4071_v42, 0.0  ;;  %v4073_v3 = vpop.eup %4072 }
 0xaf0   : > { %3372 = vadd.xlane.f32.xlu1 %v3371_v30  ;;  %v3380_v52 = vsel %vm1155_vm2, %v4073_v3, 0.0 }
 0xaf7   : > { %3381 = vadd.xlane.f32.xlu2 %v3380_v52 }
 0xaf8   : > { %3493 = vperm.xlu0 %3971, %v3435_v29  }
 0xafa   : > { %v2512_v53 = vpop.permute.xlu1 %2511 }
 0xafb   : > { %v2514_v26 = vmul.f32 %v2512_v53, %v2509_v7 }
 0xafd   : > { %v2515_v0 = vadd.f32 %v2514_v26, %v2508_v40 }
 0xaff   : > { %v2522_v39 = vadd.f32 %v2521_v62, %v2515_v0 }
 0xb00   : > { %3973 = vset.pattern.permute.xlu0 %v4157_v2 }
 0xb01   : > { %v2523_v47 = vmul.f32 0.25, %v2522_v39 }
 0xb03   : > { %v3789_v31 = vclamps-f32 %v2523_v47, 10.0 }
 0xb05   : > { %v2526_v57 = vmul.f32 %v3789_v31, %v5345_v1 }
 0xb07   : > { %v5729_v63 = vadd.f32 %v2526_v57, %v5354_v18 }
 0xb09   : > { %3479 = vperm.xlu1 %3969, %v3435_v29   ;;  %v3437_v11 = vpack.c.bf16 %v5729_v63, %v5729_v63  ;;  %3513 = vst.msk [vmem:[%s5352_s23 + $0x8] sm:$0xff] %vm3511_vm13, %v5729_v63 }
 0xb0b   : > { %v3455_v12 = vsel %vm1483_vm10, %v3437_v11, 0 }
 0xb0c   : > { %3464 = vmatpush.bf16.msrb.mxu3 %v3455_v12 }
 0xb0f   : > { %3486 = vperm.xlu2 %3970, %v3435_v29  }
 0xb11   : > { %3972 = vset.pattern.permute.xlu1 %v4157_v2 }
 0xb12   : > { %3500 = vperm.xlu1 %3972, %v3435_v29  }
 0xb57   : > { %v3379_v34 = vpop.xlane.xlu0 %3378 }
 0xb62   : > { %v3376_v21 = vpop.xlane.xlu2 %3375 }
 0xb63   : > { %4074 = vrcp.f32 %v3376_v21  ;;  %v3373_v28 = vpop.xlane.xlu1 %3372 }
 0xb64   : > { %4076 = vrcp.f32 %v3373_v28 }
 0xb69   : > { %v4075_v18 = vpop.eup %4074 }
 0xb6a   : > { %v4077_v35 = vpop.eup %4076  ;;  %v3388_v14 = vmul.f32 %v4075_v18, %v4069_v48  ;;  %v3382_v45 = vpop.xlane.xlu2 %3381 }
 0xb6b   : > { %v3387_v50 = vmul.f32 %v4077_v35, %v4071_v42  ;;  %4078 = vrcp.f32 %v3382_v45 }
 0xb6c   : > { %v3392_v6 = vpack.c.bf16 %v3388_v14, %v3388_v14  ;;  %4080 = vrcp.f32 %v3379_v34 }
 0xb6d   : > { %v3391_v55 = vpack.c.bf16 %v3387_v50, %v3387_v50 }
 0xb6e   : > { %v3443_v51 = vunpack.c.l.b16 %v3392_v6 }
 0xb6f   : > { %v3442_v49 = vunpack.c.l.b16 %v3391_v55 }
 0xb71   : > { %v3446_v2 = vpack.c.b16 %v3443_v51, %v3442_v49  ;;  %v4079_v61 = vpop.eup %4078 }
 0xb72   : > { %v4081_v54 = vpop.eup %4080  ;;  %v3390_v46 = vmul.f32 %v4079_v61, %v4073_v3 }
 0xb73   : > { %3888 = vmatmul.msk.bf16.vlgmr.msrb.gmra.mxu3 %vm1155_vm2, %v3446_v2  ;;  %v3389_v17 = vmul.f32 %v4081_v54, %v5710_v4 }
 0xb74   : > { %v3394_v41 = vpack.c.bf16 %v3390_v46, %v3390_v46 }
 0xb75   : > { %v3393_v22 = vpack.c.bf16 %v3389_v17, %v3389_v17 }
 0xb76   : > { %v3445_v27 = vunpack.c.l.b16 %v3394_v41 }
 0xb77   : > { %v3444_v9 = vunpack.c.l.b16 %v3393_v22 }
 0xb79   : > { %v3447_v20 = vpack.c.b16 %v3445_v27, %v3444_v9 }
 0xb83   : > { %3889 = vmatmul.msk.bf16.gmra.mxu3 %vm1155_vm2, %v3447_v20 }
 0xb84   : > { %4111 = shalt.err (!%p4108_p3)
}
 0xb85   : > { %3901 = dma.vmem_to_hbm [thread:$0]  (%p4291_p5), %s3534_s25, 128, %s3536_s8, %s3516_s20   ;;  %v3480_v8 = vpop.permute.xlu1 %3479  ;;  %v3487_v44 = vpop.permute.xlu2 %3486 }
 0xb86   : > { %v3494_v15 = vpop.permute.xlu0 %3493 }
 0xb8d   : > { %v3501_v40 = vpop.permute.xlu1 %3500 }
 0xbf6   : > { %v3466_v4 = vpop.f32.mrf.mxu3 }
 0xbf7   : > { %v3476_v43 = vsub.f32 %v5729_v63, %v3466_v4 }
 0xbf9   : > { %v3482_v13 = vmul.f32 %v3480_v8, %v3476_v43 }
 0xbfe   : > { %v3468_v60 = vpop.f32.mrf.mxu3 }
 0xbff   : > { %v3484_v24 = vsub.f32 %v5729_v63, %v3468_v60 }
 0xc01   : > { %v3489_v36 = vmul.f32 %v3487_v44, %v3484_v24 }
 0xc03   : > { %v3490_v23 = vadd.f32 %v3489_v36, %v3482_v13 }
 0xc06   : > { %v3471_v16 = vpop.f32.mrf.mxu3 }
 0xc07   : > { %v3491_v33 = vsub.f32 %v5729_v63, %v3471_v16 }
 0xc09   : > { %v3496_v25 = vmul.f32 %v3494_v15, %v3491_v33 }
 0xc0b   : > { %v3497_v42 = vadd.f32 %v3496_v25, %v3490_v23 }
 0xc0e   : > { %v3473_v56 = vpop.f32.mrf.mxu3 }
 0xc0f   : > { %v3498_v48 = vsub.f32 %v5729_v63, %v3473_v56 }
 0xc11   : > { %v3503_v59 = vmul.f32 %v3501_v40, %v3498_v48 }
 0xc13   : > { %v3504_v30 = vadd.f32 %v3503_v59, %v3497_v42 }
 0xc15   : > { %v3505_v19 = vmul.f32 0.25, %v3504_v30 }
 0xc17   : > { %v3890_v37 = vclamps-f32 %v3505_v19, 10.0 }
 0xc19   : > { %v3508_v58 = vmul.f32 %v3890_v37, %v5345_v1 }
 0xc1b   : > { %v3509_v3 = vadd.f32 %v3508_v58, %v5729_v63 }
 0xc1d   : > { %3514 = vst.msk [vmem:[%s5352_s23 + $0x10] sm:$0xff] %vm3511_vm13, %v3509_v3 }
 0xc1e PF: > { %s5870_s3 = sld [smem:[#allocation7_spill]] }
 0xc1f   : > { %s5871_s4 = sld [smem:[#allocation5_spill]] }
 0xc24   : > { %p3907_p4 = scmp.ge.s32.totalorder %s5870_s3, 2 }
 0xc25   : > { %s3550_s21 = sand.u32 1, %s5871_s4  }
 0xc26   : > { %p3904_p5 = pnand %p3907_p4, %p4295_p6  ;;  %s3551_s26 = scalar_lea.sflag [#allocation3], %s3550_s21 }
 0xc28   : > { %p3905_p7 = pneg %p3904_p5 }
 0xc2a   : > { %4129 = dma.done.wait (%p3905_p7), %s3551_s26, 128  }
 0xc2b   : > { %4131 = vsyncadd (%p3905_p7), %s3551_s26, 4294967168  ;;  %s5873_s30 = sld [smem:[#allocation8_spill]]  ;;  %s5876_s27 = smov %s4138_s28 }
 0xc2c   : > { %s5874_s29 = sld [smem:[#allocation6_spill]] }
 0xc2d   : > { %s5875_s2 = sld [smem:[#allocation9_spill]] }
 0xc31   : > { %p29_p8 = scmp.ge.s32.totalorder %s5873_s30, 4  }
 0xc32   : > { %s5877_s28 = smov %s5874_s29 }
 0xc33   : > { %s5878_s29 = smov %s5875_s2  ;;  %31 = sbr.rel (!%p29_p8) target bundleno = 11 (0xb), region = 161 }
 0xc38   :  { %3565 = vsyncpa [#allocation3], 1 }
 0xc39   :  { %3567 = vsyncpa [#allocation3 + $0x1], 1 }

</bundles_post_ra>
